<compile_context>
chip_gen: v7x
topology: tpu7x:2x2x1
jax: 0.10.0
libtpu: 0.0.40
codegen_flags: <defaults>
</compile_context>

<pallas_src>
import functools

import jax
import jax.numpy as jnp
from jax.experimental import pallas as pl
from jax.experimental.pallas import tpu as pltpu


def _maxpool2x2_flat(x, H, W):
    """2x2 / stride-2 max pool on a spatially-flattened (H*W, Ci) array.

    Row index is n = h*W + w (row-major flatten of NCHW); output row index is
    (h//2)*(W//2) + (w//2), matching nn.MaxPool2d((2, 2)) + row-major flatten.
    Runs once per batch (prologue only), so the sublane reshuffles here are
    off the per-tile critical path.
    """
    Ci = x.shape[-1]
    x = x.reshape(H, W // 2, 2, Ci)
    x = jnp.maximum(x[:, :, 0, :], x[:, :, 1, :])            # pool over W
    x = x.reshape(H // 2, 2, W // 2, Ci)
    x = jnp.maximum(x[:, 0], x[:, 1])                        # pool over H
    return x.reshape((H // 2) * (W // 2), Ci)


def _attention_kernel(*refs, H, W, pairwise_func, sub_sample,
                      compute_dtype, return_nl_map):
    if return_nl_map:
        (base_ref, ttq_ref, tt_hbm_ref,
         th_w_ref, th_b_ref, ph_w_ref, ph_b_ref, g_w_ref, g_b_ref,
         w_w_ref, w_b_ref,
         z_ref, attn_ref,
         tt_scr, dma_sem, phi_scr, gw_scr) = refs
    else:
        (base_ref, ttq_ref, tt_hbm_ref,
         th_w_ref, th_b_ref, ph_w_ref, ph_b_ref, g_w_ref, g_b_ref,
         w_w_ref, w_b_ref,
         z_ref,
         tt_scr, dma_sem, phi_scr, gw_scr) = refs
        attn_ref = None

    f32 = jnp.float32
    b = pl.program_id(0)
    q = pl.program_id(1)

    def mm(a, bm, dims):
        # cast MXU operands to compute_dtype (bf16 by default), accumulate f32
        return jax.lax.dot_general(
            a.astype(compute_dtype), bm.astype(compute_dtype),
            (dims, ((), ())), preferred_element_type=f32)

    # ---- per-batch prologue: stage tt, build phi and gW = W @ g (resident) --
    @pl.when(q == 0)
    def _():
        cp = pltpu.make_async_copy(tt_hbm_ref.at[b], tt_scr, dma_sem)
        cp.start()
        cp.wait()
        x_tt = tt_scr[...]                                        # (C, Nq)
        if sub_sample:
            # spatial-major 1x1 convs, then 2x2 max pool, stage (Nkv, Ci)
            phi = mm(x_tt, ph_w_ref[...], ((0,), (0,))) + ph_b_ref[...]   # (Nq, Ci)
            g = mm(x_tt, g_w_ref[...], ((0,), (0,))) + g_b_ref[...]       # (Nq, Ci)
            phi = _maxpool2x2_flat(phi, H, W)                             # (Nkv, Ci)
            g = _maxpool2x2_flat(g, H, W)                                 # (Nkv, Ci)
            # fuse output 1x1 conv: gW[c, m] = sum_i W[c, i] * g[m, i]
            gw = mm(w_w_ref[...], g, ((1,), (1,)))                        # (C, Nkv)
        else:
            # no pooling: stage channel-major, lane-dense (Ci, Nq) / (C, Nq)
            phi = mm(ph_w_ref[...], x_tt, ((1,), (0,))) + ph_b_ref[...]   # (Ci, Nq)
            g = mm(g_w_ref[...], x_tt, ((1,), (0,))) + g_b_ref[...]       # (Ci, Nq)
            gw = mm(w_w_ref[...], g, ((1,), (0,)))                        # (C, Nq)
        phi_scr[...] = phi.astype(phi_scr.dtype)
        gw_scr[...] = gw.astype(gw_scr.dtype)

    # ---- per q-tile attention ------------------------------------------------
    x_base = base_ref[0]                                          # (C, TQ)
    theta = mm(x_base, th_w_ref[...], ((0,), (0,))) + th_b_ref[...]   # (TQ, Ci) f32

    if sub_sample:
        f = mm(theta, phi_scr[...], ((1,), (1,)))                 # (TQ, Nkv)
    else:
        f = mm(theta, phi_scr[...], ((1,), (0,)))                 # (TQ, Nkv)

    if pairwise_func == 'dot_product':
        attn = f * (1.0 / f.shape[-1])
    elif pairwise_func == 'softmax':
        # softmax math stays f32 (f is f32-accumulated)
        m_row = jnp.max(f, axis=-1, keepdims=True)
        e = jnp.exp(f - m_row)
        denom = jnp.sum(e, axis=-1, keepdims=True)
        attn = e * pl.reciprocal(denom, approx=True)
    else:
        raise ValueError('Error pairwise function')

    # z tile, channel-major: z[c, n] = sum_m gW[c, m] * attn[n, m] (= W(attn@g))
    z_ct = mm(gw_scr[...], attn, ((1,), (1,)))                    # (C, TQ) f32
    z = z_ct + w_b_ref[...] + ttq_ref[0].astype(f32)              # residual in f32
    z_ref[0] = z.astype(z_ref.dtype)
    if attn_ref is not None:
        attn_ref[0] = attn.astype(attn_ref.dtype)


def _vmem_capacity_bytes():
    default = 128 * 1024 * 1024
    try:
        info = pltpu.get_tpu_info()
    except Exception:
        return default
    for attr in ("vmem_capacity_bytes", "vmem_size_bytes", "vmem_bytes"):
        v = getattr(info, attr, None)
        if v:
            return int(v)
    return default


def attention_forward(base, to_transform, params, *, pairwise_func='softmax',
                      sub_sample=True, return_nl_map=True, q_tile=None,
                      compute_dtype=jnp.bfloat16, nl_map_dtype=jnp.float32):
    """Pallas implementation of _AttentionModule.forward.

    base / to_transform are NCHW (B, C, H, W).
    Returns z [NCHW] (and nl_map when return_nl_map=True).
    """
    assert pairwise_func in ('softmax', 'dot_product')
    B, C, H, W = base.shape
    Ci = params['theta_w'].shape[0]
    Nq = H * W
    if sub_sample:
        assert H % 2 == 0 and W % 2 == 0, "sub_sample=True requires even H and W"
        Nkv = (H // 2) * (W // 2)
    else:
        Nkv = Nq

    out_dtype = to_transform.dtype

    # --- generation-aware VMEM budget and q-tile selection --------------------
    cap = _vmem_capacity_bytes()
    budget = int(0.70 * cap)

    in_b = jnp.dtype(base.dtype).itemsize
    tt_b = jnp.dtype(to_transform.dtype).itemsize
    cd_b = jnp.dtype(compute_dtype).itemsize
    z_b = jnp.dtype(out_dtype).itemsize
    a_b = jnp.dtype(nl_map_dtype).itemsize

    def footprint(tq):
        fixed = C * Nq * tt_b                              # tt staging (single buffer)
        fixed += (Nkv * Ci + C * Nkv) * cd_b               # phi + gW scratch
        fixed += 2 * (3 * C * Ci + 3 * Ci + 2 * C) * 4     # weights/biases (tiny)
        per = 2 * C * tq * (in_b + tt_b + z_b)             # base / tt tile / z (x2 bufs)
        if return_nl_map:
            per += 2 * tq * Nkv * a_b                      # nl_map out tile (x2 bufs)
        work = tq * Nkv * 8 + tq * max(Ci, 128) * 8        # live f/attn/theta vregs
        return fixed + per + work

    if q_tile is None:
        # prefer the largest lane-dense tile that fits the budget
        cands = [Nq] + [t for t in (1024, 512, 256, 128) if Nq % t == 0 and t < Nq]
        q_tile = cands[-1]
        for t in cands:
            if footprint(t) <= budget:
                q_tile = t
                break
    if q_tile != Nq:
        assert q_tile % 128 == 0 and Nq % q_tile == 0
    n_q = Nq // q_tile

    fp = footprint(q_tile)
    if fp > int(0.95 * cap):
        # No kv tiling in this kernel: explicit scalability limit.
        raise ValueError(
            f"Attention VMEM footprint ~{fp >> 20} MiB exceeds VMEM capacity "
            f"({cap >> 20} MiB); enable sub_sample or reduce spatial size.")
    vmem_limit = int(min(max(budget, int(1.25 * fp)), int(0.9 * cap)))

    # Channel-major spatial flatten (free reshape of NCHW, no transpose op).
    base_cn = base.reshape(B, C, Nq)
    tt_cn = to_transform.reshape(B, C, Nq)

    # Weight layouts for the kernel.
    th_w = jnp.transpose(params['theta_w'])        # (C, Ci)
    th_b = params['theta_b'].reshape(1, Ci)
    w_w = params['W_w']                            # (C, Ci)
    w_b = params['W_b'].reshape(C, 1)
    if sub_sample:
        ph_w = jnp.transpose(params['phi_w'])      # (C, Ci)  -> (Nq, Ci) outputs
        ph_b = params['phi_b'].reshape(1, Ci)
        g_w = jnp.transpose(params['g_w'])         # (C, Ci)
        g_b = params['g_b'].reshape(1, Ci)
        phi_scr_shape = (Nkv, Ci)
    else:
        ph_w = params['phi_w']                     # (Ci, C)  -> (Ci, Nq) outputs
        ph_b = params['phi_b'].reshape(Ci, 1)
        g_w = params['g_w']                        # (Ci, C)
        g_b = params['g_b'].reshape(Ci, 1)
        phi_scr_shape = (Ci, Nq)

    kernel = functools.partial(
        _attention_kernel, H=H, W=W, pairwise_func=pairwise_func,
        sub_sample=sub_sample, compute_dtype=compute_dtype,
        return_nl_map=return_nl_map)

    def full_spec(shape):
        return pl.BlockSpec(shape, lambda b, q: tuple(0 for _ in shape))

    in_specs = [
        pl.BlockSpec((1, C, q_tile), lambda b, q: (b, 0, q)),   # base (q tile)
        pl.BlockSpec((1, C, q_tile), lambda b, q: (b, 0, q)),   # tt tile (residual)
        pl.BlockSpec(memory_space=pl.ANY),                      # tt full (HBM, manual DMA)
        full_spec(th_w.shape), full_spec(th_b.shape),           # theta
        full_spec(ph_w.shape), full_spec(ph_b.shape),           # phi
        full_spec(g_w.shape), full_spec(g_b.shape),             # g
        full_spec(w_w.shape), full_spec(w_b.shape),             # W
    ]

    z_spec = pl.BlockSpec((1, C, q_tile), lambda b, q: (b, 0, q))
    z_shape = jax.ShapeDtypeStruct((B, C, Nq), out_dtype)
    if return_nl_map:
        out_specs = [z_spec, pl.BlockSpec((1, q_tile, Nkv), lambda b, q: (b, q, 0))]
        out_shape = [z_shape, jax.ShapeDtypeStruct((B, Nq, Nkv), nl_map_dtype)]
    else:
        out_specs = z_spec
        out_shape = z_shape

    scratch_shapes = [
        pltpu.VMEM((C, Nq), to_transform.dtype),    # tt staging (single buffer)
        pltpu.SemaphoreType.DMA(()),                # staging DMA completion
        pltpu.VMEM(phi_scr_shape, compute_dtype),   # phi (per batch)
        pltpu.VMEM((C, Nkv), compute_dtype),        # gW  (per batch)
    ]

    result = pl.pallas_call(
        kernel,
        grid=(B, n_q),
        in_specs=in_specs,
        out_specs=out_specs,
        out_shape=out_shape,
        scratch_shapes=scratch_shapes,
        compiler_params=pltpu.CompilerParams(
            dimension_semantics=("parallel", "arbitrary"),
            vmem_limit_bytes=vmem_limit),
    )(base_cn, tt_cn, tt_cn, th_w, th_b, ph_w, ph_b, g_w, g_b, w_w, w_b)

    if return_nl_map:
        z_cn, attn = result
        return z_cn.reshape(B, C, H, W), attn
    return result.reshape(B, C, H, W)


# ---------------- parameter init (mirrors nn.Conv2d defaults + zero-init W) ---

def init_params(key, in_channels, inter_channels):
    ks = jax.random.split(key, 6)

    def conv_init(kw_, kb_, c_in, c_out):
        bound = 1.0 / (c_in ** 0.5)
        w = jax.random.uniform(kw_, (c_out, c_in), jnp.float32, -bound, bound)
        b = jax.random.uniform(kb_, (c_out,), jnp.float32, -bound, bound)
        return w, b

    g_w, g_b = conv_init(ks[0], ks[1], in_channels, inter_channels)
    theta_w, theta_b = conv_init(ks[2], ks[3], in_channels, inter_channels)
    phi_w, phi_b = conv_init(ks[4], ks[5], in_channels, inter_channels)
    # The W conv is zero-initialized in the PyTorch module.
    W_w = jnp.zeros((in_channels, inter_channels), jnp.float32)
    W_b = jnp.zeros((in_channels,), jnp.float32)
    return dict(g_w=g_w, g_b=g_b, theta_w=theta_w, theta_b=theta_b,
                phi_w=phi_w, phi_b=phi_b, W_w=W_w, W_b=W_b)


# ---------------- pure-JAX reference (mirrors the PyTorch forward) -------------

def reference_forward(base, tt, params, *, pairwise_func='softmax', sub_sample=True):
    B, C, H, W = base.shape
    Ci = params['theta_w'].shape[0]

    def conv1x1(x, w, b):   # x NCHW, w (Cout, Cin), b (Cout,)
        return jnp.einsum('bchw,oc->bohw', x, w) + b.reshape(1, -1, 1, 1)

    def pool(x):            # NCHW 2x2 max pool, stride 2
        Bx, Cx, Hx, Wx = x.shape
        return x.reshape(Bx, Cx, Hx // 2, 2, Wx // 2, 2).max(axis=(3, 5))

    g = conv1x1(tt, params['g_w'], params['g_b'])
    phi = conv1x1(tt, params['phi_w'], params['phi_b'])
    if sub_sample:
        g = pool(g)
        phi = pool(phi)
    theta = conv1x1(base, params['theta_w'], params['theta_b'])

    g_f = jnp.transpose(g.reshape(B, Ci, -1), (0, 2, 1))
    theta_f = jnp.transpose(theta.reshape(B, Ci, -1), (0, 2, 1))
    phi_f = phi.reshape(B, Ci, -1)
    f = theta_f @ phi_f
    if pairwise_func == 'dot_product':
        attn = f / f.shape[-1]
    else:
        attn = jax.nn.softmax(f, axis=-1)
    y = attn @ g_f
    y = jnp.transpose(y, (0, 2, 1)).reshape(B, Ci, H, W)
    w_y = conv1x1(y, params['W_w'], params['W_b'])
    z = w_y + tt
    return z, attn


if __name__ == "__main__":
    key = jax.random.PRNGKey(0)
    kb, kt, kp, kw, kwb = jax.random.split(key, 5)

    B, C, H, W = 2, 8, 16, 16
    Ci = C // 2  # inter_channels default: in_channels // 2

    base = jax.random.normal(kb, (B, C, H, W), jnp.float32)
    to_transform = jax.random.normal(kt, (B, C, H, W), jnp.float32)
    params = init_params(kp, C, Ci)
    # Also test with a non-zero W so the fused attn @ (W @ g) path is exercised
    # (with the module's zero-init W, z == to_transform trivially).
    params_nz = dict(params,
                     W_w=0.1 * jax.random.normal(kw, (C, Ci), jnp.float32),
                     W_b=0.1 * jax.random.normal(kwb, (C,), jnp.float32))

    for p in (params, params_nz):
        for pw in ('softmax', 'dot_product'):
            for ss in (True, False):
                z_ref, attn_ref = reference_forward(base, to_transform, p,
                                                    pairwise_func=pw, sub_sample=ss)

                # f32 MXU path, explicit q tiling -> tight tolerance
                z, attn = attention_forward(base, to_transform, p,
                                            pairwise_func=pw, sub_sample=ss,
                                            q_tile=128,
                                            compute_dtype=jnp.float32)
                jax.block_until_ready((z, attn))
                assert jnp.allclose(z, z_ref, atol=1e-3, rtol=1e-3), \
                    f"z mismatch f32 (pw={pw}, sub_sample={ss})"
                assert jnp.allclose(attn, attn_ref, atol=1e-3, rtol=1e-3), \
                    f"nl_map mismatch f32 (pw={pw}, sub_sample={ss})"

                # default bf16 MXU path + bf16 nl_map writeback -> loose tolerance
                z2, attn2 = attention_forward(base, to_transform, p,
                                              pairwise_func=pw, sub_sample=ss,
                                              nl_map_dtype=jnp.bfloat16)
                jax.block_until_ready((z2, attn2))
                assert jnp.allclose(z2, z_ref, atol=5e-2, rtol=5e-2), \
                    f"z mismatch bf16 (pw={pw}, sub_sample={ss})"
                assert jnp.allclose(attn2.astype(jnp.float32), attn_ref,
                                    atol=3e-2, rtol=3e-2), \
                    f"nl_map mismatch bf16 (pw={pw}, sub_sample={ss})"

                # z-only path (drops the nl_map output + its HBM writeback)
                z3 = attention_forward(base, to_transform, p,
                                       pairwise_func=pw, sub_sample=ss,
                                       return_nl_map=False,
                                       compute_dtype=jnp.float32)
                jax.block_until_ready(z3)
                assert jnp.allclose(z3, z_ref, atol=1e-3, rtol=1e-3), \
                    f"z mismatch (no nl_map) (pw={pw}, sub_sample={ss})"

    print("KERNEL_OK")
</pallas_src>

<mosaic_0001>
module attributes {stable_mosaic.version = 11 : i64} {
  func.func @_attention_kernel(%arg0: i32, %arg1: i32, %arg2: memref<1x8x128xf32, #tpu.memory_space<vmem>>, %arg3: memref<1x8x128xf32, #tpu.memory_space<vmem>>, %arg4: memref<2x8x256xf32, #tpu.memory_space<any>>, %arg5: memref<8x4xf32, #tpu.memory_space<vmem>>, %arg6: memref<1x4xf32, #tpu.memory_space<vmem>>, %arg7: memref<8x4xf32, #tpu.memory_space<vmem>>, %arg8: memref<1x4xf32, #tpu.memory_space<vmem>>, %arg9: memref<8x4xf32, #tpu.memory_space<vmem>>, %arg10: memref<1x4xf32, #tpu.memory_space<vmem>>, %arg11: memref<8x4xf32, #tpu.memory_space<vmem>>, %arg12: memref<8x1xf32, #tpu.memory_space<vmem>>, %arg13: memref<1x8x128xf32, #tpu.memory_space<vmem>>, %arg14: memref<1x128x64xf32, #tpu.memory_space<vmem>>, %arg15: memref<8x256xf32, #tpu.memory_space<vmem>>, %arg16: memref<!tpu.dma_semaphore, #tpu.memory_space<semaphore_mem>>, %arg17: memref<64x4xf32, #tpu.memory_space<vmem>>, %arg18: memref<8x64xf32, #tpu.memory_space<vmem>>) attributes {dimension_semantics = [#tpu.dimension_semantics<parallel>, #tpu.dimension_semantics<arbitrary>], iteration_bounds = array<i64: 2, 2>, scalar_prefetch = 0 : i64, scratch_operands = 4 : i64, tpu.core_type = #tpu.core_type<tc>, window_params = [{transform_indices = @transform_0, window_bounds = array<i64: 1, 8, 128>}, {transform_indices = @transform_1, window_bounds = array<i64: 1, 8, 128>}, {}, {pipeline_mode = #tpu.pipeline_mode<synchronous>, transform_indices = @transform_3, window_bounds = array<i64: 8, 4>}, {pipeline_mode = #tpu.pipeline_mode<synchronous>, transform_indices = @transform_4, window_bounds = array<i64: 1, 4>}, {pipeline_mode = #tpu.pipeline_mode<synchronous>, transform_indices = @transform_5, window_bounds = array<i64: 8, 4>}, {pipeline_mode = #tpu.pipeline_mode<synchronous>, transform_indices = @transform_6, window_bounds = array<i64: 1, 4>}, {pipeline_mode = #tpu.pipeline_mode<synchronous>, transform_indices = @transform_7, window_bounds = array<i64: 8, 4>}, {pipeline_mode = #tpu.pipeline_mode<synchronous>, transform_indices = @transform_8, window_bounds = array<i64: 1, 4>}, {pipeline_mode = #tpu.pipeline_mode<synchronous>, transform_indices = @transform_9, window_bounds = array<i64: 8, 4>}, {pipeline_mode = #tpu.pipeline_mode<synchronous>, transform_indices = @transform_10, window_bounds = array<i64: 8, 1>}, {transform_indices = @transform_11, window_bounds = array<i64: 1, 8, 128>}, {transform_indices = @transform_12, window_bounds = array<i64: 1, 128, 64>}]} {
    %c0_i32 = arith.constant 0 : i32
    %0 = arith.cmpi eq, %arg1, %c0_i32 : i32
    %1 = arith.extui %0 : i1 to i32
    %c0_i32_0 = arith.constant 0 : i32
    %2 = arith.cmpi ne, %1, %c0_i32_0 : i32
    scf.if %2 {
      %c0_i32_26 = arith.constant 0 : i32
      %c0_i32_27 = arith.constant 0 : i32
      %36 = tpu.memref_slice %arg4[%arg0, %c0_i32_26, %c0_i32_27] : memref<2x8x256xf32, #tpu.memory_space<any>> -> memref<1x8x256xf32, #tpu.memory_space<any>>
      %37 = tpu.memref_squeeze %36 : memref<1x8x256xf32, #tpu.memory_space<any>> -> memref<8x256xf32, #tpu.memory_space<any>>
      tpu.enqueue_dma source(%37 : memref<8x256xf32, #tpu.memory_space<any>>) target(%arg15 : memref<8x256xf32, #tpu.memory_space<vmem>>) target_semaphore(%arg16 : memref<!tpu.dma_semaphore, #tpu.memory_space<semaphore_mem>>)
      %c0_i32_28 = arith.constant 0 : i32
      %c0_i32_29 = arith.constant 0 : i32
      %38 = tpu.memref_slice %arg4[%arg0, %c0_i32_28, %c0_i32_29] : memref<2x8x256xf32, #tpu.memory_space<any>> -> memref<1x8x256xf32, #tpu.memory_space<any>>
      %39 = tpu.memref_squeeze %38 : memref<1x8x256xf32, #tpu.memory_space<any>> -> memref<8x256xf32, #tpu.memory_space<any>>
      tpu.wait_dma2 semaphore(%arg16 : memref<!tpu.dma_semaphore, #tpu.memory_space<semaphore_mem>>) src(%39 : memref<8x256xf32, #tpu.memory_space<any>>) dst(%arg15 : memref<8x256xf32, #tpu.memory_space<vmem>>)
      %c0_30 = arith.constant 0 : index
      %c0_31 = arith.constant 0 : index
      %40 = vector.load %arg15[%c0_30, %c0_31] : memref<8x256xf32, #tpu.memory_space<vmem>>, vector<8x256xf32>
      %c0_32 = arith.constant 0 : index
      %c0_33 = arith.constant 0 : index
      %41 = vector.load %arg7[%c0_32, %c0_33] : memref<8x4xf32, #tpu.memory_space<vmem>>, vector<8x4xf32>
      %cst_34 = arith.constant dense<0.000000e+00> : vector<256x4xf32>
      %42 = tpu.matmul %40, %41, %cst_34 {dimension_numbers = #tpu.dot_dimension_numbers<[0], [0], [1], [1], [0, 1, 1, 1], [], []>} : vector<8x256xf32>, vector<8x4xf32>, vector<256x4xf32> -> vector<256x4xf32>
      %c0_35 = arith.constant 0 : index
      %c0_36 = arith.constant 0 : index
      %43 = vector.load %arg8[%c0_35, %c0_36] : memref<1x4xf32, #tpu.memory_space<vmem>>, vector<1x4xf32>
      %44 = vector.broadcast %43 : vector<1x4xf32> to vector<256x4xf32>
      %45 = arith.addf %42, %44 : vector<256x4xf32>
      %c0_37 = arith.constant 0 : index
      %c0_38 = arith.constant 0 : index
      %46 = vector.load %arg9[%c0_37, %c0_38] : memref<8x4xf32, #tpu.memory_space<vmem>>, vector<8x4xf32>
      %cst_39 = arith.constant dense<0.000000e+00> : vector<256x4xf32>
      %47 = tpu.matmul %40, %46, %cst_39 {dimension_numbers = #tpu.dot_dimension_numbers<[0], [0], [1], [1], [0, 1, 1, 1], [], []>} : vector<8x256xf32>, vector<8x4xf32>, vector<256x4xf32> -> vector<256x4xf32>
      %c0_40 = arith.constant 0 : index
      %c0_41 = arith.constant 0 : index
      %48 = vector.load %arg10[%c0_40, %c0_41] : memref<1x4xf32, #tpu.memory_space<vmem>>, vector<1x4xf32>
      %49 = vector.broadcast %48 : vector<1x4xf32> to vector<256x4xf32>
      %50 = arith.addf %47, %49 : vector<256x4xf32>
      %51 = vector.shape_cast %45 : vector<256x4xf32> to vector<16x8x2x4xf32>
      %52 = vector.extract_strided_slice %51 {offsets = [0, 0, 0, 0], sizes = [16, 8, 1, 4], strides = [1, 1, 1, 1]} : vector<16x8x2x4xf32> to vector<16x8x1x4xf32>
      %53 = vector.shape_cast %52 : vector<16x8x1x4xf32> to vector<16x8x4xf32>
      %54 = vector.extract_strided_slice %51 {offsets = [0, 0, 1, 0], sizes = [16, 8, 1, 4], strides = [1, 1, 1, 1]} : vector<16x8x2x4xf32> to vector<16x8x1x4xf32>
      %55 = vector.shape_cast %54 : vector<16x8x1x4xf32> to vector<16x8x4xf32>
      %56 = arith.maximumf %53, %55 : vector<16x8x4xf32>
      %57 = vector.shape_cast %56 : vector<16x8x4xf32> to vector<8x2x8x4xf32>
      %58 = vector.extract_strided_slice %57 {offsets = [0, 0, 0, 0], sizes = [8, 1, 8, 4], strides = [1, 1, 1, 1]} : vector<8x2x8x4xf32> to vector<8x1x8x4xf32>
      %59 = vector.shape_cast %58 : vector<8x1x8x4xf32> to vector<8x8x4xf32>
      %60 = vector.extract_strided_slice %57 {offsets = [0, 1, 0, 0], sizes = [8, 1, 8, 4], strides = [1, 1, 1, 1]} : vector<8x2x8x4xf32> to vector<8x1x8x4xf32>
      %61 = vector.shape_cast %60 : vector<8x1x8x4xf32> to vector<8x8x4xf32>
      %62 = arith.maximumf %59, %61 : vector<8x8x4xf32>
      %63 = vector.shape_cast %62 : vector<8x8x4xf32> to vector<64x4xf32>
      %64 = vector.shape_cast %50 : vector<256x4xf32> to vector<16x8x2x4xf32>
      %65 = vector.extract_strided_slice %64 {offsets = [0, 0, 0, 0], sizes = [16, 8, 1, 4], strides = [1, 1, 1, 1]} : vector<16x8x2x4xf32> to vector<16x8x1x4xf32>
      %66 = vector.shape_cast %65 : vector<16x8x1x4xf32> to vector<16x8x4xf32>
      %67 = vector.extract_strided_slice %64 {offsets = [0, 0, 1, 0], sizes = [16, 8, 1, 4], strides = [1, 1, 1, 1]} : vector<16x8x2x4xf32> to vector<16x8x1x4xf32>
      %68 = vector.shape_cast %67 : vector<16x8x1x4xf32> to vector<16x8x4xf32>
      %69 = arith.maximumf %66, %68 : vector<16x8x4xf32>
      %70 = vector.shape_cast %69 : vector<16x8x4xf32> to vector<8x2x8x4xf32>
      %71 = vector.extract_strided_slice %70 {offsets = [0, 0, 0, 0], sizes = [8, 1, 8, 4], strides = [1, 1, 1, 1]} : vector<8x2x8x4xf32> to vector<8x1x8x4xf32>
      %72 = vector.shape_cast %71 : vector<8x1x8x4xf32> to vector<8x8x4xf32>
      %73 = vector.extract_strided_slice %70 {offsets = [0, 1, 0, 0], sizes = [8, 1, 8, 4], strides = [1, 1, 1, 1]} : vector<8x2x8x4xf32> to vector<8x1x8x4xf32>
      %74 = vector.shape_cast %73 : vector<8x1x8x4xf32> to vector<8x8x4xf32>
      %75 = arith.maximumf %72, %74 : vector<8x8x4xf32>
      %76 = vector.shape_cast %75 : vector<8x8x4xf32> to vector<64x4xf32>
      %c0_42 = arith.constant 0 : index
      %c0_43 = arith.constant 0 : index
      %77 = vector.load %arg11[%c0_42, %c0_43] : memref<8x4xf32, #tpu.memory_space<vmem>>, vector<8x4xf32>
      %cst_44 = arith.constant dense<0.000000e+00> : vector<8x64xf32>
      %78 = tpu.matmul %77, %76, %cst_44 {dimension_numbers = #tpu.dot_dimension_numbers<[1], [1], [0], [0], [0, 0, 1, 0], [], []>} : vector<8x4xf32>, vector<64x4xf32>, vector<8x64xf32> -> vector<8x64xf32>
      %c0_45 = arith.constant 0 : index
      %c0_46 = arith.constant 0 : index
      %79 = vector.load %arg17[%c0_45, %c0_46] : memref<64x4xf32, #tpu.memory_space<vmem>>, vector<64x4xf32>
      tpu.vector_store %arg17[%c0_45, %c0_46], %63 {strides = array<i32>} : memref<64x4xf32, #tpu.memory_space<vmem>>, vector<64x4xf32>,
      %c0_47 = arith.constant 0 : index
      %c0_48 = arith.constant 0 : index
      %80 = vector.load %arg18[%c0_47, %c0_48] : memref<8x64xf32, #tpu.memory_space<vmem>>, vector<8x64xf32>
      tpu.vector_store %arg18[%c0_47, %c0_48], %78 {strides = array<i32>} : memref<8x64xf32, #tpu.memory_space<vmem>>, vector<8x64xf32>,
    } else {
    }
    %c0 = arith.constant 0 : index
    %c0_1 = arith.constant 0 : index
    %c0_2 = arith.constant 0 : index
    %3 = vector.load %arg2[%c0, %c0_1, %c0_2] : memref<1x8x128xf32, #tpu.memory_space<vmem>>, vector<1x8x128xf32>
    %4 = vector.shape_cast %3 : vector<1x8x128xf32> to vector<8x128xf32>
    %c0_3 = arith.constant 0 : index
    %c0_4 = arith.constant 0 : index
    %5 = vector.load %arg5[%c0_3, %c0_4] : memref<8x4xf32, #tpu.memory_space<vmem>>, vector<8x4xf32>
    %cst = arith.constant dense<0.000000e+00> : vector<128x4xf32>
    %6 = tpu.matmul %4, %5, %cst {dimension_numbers = #tpu.dot_dimension_numbers<[0], [0], [1], [1], [0, 1, 1, 1], [], []>} : vector<8x128xf32>, vector<8x4xf32>, vector<128x4xf32> -> vector<128x4xf32>
    %c0_5 = arith.constant 0 : index
    %c0_6 = arith.constant 0 : index
    %7 = vector.load %arg6[%c0_5, %c0_6] : memref<1x4xf32, #tpu.memory_space<vmem>>, vector<1x4xf32>
    %8 = vector.broadcast %7 : vector<1x4xf32> to vector<128x4xf32>
    %9 = arith.addf %6, %8 : vector<128x4xf32>
    %c0_7 = arith.constant 0 : index
    %c0_8 = arith.constant 0 : index
    %10 = vector.load %arg17[%c0_7, %c0_8] : memref<64x4xf32, #tpu.memory_space<vmem>>, vector<64x4xf32>
    %cst_9 = arith.constant dense<0.000000e+00> : vector<128x64xf32>
    %11 = tpu.matmul %9, %10, %cst_9 {dimension_numbers = #tpu.dot_dimension_numbers<[1], [1], [0], [0], [0, 0, 1, 0], [], []>} : vector<128x4xf32>, vector<64x4xf32>, vector<128x64xf32> -> vector<128x64xf32>
    %cst_10 = arith.constant dense<0xFF800000> : vector<128xf32>
    %12 = vector.multi_reduction <maximumf>, %11, %cst_10 [1] : vector<128x64xf32> to vector<128xf32>
    %13 = vector.shape_cast %12 : vector<128xf32> to vector<128x1xf32>
    %14 = vector.broadcast %13 : vector<128x1xf32> to vector<128x64xf32>
    %15 = arith.subf %11, %14 : vector<128x64xf32>
    %16 = math.exp %15 : vector<128x64xf32>
    %cst_11 = arith.constant dense<0.000000e+00> : vector<128xf32>
    %17 = vector.multi_reduction <add>, %16, %cst_11 [1] : vector<128x64xf32> to vector<128xf32>
    %18 = vector.shape_cast %17 : vector<128xf32> to vector<128x1xf32>
    %19 = tpu.reciprocal %18 {approx = true} : vector<128x1xf32> -> vector<128x1xf32>
    %20 = vector.broadcast %19 : vector<128x1xf32> to vector<128x64xf32>
    %21 = arith.mulf %16, %20 : vector<128x64xf32>
    %c0_12 = arith.constant 0 : index
    %c0_13 = arith.constant 0 : index
    %22 = vector.load %arg18[%c0_12, %c0_13] : memref<8x64xf32, #tpu.memory_space<vmem>>, vector<8x64xf32>
    %cst_14 = arith.constant dense<0.000000e+00> : vector<8x128xf32>
    %23 = tpu.matmul %22, %21, %cst_14 {dimension_numbers = #tpu.dot_dimension_numbers<[1], [1], [0], [0], [0, 0, 1, 0], [], []>} : vector<8x64xf32>, vector<128x64xf32>, vector<8x128xf32> -> vector<8x128xf32>
    %c0_15 = arith.constant 0 : index
    %c0_16 = arith.constant 0 : index
    %24 = vector.load %arg12[%c0_15, %c0_16] : memref<8x1xf32, #tpu.memory_space<vmem>>, vector<8x1xf32>
    %25 = vector.broadcast %24 : vector<8x1xf32> to vector<8x128xf32>
    %26 = arith.addf %23, %25 : vector<8x128xf32>
    %c0_17 = arith.constant 0 : index
    %c0_18 = arith.constant 0 : index
    %c0_19 = arith.constant 0 : index
    %27 = vector.load %arg3[%c0_17, %c0_18, %c0_19] : memref<1x8x128xf32, #tpu.memory_space<vmem>>, vector<1x8x128xf32>
    %28 = vector.shape_cast %27 : vector<1x8x128xf32> to vector<8x128xf32>
    %29 = arith.addf %26, %28 : vector<8x128xf32>
    %c0_20 = arith.constant 0 : index
    %c0_21 = arith.constant 0 : index
    %c0_22 = arith.constant 0 : index
    %30 = vector.load %arg13[%c0_20, %c0_21, %c0_22] : memref<1x8x128xf32, #tpu.memory_space<vmem>>, vector<1x8x128xf32>
    %31 = vector.shape_cast %30 : vector<1x8x128xf32> to vector<8x128xf32>
    %32 = vector.shape_cast %29 : vector<8x128xf32> to vector<1x8x128xf32>
    tpu.vector_store %arg13[%c0_20, %c0_21, %c0_22], %32 {strides = array<i32>} : memref<1x8x128xf32, #tpu.memory_space<vmem>>, vector<1x8x128xf32>,
    %c0_23 = arith.constant 0 : index
    %c0_24 = arith.constant 0 : index
    %c0_25 = arith.constant 0 : index
    %33 = vector.load %arg14[%c0_23, %c0_24, %c0_25] : memref<1x128x64xf32, #tpu.memory_space<vmem>>, vector<1x128x64xf32>
    %34 = vector.shape_cast %33 : vector<1x128x64xf32> to vector<128x64xf32>
    %35 = vector.shape_cast %21 : vector<128x64xf32> to vector<1x128x64xf32>
    tpu.vector_store %arg14[%c0_23, %c0_24, %c0_25], %35 {strides = array<i32>} : memref<1x128x64xf32, #tpu.memory_space<vmem>>, vector<1x128x64xf32>,
    return
  }
  func.func @transform_0(%arg0: i32, %arg1: i32) -> (i32, i32, i32) {
    %c0_i32 = arith.constant 0 : i32
    %c0_i32_0 = arith.constant 0 : i32
    return %arg0, %c0_i32, %arg1 : i32, i32, i32
  }
  func.func @transform_1(%arg0: i32, %arg1: i32) -> (i32, i32, i32) {
    %c0_i32 = arith.constant 0 : i32
    %c0_i32_0 = arith.constant 0 : i32
    return %arg0, %c0_i32, %arg1 : i32, i32, i32
  }
  func.func @transform_3(%arg0: i32, %arg1: i32) -> (i32, i32) {
    %c0_i32 = arith.constant 0 : i32
    %c0_i32_0 = arith.constant 0 : i32
    %c0_i32_1 = arith.constant 0 : i32
    return %c0_i32, %c0_i32_0 : i32, i32
  }
  func.func @transform_4(%arg0: i32, %arg1: i32) -> (i32, i32) {
    %c0_i32 = arith.constant 0 : i32
    %c0_i32_0 = arith.constant 0 : i32
    %c0_i32_1 = arith.constant 0 : i32
    return %c0_i32, %c0_i32_0 : i32, i32
  }
  func.func @transform_5(%arg0: i32, %arg1: i32) -> (i32, i32) {
    %c0_i32 = arith.constant 0 : i32
    %c0_i32_0 = arith.constant 0 : i32
    %c0_i32_1 = arith.constant 0 : i32
    return %c0_i32, %c0_i32_0 : i32, i32
  }
  func.func @transform_6(%arg0: i32, %arg1: i32) -> (i32, i32) {
    %c0_i32 = arith.constant 0 : i32
    %c0_i32_0 = arith.constant 0 : i32
    %c0_i32_1 = arith.constant 0 : i32
    return %c0_i32, %c0_i32_0 : i32, i32
  }
  func.func @transform_7(%arg0: i32, %arg1: i32) -> (i32, i32) {
    %c0_i32 = arith.constant 0 : i32
    %c0_i32_0 = arith.constant 0 : i32
    %c0_i32_1 = arith.constant 0 : i32
    return %c0_i32, %c0_i32_0 : i32, i32
  }
  func.func @transform_8(%arg0: i32, %arg1: i32) -> (i32, i32) {
    %c0_i32 = arith.constant 0 : i32
    %c0_i32_0 = arith.constant 0 : i32
    %c0_i32_1 = arith.constant 0 : i32
    return %c0_i32, %c0_i32_0 : i32, i32
  }
  func.func @transform_9(%arg0: i32, %arg1: i32) -> (i32, i32) {
    %c0_i32 = arith.constant 0 : i32
    %c0_i32_0 = arith.constant 0 : i32
    %c0_i32_1 = arith.constant 0 : i32
    return %c0_i32, %c0_i32_0 : i32, i32
  }
  func.func @transform_10(%arg0: i32, %arg1: i32) -> (i32, i32) {
    %c0_i32 = arith.constant 0 : i32
    %c0_i32_0 = arith.constant 0 : i32
    %c0_i32_1 = arith.constant 0 : i32
    return %c0_i32, %c0_i32_0 : i32, i32
  }
  func.func @transform_11(%arg0: i32, %arg1: i32) -> (i32, i32, i32) {
    %c0_i32 = arith.constant 0 : i32
    %c0_i32_0 = arith.constant 0 : i32
    return %arg0, %c0_i32, %arg1 : i32, i32, i32
  }
  func.func @transform_12(%arg0: i32, %arg1: i32) -> (i32, i32, i32) {
    %c0_i32 = arith.constant 0 : i32
    %c0_i32_0 = arith.constant 0 : i32
    return %arg0, %arg1, %c0_i32 : i32, i32, i32
  }
}

</mosaic_0001>

<bundles_post_ra>
// kernel: tpu_custom_call.1
= control target key start
LH: loop header
LB: loop body
LE: loop exit
PB: predicated region body
PF: predicated region fallthrough
CT: control target
= control target key end

     0   :  { %s9473_s0 = inlined_call_operand.hbm [shape: f32[2,8,256], index: 0, kind: input, shape index: {}]   ;;  %s9474_s1 = inlined_call_operand.hbm [shape: f32[2,8,256], index: 1, kind: input, shape index: {}]   ;;  %s9475_s2 = inlined_call_operand.hbm [shape: f32[2,8,256], index: 2, kind: input, shape index: {}]   ;;  %s9476_s3 = inlined_call_operand.hbm [shape: f32[8,4], index: 3, kind: input, shape index: {}]   ;;  %s9477_s4 = inlined_call_operand.hbm [shape: f32[1,4], index: 4, kind: input, shape index: {}]   ;;  %s9478_s5 = inlined_call_operand.hbm [shape: f32[8,4], index: 5, kind: input, shape index: {}]   ;;  %s9479_s6 = inlined_call_operand.hbm [shape: f32[1,4], index: 6, kind: input, shape index: {}]   ;;  %s9480_s7 = inlined_call_operand.hbm [shape: f32[8,4], index: 7, kind: input, shape index: {}]   ;;  %s9481_s8 = inlined_call_operand.hbm [shape: f32[1,4], index: 8, kind: input, shape index: {}]   ;;  %s9482_s9 = inlined_call_operand.hbm [shape: f32[8,4], index: 9, kind: input, shape index: {}]   ;;  %s9483_s10 = inlined_call_operand.hbm [shape: f32[8,1], index: 10, kind: input, shape index: {}]   ;;  %s9484_s11 = inlined_call_operand.hbm [shape: f32[2,8,256], index: 11, kind: output, shape index: {0}]   ;;  %s9485_s12 = inlined_call_operand.hbm [shape: f32[2,256,64], index: 12, kind: output, shape index: {1}]  }
   0x1   :  { %9501 = sst [smem:[#allocation67_spill]] %s9473_s0 }
   0x2   :  { %9502 = sst [smem:[#allocation68_spill]] %s9474_s1 }
   0x3   :  { %9503 = sst [smem:[#allocation69_spill]] %s9475_s2 }
   0x4   :  { %9504 = sst [smem:[#allocation70_spill]] %s9476_s3 }
   0x5   :  { %9505 = sst [smem:[#allocation71_spill]] %s9477_s4 }
   0x6   :  { %9506 = sst [smem:[#allocation72_spill]] %s9478_s5 }
   0x7   :  { %9507 = sst [smem:[#allocation73_spill]] %s9479_s6 }
   0x8   :  { %9508 = sst [smem:[#allocation74_spill]] %s9480_s7 }
   0x9   :  { %9509 = sst [smem:[#allocation75_spill]] %s9481_s8 }
   0xa   :  { %9510 = sst [smem:[#allocation76_spill]] %s9482_s9 }
   0xb   :  { %9511 = sst [smem:[#allocation77_spill]] %s9483_s10 }
   0xc   :  { %9512 = sst [smem:[#allocation78_spill]] %s9484_s11 }
   0xd   :  { %9513 = sst [smem:[#allocation79_spill]] %s9485_s12 }
   0xe   :  { %18 = vsyncpa [#allocation7], 0 }
   0xf   :  { %20 = vsyncpa [#allocation7 + $0x1], 0 }
  0x10   :  { %21 = vsyncpa [#allocation10], 0 }
  0x11   :  { %23 = vsyncpa [#allocation10 + $0x1], 0 }
  0x12   :  { %24 = vsyncpa [#allocation13], 0 }
  0x13   :  { %25 = vsyncpa [#allocation16], 0 }
  0x14   :  { %26 = vsyncpa [#allocation19], 0 }
  0x15   :  { %27 = vsyncpa [#allocation22], 0 }
  0x16   :  { %28 = vsyncpa [#allocation8], 0 }
  0x17   :  { %30 = vsyncpa [#allocation8 + $0x1], 0 }
  0x18   :  { %31 = vsyncpa [#allocation25], 0 }
  0x19   :  { %33 = vsyncpa [#allocation25 + $0x1], 0  ;;  %s7371_s21 = smov 0   ;;  %s7373_s22 = smov 0  }
  0x1a   :  { %s7375_s23 = smov 0   ;;  %s7377_s24 = smov 0  }
  0x1b   :  { %s7379_s25 = smov 0   ;;  %s7381_s26 = smov 0  }
  0x1c   :  { %s7383_s27 = smov 0   ;;  %s7385_s28 = smov 0  }
  0x1d LB: > { %9514 = sst [smem:[#allocation40_spill]] %s7265_s24  ;;  %s7412_s29 = sadd.s32 4294967295, %s7281_s28   ;;  %s7281_s28 = sphi %s7385_s28, %s39_s28   ;;  %s7277_s27 = sphi %s7383_s27, %s9659_s27   ;;  %s7273_s26 = sphi %s7381_s26, %s9658_s26   ;;  %s7269_s25 = sphi %s7379_s25, %s9657_s25   ;;  %s7265_s24 = sphi %s7377_s24, %s9656_s24   ;;  %s7261_s23 = sphi %s7375_s23, %s9655_s23   ;;  %s7257_s22 = sphi %s7373_s22, %s9654_s22   ;;  %s7253_s21 = sphi %s7371_s21, %s9653_s21  }
  0x1e   : > { %9515 = sst [smem:[#allocation41_spill]] %s7269_s25  ;;  %p5710_p0 = scmp.ge.s32.totalorder %s7281_s28, 1 }
  0x1f   : > { %p9490_p1 = scmp.eq.s32.totalorder %s7412_s29, 0  ;;  %p336_p2 = scmp.lt.s32.totalorder %s7281_s28, 5 }
  0x20   : > { %s7283_s13 = smov [#allocation11]   ;;  %s7284_s15 = smov [#allocation12]  }
  0x21   : > { %p7417_p3 = pnand %p5710_p0, %p336_p2  ;;  %s349_s14 = sshll.u32 %s7283_s13, 4  ;;  %s350_s14 = int_to_ptr.vmem [resolvable:$true] %s349_s14 }
  0x22   : > { %s360_s16 = sshll.u32 %s7284_s15, 4  ;;  %s7285_s18 = smov [#allocation15]   ;;  %s7429_s16 = int_to_ptr.vmem [resolvable:$true] %s360_s16 }
  0x23   : > { %s9516_s30 = scalar_select %p7417_p3, 1, 0 }
  0x24   : > { %p6607_p4 = pneg %p7417_p3  ;;  %s382_s19 = sshll.u32 %s7285_s18, 4  ;;  %s7431_s19 = int_to_ptr.vmem [resolvable:$true] %s382_s19 }
  0x25   : > { %9517 = sst [smem:[#allocation42_spill]] %s9516_s30  ;;  %s9519_s3 = sld [smem:[#allocation70_spill]] }
  0x26   : > { %p7425_p5 = pnand %p6607_p4, %p9490_p1 }
  0x28   : > { %p7441_p7 = pneg %p7425_p5 }
  0x2b   : > { %s6817_s13 = scalar_lea.hbm %s9519_s3, 128 }
  0x2c   : > { %p6818_p6 = scmp.ne.s32.totalorder %s9519_s3, %s6817_s13  ;;  %p6824_p10 = scmp.lt.u32.totalorder %s6817_s13, %s9519_s3 }
  0x2e   : > { %p6820_p8 = pnand %p7441_p7, %p6818_p6 }
  0x30   : > { %p6821_p9 = pneg %p6820_p8 }
  0x32   : > { %p6826_p11 = pnand %p6824_p10, %p6821_p9 }
  0x34   : > { %6829 = shalt.err (!%p6826_p11)
}
  0x35   : > { %s6830_s11 = scalar_lea.vmem %s350_s14, 128  ;;  %p6838_p2 = scmp.lt.s32.totalorder %s350_s14, %s350_s14 }
  0x36   : > { %p6831_p12 = scmp.ne.s32.totalorder %s350_s14, %s6830_s11  ;;  %p6839_p4 = scmp.lt.s32.totalorder %s6830_s11, %s6830_s11 }
  0x38   : > { %p6833_p13 = pnand %p6831_p12, %p7441_p7  ;;  %p6840_p1 = por %p6839_p4, %p6838_p2 }
  0x3a   : > { %p6834_p0 = pneg %p6833_p13 }
  0x3c   : > { %p6841_p3 = pnand %p6840_p1, %p6834_p0 }
  0x3e   : > { %6844 = shalt.err (!%p6841_p3)
}
  0x3f   : > { %6610 = dma.hbm_to_vmem [thread:$0]  (!%p7425_p5), %s9519_s3, 128, %s350_s14, [#allocation10]  }
  0x40   : > { %s9521_s4 = sld [smem:[#allocation71_spill]] }
  0x46   : > { %s6845_s13 = scalar_lea.hbm %s9521_s4, 16 }
  0x47   : > { %p6846_p6 = scmp.ne.s32.totalorder %s9521_s4, %s6845_s13  ;;  %p6852_p1 = scmp.lt.u32.totalorder %s6845_s13, %s9521_s4 }
  0x49   : > { %p6848_p8 = pnand %p6846_p6, %p7441_p7 }
  0x4b   : > { %p6849_p9 = pneg %p6848_p8 }
  0x4d   : > { %p6854_p3 = pnand %p6852_p1, %p6849_p9 }
  0x4f   : > { %6857 = shalt.err (!%p6854_p3)
}
  0x50   : > { %s6858_s14 = scalar_lea.vmem %s7429_s16, 16  ;;  %s6865_s24 = scalar_lea.vmem %s7429_s16, 32 }
  0x51   : > { %p6859_p10 = scmp.ne.s32.totalorder %s7429_s16, %s6858_s14  ;;  %p6866_p13 = scmp.lt.s32.totalorder %s7429_s16, %s7429_s16 }
  0x52   : > { %p6867_p0 = scmp.lt.s32.totalorder %s6865_s24, %s6858_s14 }
  0x53   : > { %p6861_p11 = pnand %p6859_p10, %p7441_p7 }
  0x54   : > { %p6868_p2 = por %p6867_p0, %p6866_p13 }
  0x55   : > { %p6862_p12 = pneg %p6861_p11 }
  0x57   : > { %p6869_p4 = pnand %p6868_p2, %p6862_p12 }
  0x59   : > { %6872 = shalt.err (!%p6869_p4)
}
  0x5a   : > { %6613 = dma.hbm_to_vmem [thread:$0]  (!%p7425_p5), %s9521_s4, 16, %s7429_s16, [#allocation13]  }
  0x5b   : > { %s9522_s6 = sld [smem:[#allocation73_spill]] }
  0x61   : > { %s6873_s20 = scalar_lea.hbm %s9522_s6, 16 }
  0x62   : > { %p6874_p6 = scmp.ne.s32.totalorder %s9522_s6, %s6873_s20  ;;  %p6880_p1 = scmp.lt.u32.totalorder %s6873_s20, %s9522_s6 }
  0x64   : > { %p6876_p8 = pnand %p6874_p6, %p7441_p7 }
  0x66   : > { %p6877_p9 = pneg %p6876_p8 }
  0x68   : > { %p6882_p3 = pnand %p6880_p1, %p6877_p9 }
  0x6a   : > { %6885 = shalt.err (!%p6882_p3)
}
  0x6b   : > { %s6886_s16 = scalar_lea.vmem %s7431_s19, 16  ;;  %s6893_s24 = scalar_lea.vmem %s7431_s19, 32 }
  0x6c   : > { %p6887_p10 = scmp.ne.s32.totalorder %s7431_s19, %s6886_s16  ;;  %p6894_p13 = scmp.lt.s32.totalorder %s7431_s19, %s7431_s19 }
  0x6d   : > { %p6895_p0 = scmp.lt.s32.totalorder %s6893_s24, %s6886_s16 }
  0x6e   : > { %p6889_p11 = pnand %p6887_p10, %p7441_p7 }
  0x6f   : > { %p6896_p2 = por %p6895_p0, %p6894_p13 }
  0x70   : > { %p6890_p12 = pneg %p6889_p11 }
  0x72   : > { %p6897_p4 = pnand %p6896_p2, %p6890_p12 }
  0x74   : > { %6900 = shalt.err (!%p6897_p4)
}
  0x75   : > { %6619 = dma.hbm_to_vmem [thread:$0]  (!%p7425_p5), %s9522_s6, 16, %s7431_s19, [#allocation16]  }
  0x76   : > { %s7286_s12 = smov [#allocation18]   ;;  %s7287_s20 = smov [#allocation14]  }
  0x77   : > { %s404_s25 = sshll.u32 %s7286_s12, 4  ;;  %s371_s13 = sshll.u32 %s7287_s20, 4  ;;  %s405_s25 = int_to_ptr.vmem [resolvable:$true] %s404_s25  ;;  %s372_s13 = int_to_ptr.vmem [resolvable:$true] %s371_s13 }
  0x78   : > { %s9523_s8 = sld [smem:[#allocation75_spill]] }
  0x7e   : > { %s6901_s14 = scalar_lea.hbm %s9523_s8, 16 }
  0x7f   : > { %p6902_p6 = scmp.ne.s32.totalorder %s9523_s8, %s6901_s14  ;;  %p6908_p1 = scmp.lt.u32.totalorder %s6901_s14, %s9523_s8 }
  0x81   : > { %p6904_p8 = pnand %p6902_p6, %p7441_p7 }
  0x83   : > { %p6905_p9 = pneg %p6904_p8 }
  0x85   : > { %p6910_p3 = pnand %p6908_p1, %p6905_p9 }
  0x87   : > { %6913 = shalt.err (!%p6910_p3)
}
  0x88   : > { %s6914_s19 = scalar_lea.vmem %s405_s25, 16  ;;  %s6921_s2 = scalar_lea.vmem %s405_s25, 32 }
  0x89   : > { %p6915_p10 = scmp.ne.s32.totalorder %s405_s25, %s6914_s19  ;;  %p6922_p13 = scmp.lt.s32.totalorder %s405_s25, %s405_s25 }
  0x8a   : > { %p6923_p0 = scmp.lt.s32.totalorder %s6921_s2, %s6914_s19 }
  0x8b   : > { %p6917_p11 = pnand %p6915_p10, %p7441_p7 }
  0x8c   : > { %p6924_p2 = por %p6923_p0, %p6922_p13 }
  0x8d   : > { %p6918_p12 = pneg %p6917_p11 }
  0x8f   : > { %p6925_p4 = pnand %p6924_p2, %p6918_p12 }
  0x91   : > { %6928 = shalt.err (!%p6925_p4)
}
  0x92   : > { %6625 = dma.hbm_to_vmem [thread:$0]  (!%p7425_p5), %s9523_s8, 16, %s405_s25, [#allocation19]  }
  0x93   : > { %s9524_s5 = sld [smem:[#allocation72_spill]] }
  0x99   : > { %s6929_s11 = scalar_lea.hbm %s9524_s5, 128 }
  0x9a   : > { %p6930_p6 = scmp.ne.s32.totalorder %s9524_s5, %s6929_s11  ;;  %p6936_p1 = scmp.lt.u32.totalorder %s6929_s11, %s9524_s5 }
  0x9c   : > { %p6932_p8 = pnand %p6930_p6, %p7441_p7 }
  0x9e   : > { %p6933_p9 = pneg %p6932_p8 }
  0xa0   : > { %p6938_p3 = pnand %p6936_p1, %p6933_p9 }
  0xa2   : > { %6941 = shalt.err (!%p6938_p3)
}
  0xa3   : > { %s6942_s19 = scalar_lea.vmem %s372_s13, 128  ;;  %p6950_p13 = scmp.lt.s32.totalorder %s372_s13, %s372_s13 }
  0xa4   : > { %p6943_p10 = scmp.ne.s32.totalorder %s372_s13, %s6942_s19  ;;  %p6951_p0 = scmp.lt.s32.totalorder %s6942_s19, %s6942_s19 }
  0xa6   : > { %p6945_p11 = pnand %p6943_p10, %p7441_p7  ;;  %p6952_p2 = por %p6951_p0, %p6950_p13 }
  0xa8   : > { %p6946_p12 = pneg %p6945_p11 }
  0xaa   : > { %p6953_p4 = pnand %p6952_p2, %p6946_p12 }
  0xac   : > { %6956 = shalt.err (!%p6953_p4)
}
  0xad   : > { %6616 = dma.hbm_to_vmem [thread:$0]  (!%p7425_p5), %s9524_s5, 128, %s372_s13, [#allocation13]  }
  0xae   : > { %s7288_s12 = smov [#allocation17]   ;;  %s7289_s3 = smov [#allocation20]  }
  0xaf   : > { %s393_s20 = sshll.u32 %s7288_s12, 4  ;;  %s415_s18 = sshll.u32 %s7289_s3, 4  ;;  %s394_s20 = int_to_ptr.vmem [resolvable:$true] %s393_s20  ;;  %s416_s18 = int_to_ptr.vmem [resolvable:$true] %s415_s18 }
  0xb0   : > { %s9525_s7 = sld [smem:[#allocation74_spill]] }
  0xb6   : > { %s6957_s16 = scalar_lea.hbm %s9525_s7, 128 }
  0xb7   : > { %p6958_p6 = scmp.ne.s32.totalorder %s9525_s7, %s6957_s16  ;;  %p6964_p1 = scmp.lt.u32.totalorder %s6957_s16, %s9525_s7 }
  0xb9   : > { %p6960_p8 = pnand %p6958_p6, %p7441_p7 }
  0xbb   : > { %p6961_p9 = pneg %p6960_p8 }
  0xbd   : > { %p6966_p3 = pnand %p6964_p1, %p6961_p9 }
  0xbf   : > { %6969 = shalt.err (!%p6966_p3)
}
  0xc0   : > { %s6970_s13 = scalar_lea.vmem %s394_s20, 128  ;;  %p6978_p13 = scmp.lt.s32.totalorder %s394_s20, %s394_s20 }
  0xc1   : > { %p6971_p10 = scmp.ne.s32.totalorder %s394_s20, %s6970_s13  ;;  %p6979_p0 = scmp.lt.s32.totalorder %s6970_s13, %s6970_s13 }
  0xc3   : > { %p6973_p11 = pnand %p6971_p10, %p7441_p7  ;;  %p6980_p2 = por %p6979_p0, %p6978_p13 }
  0xc5   : > { %p6974_p12 = pneg %p6973_p11 }
  0xc7   : > { %p6981_p4 = pnand %p6980_p2, %p6974_p12 }
  0xc9   : > { %6984 = shalt.err (!%p6981_p4)
}
  0xca   : > { %6622 = dma.hbm_to_vmem [thread:$0]  (!%p7425_p5), %s9525_s7, 128, %s394_s20, [#allocation16]  }
  0xcb   : > { %s9526_s9 = sld [smem:[#allocation76_spill]] }
  0xd1   : > { %s6985_s14 = scalar_lea.hbm %s9526_s9, 128 }
  0xd2   : > { %p6986_p6 = scmp.ne.s32.totalorder %s9526_s9, %s6985_s14  ;;  %p6992_p1 = scmp.lt.u32.totalorder %s6985_s14, %s9526_s9 }
  0xd4   : > { %p6988_p8 = pnand %p6986_p6, %p7441_p7 }
  0xd6   : > { %p6989_p9 = pneg %p6988_p8 }
  0xd8   : > { %p6994_p3 = pnand %p6992_p1, %p6989_p9 }
  0xda   : > { %6997 = shalt.err (!%p6994_p3)
}
  0xdb   : > { %s6998_s25 = scalar_lea.vmem %s416_s18, 128  ;;  %p7006_p13 = scmp.lt.s32.totalorder %s416_s18, %s416_s18 }
  0xdc   : > { %p6999_p10 = scmp.ne.s32.totalorder %s416_s18, %s6998_s25  ;;  %p7007_p0 = scmp.lt.s32.totalorder %s6998_s25, %s6998_s25 }
  0xde   : > { %p7001_p11 = pnand %p6999_p10, %p7441_p7  ;;  %p7008_p2 = por %p7007_p0, %p7006_p13 }
  0xe0   : > { %p7002_p12 = pneg %p7001_p11 }
  0xe2   : > { %p7009_p4 = pnand %p7008_p2, %p7002_p12 }
  0xe4   : > { %7012 = shalt.err (!%p7009_p4)
}
  0xe5   : > { %6628 = dma.hbm_to_vmem [thread:$0]  (!%p7425_p5), %s9526_s9, 128, %s416_s18, [#allocation19]  }
  0xe6   : > { %s7290_s2 = smov [#allocation21]   ;;  %s9527_s10 = sld [smem:[#allocation77_spill]] }
  0xe7   : > { %s426_s12 = sshll.u32 %s7290_s2, 4  ;;  %s427_s12 = int_to_ptr.vmem [resolvable:$true] %s426_s12 }
  0xec   : > { %s7013_s14 = scalar_lea.hbm %s9527_s10, 128 }
  0xed   : > { %p7014_p6 = scmp.ne.s32.totalorder %s9527_s10, %s7013_s14  ;;  %p7020_p1 = scmp.lt.u32.totalorder %s7013_s14, %s9527_s10 }
  0xef   : > { %p7016_p8 = pnand %p7014_p6, %p7441_p7 }
  0xf1   : > { %p7017_p9 = pneg %p7016_p8 }
  0xf3   : > { %p7022_p3 = pnand %p7020_p1, %p7017_p9 }
  0xf5   : > { %7025 = shalt.err (!%p7022_p3)
}
  0xf6   : > { %s7026_s18 = scalar_lea.vmem %s427_s12, 128  ;;  %p7034_p13 = scmp.lt.s32.totalorder %s427_s12, %s427_s12 }
  0xf7   : > { %p7027_p10 = scmp.ne.s32.totalorder %s427_s12, %s7026_s18  ;;  %p7035_p0 = scmp.lt.s32.totalorder %s7026_s18, %s7026_s18 }
  0xf9   : > { %p7029_p11 = pnand %p7027_p10, %p7441_p7  ;;  %p7036_p2 = por %p7035_p0, %p7034_p13 }
  0xfb   : > { %p7030_p12 = pneg %p7029_p11 }
  0xfd   : > { %p7037_p4 = pnand %p7036_p2, %p7030_p12 }
  0xff   : > { %7040 = shalt.err (!%p7037_p4)
}
 0x100   : > { %6631 = dma.hbm_to_vmem [thread:$0]  (!%p7425_p5), %s9527_s10, 128, %s427_s12, [#allocation22]  }
 0x101   : > { %s5709_s15 = sadd.s32 4294967294, %s7281_s28   ;;  %s48_s13 = sadd.s32 1, %s7273_s26 }
 0x102   : > { %p49_p7 = scmp.ge.s32.totalorder %s48_s13, 2  ;;  %s51_s17 = sadd.s32 1, %s7277_s27 }
 0x103   : > { %s60_s2 = sadd.s32 1, %s7261_s23  ;;  %p67_p6 = scmp.ne.s32.totalorder %s7261_s23, %s7257_s22 }
 0x104   : > { %s9661_s13 = smov (%p49_p7, %s48_s13), 0  ;;  %s9663_s17 = smov (!%p49_p7, %s51_s17), %s7277_s27 }
 0x105   : > { %s56_s3 = ssub.s32 %s7273_s26, %s9661_s13  ;;  %p68_p8 = scmp.eq.s32.totalorder %s7281_s28, 0 }
 0x106   : > { %p53_p9 = scmp.ge.s32.totalorder %s9663_s17, 2  ;;  %p73_p5 = scmp.ne.s32.totalorder %s7257_s22, %s7253_s21 }
 0x107   : > { %p7609_p1 = por %p68_p8, %p67_p6  ;;  %p295_p3 = scmp.eq.s32.totalorder %s7412_s29, 3 }
 0x108   : > { %s9665_s17 = smov (%p53_p9, %s9663_s17), 0  ;;  %p9529_p10 = scmp.eq.s32.totalorder %s7412_s29, 0 }
 0x109   : > { %p7622_p12 = por %p295_p3, %p67_p6  ;;  %s55_s16 = ssub.s32 %s7277_s27, %s9665_s17 }
 0x10a   : > { %p7618_p11 = por %p9529_p10, %p73_p5  ;;  %p301_p13 = scmp.eq.s32.totalorder %s5709_s15, 3 }
 0x10b   : > { %s9531_s14 = scalar_select %p7622_p12, 1, 0 }
 0x10c   : > { %s9530_s11 = scalar_select %p7618_p11, 1, 0 }
 0x10d   : > { %s57_s24 = sor.u32 %s56_s3, %s55_s16  ;;  %p6654_p0 = scmp.lt.s32.totalorder %s7281_s28, 4 }
 0x10e   : > { %p58_p2 = scmp.eq.s32.totalorder %s57_s24, 0  ;;  %p7629_p4 = por %p301_p13, %p73_p5 }
 0x10f   : > { %s437_s19 = sand.u32 1, %s7261_s23   ;;  %s5721_s18 = sshll.u32 %s7277_s27, 1 }
 0x110   : > { %s9532_s30 = scalar_select %p7629_p4, 1, 0 }
 0x111   : > { %s7636_s25 = scalar_select %p58_p2, %s7261_s23, %s60_s2  }
 0x112   : > { %s7638_s20 = sshll.u32 %s437_s19, 3  ;;  %s446_s4 = sadd.s32 %s7273_s26, %s5721_s18 }
 0x113   : > { %s5722_s5 = sshll.u32 %s446_s4, 7  ;;  %s441_s6 = scalar_lea.vmem [#allocation6], %s7638_s20 }
 0x114   : > { %s450_s7 = sshll.u32 %s441_s6, 4  ;;  %s9533_s0 = sld [smem:[#allocation67_spill]]  ;;  %s7647_s7 = int_to_ptr.vmem [resolvable:$true] %s450_s7 }
 0x115   : > { %p7653_p7 = pnand %p6654_p0, %p7609_p1  ;;  %s9535_s1 = sld [smem:[#allocation68_spill]] }
 0x116   : > { %s457_s18 = sand.u32 1, %s7281_s28   ;;  %s438_s15 = scalar_lea.sflag [#allocation7], %s437_s19 }
 0x117   : > { %p7043_p8 = pneg %p7653_p7 }
 0x11a   : > { %s7645_s16 = scalar_lea.hbm %s9533_s0, %s5722_s5  ;;  %s7046_s9 = scalar_lea.hbm %s9533_s0, 512 }
 0x11b   : > { %s7660_s6 = scalar_lea.hbm %s9535_s1, %s5722_s5  ;;  %s7041_s3 = scalar_lea.hbm %s7645_s16, 128 }
 0x11c   : > { %p7042_p6 = scmp.ne.s32.totalorder %s7645_s16, %s7041_s3  ;;  %p7047_p1 = scmp.lt.u32.totalorder %s7645_s16, %s9533_s0 }
 0x11d   : > { %p7048_p3 = scmp.lt.u32.totalorder %s7046_s9, %s7041_s3  ;;  %p7050_p13 = scmp.lt.u32.totalorder %s7041_s3, %s7645_s16 }
 0x11e   : > { %p7044_p9 = pnand %p7043_p8, %p7042_p6 }
 0x11f   : > { %p7049_p10 = por %p7048_p3, %p7047_p1 }
 0x120   : > { %p7045_p5 = pneg %p7044_p9 }
 0x121   : > { %p7051_p0 = por %p7050_p13, %p7049_p10 }
 0x123   : > { %p7052_p2 = pnand %p7051_p0, %p7045_p5 }
 0x125   : > { %7055 = shalt.err (!%p7052_p2)
}
 0x126   : > { %s7056_s5 = scalar_lea.vmem %s7647_s7, 128  ;;  %s7291_s8 = smov [#allocation6]  }
 0x127   : > { %p7057_p6 = scmp.ne.s32.totalorder %s7647_s7, %s7056_s5  ;;  %s7061_s19 = sshll.u32 %s7291_s8, 4  ;;  %s7062_s19 = int_to_ptr.vmem [resolvable:$false] %s7061_s19 }
 0x128   : > { %s7063_s10 = scalar_lea.vmem %s7062_s19, 256  ;;  %p7064_p12 = scmp.lt.s32.totalorder %s7647_s7, %s7062_s19 }
 0x129   : > { %p7059_p9 = pnand %p7057_p6, %p7043_p8  ;;  %p7065_p1 = scmp.lt.s32.totalorder %s7063_s10, %s7056_s5 }
 0x12b   : > { %p7060_p4 = pneg %p7059_p9  ;;  %p7066_p3 = por %p7065_p1, %p7064_p12 }
 0x12d   : > { %p7067_p10 = pnand %p7066_p3, %p7060_p4 }
 0x12f   : > { %7070 = shalt.err (!%p7067_p10)
}
 0x130   : > { %6635 = dma.hbm_to_vmem [thread:$0]  (!%p7653_p7), %s7645_s16, 128, %s7647_s7, %s438_s15  }
 0x131   : > { %s461_s9 = scalar_lea.vmem [#allocation9], %s7638_s20  ;;  %s458_s3 = scalar_lea.sflag [#allocation10], %s457_s18 }
 0x132   : > { %s470_s24 = sshll.u32 %s461_s9, 4  ;;  %s7071_s12 = scalar_lea.hbm %s7660_s6, 128  ;;  %s471_s24 = int_to_ptr.vmem [resolvable:$true] %s470_s24 }
 0x133   : > { %p7072_p12 = scmp.ne.s32.totalorder %s7660_s6, %s7071_s12  ;;  %s7076_s8 = scalar_lea.hbm %s9535_s1, 512 }
 0x134   : > { %p7077_p13 = scmp.lt.u32.totalorder %s7660_s6, %s9535_s1  ;;  %p7078_p0 = scmp.lt.u32.totalorder %s7076_s8, %s7071_s12 }
 0x135   : > { %p7074_p4 = pnand %p7072_p12, %p7043_p8  ;;  %p7080_p6 = scmp.lt.u32.totalorder %s7071_s12, %s7660_s6 }
 0x136   : > { %p7079_p2 = por %p7078_p0, %p7077_p13 }
 0x137   : > { %p7075_p5 = pneg %p7074_p4 }
 0x138   : > { %p7081_p9 = por %p7080_p6, %p7079_p2 }
 0x13a   : > { %p7082_p1 = pnand %p7081_p9, %p7075_p5 }
 0x13c   : > { %7085 = shalt.err (!%p7082_p1)
}
 0x13d   : > { %s7086_s7 = scalar_lea.vmem %s471_s24, 128  ;;  %s7292_s20 = smov [#allocation9]  }
 0x13e   : > { %p7087_p3 = scmp.ne.s32.totalorder %s471_s24, %s7086_s7  ;;  %s7091_s16 = sshll.u32 %s7292_s20, 4  ;;  %s7092_s16 = int_to_ptr.vmem [resolvable:$false] %s7091_s16 }
 0x13f   : > { %s7093_s18 = scalar_lea.vmem %s7092_s16, 256  ;;  %p7094_p4 = scmp.lt.s32.totalorder %s471_s24, %s7092_s16 }
 0x140   : > { %p7089_p10 = pnand %p7087_p3, %p7043_p8  ;;  %p7095_p11 = scmp.lt.s32.totalorder %s7093_s18, %s7086_s7 }
 0x142   : > { %p7090_p12 = pneg %p7089_p10  ;;  %p7096_p0 = por %p7095_p11, %p7094_p4 }
 0x144   : > { %p7097_p13 = pnand %p7096_p0, %p7090_p12 }
 0x146   : > { %7100 = shalt.err (!%p7097_p13)
}
 0x147   : > { %6638 = dma.hbm_to_vmem [thread:$0]  (!%p7653_p7), %s7660_s6, 128, %s471_s24, %s458_s3  }
 0x148   : > { %s9536_s15 = sld [smem:[#allocation42_spill]] }
 0x14e   : > { %p9537_p5 = scmp.ne.s32.totalorder %s9536_s15, 0 }
 0x14f   : > { %s7713_s9 = sand.u32 (!%p9537_p5), 1, %s7257_s22   ;;  %p9538_p11 = scmp.ne.s32.totalorder (!%p9537_p5), %s9530_s11, 0 }
 0x150   : > { %479 = sbr.rel (%p9537_p5) target bundleno = 2479 (0x9af), region = 60  ;;  %s7716_s12 = sshll.u32 (!%p9537_p5), %s7713_s9, 3 }
 0x151   : > { %s482_s4 = scalar_lea.sflag (!%p9537_p5), [#allocation7], %s7713_s9 }
 0x157   : > { %7214 = dma.done.wait (%p9538_p11), %s482_s4, 128  }
 0x158   : > { %7216 = vsyncadd (%p9538_p11), %s482_s4, 4294967168  ;;  %s490_s2 = sand.u32 1, %s7412_s29  }
 0x159   : > { %s491_s6 = scalar_lea.sflag [#allocation10], %s490_s2 }
 0x15a   : > { %7218 = dma.done.wait (%p9538_p11), %s491_s6, 128  }
 0x15b   : > { %7220 = vsyncadd (%p9538_p11), %s491_s6, 4294967168  ;;  %p9539_p7 = scmp.eq.s32.totalorder %s7412_s29, 0 }
 0x15d   : > { %7222 = dma.done.wait (%p9539_p7), [#allocation10], 128   ;;  %p9540_p8 = pmov %p9539_p7 }
 0x15e   : > { %p9541_p2 = pmov %p9539_p7 }
 0x15f   : > { %7224 = vsyncadd (%p9540_p8), [#allocation10], 4294967168 }
 0x160   : > { %7226 = dma.done.wait (%p9541_p2), [#allocation13], 144   ;;  %p9542_p6 = pmov %p9541_p2 }
 0x161   : > { %p9543_p9 = pmov %p9541_p2 }
 0x162   : > { %7228 = vsyncadd (%p9542_p6), [#allocation13], 4294967152 }
 0x163   : > { %7230 = dma.done.wait (%p9543_p9), [#allocation16], 144   ;;  %p9544_p1 = pmov %p9541_p2 }
 0x165   : > { %7232 = vsyncadd (%p9544_p1), [#allocation16], 4294967152  ;;  %p9545_p3 = pmov %p9544_p1 }
 0x166   : > { %p9546_p10 = pmov %p9544_p1 }
 0x167   : > { %7234 = dma.done.wait (%p9545_p3), [#allocation19], 144  }
 0x168   : > { %7236 = vsyncadd (%p9546_p10), [#allocation19], 4294967152  ;;  %p9547_p12 = pmov %p9544_p1 }
 0x169   : > { %p9548_p4 = pmov %p9544_p1 }
 0x16a   : > { %7238 = dma.done.wait (%p9547_p12), [#allocation22], 128  }
 0x16b   : > { %7240 = vsyncadd (%p9548_p4), [#allocation22], 4294967168  ;;  %s5738_s11 = sshll.u32 %s7713_s9, 7  ;;  %s9549_s19 = sld [smem:[#allocation40_spill]] }
 0x16c   : > { %s7752_s8 = scalar_lea.vmem [#allocation24], %s5738_s11 }
 0x171   : > { %p5739_p0 = scmp.ne.s32.totalorder %s9549_s19, 0 }
 0x173   : > { %579 = sbr.rel (%p5739_p0) target bundleno = 1298 (0x512), region = 104 }
 0x17a   : > { %s9550_s10 = sld [smem:[#allocation41_spill]]  ;;  %s9551_s18 = sld [smem:[#allocation69_spill]] }
 0x17b   : > { %s7293_s4 = smov [#allocation2]  }
 0x17c   : > { %s590_s2 = sshll.u32 %s7293_s4, 4  ;;  %s591_s2 = int_to_ptr.vmem [resolvable:$true] %s590_s2 }
 0x180   : > { %s6141_s7 = sshll.u32 %s9550_s10, 8  ;;  %s7103_s3 = scalar_lea.hbm %s9551_s18, 512 }
 0x181   : > { %s582_s15 = scalar_lea.hbm %s9551_s18, %s6141_s7 }
 0x182   : > { %s7101_s29 = scalar_lea.hbm %s582_s15, 256  ;;  %p7104_p5 = scmp.lt.u32.totalorder %s582_s15, %s9551_s18 }
 0x183   : > { %p7102_p13 = scmp.ne.s32.totalorder %s582_s15, %s7101_s29  ;;  %p7105_p11 = scmp.lt.u32.totalorder %s7103_s3, %s7101_s29 }
 0x184   : > { %p7107_p8 = scmp.lt.u32.totalorder %s7101_s29, %s582_s15 }
 0x185   : > { %p7106_p7 = por %p7105_p11, %p7104_p5 }
 0x187   : > { %p7108_p2 = por %p7107_p8, %p7106_p7 }
 0x189   : > { %p7109_p6 = pnand %p7108_p2, %p7102_p13 }
 0x18b   : > { %7112 = shalt.err (!%p7109_p6)  }
 0x18c   : > { %s7113_s19 = scalar_lea.vmem %s591_s2, 256  ;;  %p7118_p1 = scmp.lt.s32.totalorder %s591_s2, %s591_s2 }
 0x18d   : > { %p7114_p9 = scmp.ne.s32.totalorder %s591_s2, %s7113_s19  ;;  %p7119_p3 = scmp.lt.s32.totalorder %s7113_s19, %s7113_s19 }
 0x18f   : > { %p7120_p10 = por %p7119_p3, %p7118_p1 }
 0x191   : > { %p7121_p12 = pnand %p7120_p10, %p7114_p9 }
 0x193   : > { %7124 = shalt.err (!%p7121_p12)  }
 0x194   : > { %593 = dma.hbm_to_vmem [thread:$0]  %s582_s15, 256, %s591_s2, [#allocation3] }
 0x195   : > { %7241 = dma.done.wait [#allocation3], 256 }
 0x196   : > { %7242 = vsyncadd [#allocation3], 4294967040  ;;  %v598_v0 = vld [vmem:[#allocation2] sm:$0xff]  ;;  %v994_v2 = vld [vmem:[#allocation17] sm:$0xff]  ;;  %vm672_vm0 = vcmask 64512   ;;  %v9496_v36 = vmov 0.0|0.0   ;;  %v1263_v39 = vlaneseq }
 0x197   : > { %608 = vxpose.xlu0.b32.start.end [1/1] (short) %v598_v0, 128  ;;  %v600_v1 = vld [vmem:[#allocation14] sm:$0xff]  ;;  %6325 = vmatprep.subr.mxu1 %v994_v2  ;;  %v7295_v37 = vmov 1983009808   ;;  %v7830_v42 = vld [vmem:[#allocation15] ss:$0 sm:$0xff]  ;;  %vm4108_vm1 = vcmask 1041409  }
 0x198   : > { %6275 = vmatprep.subr.mxu0 %v600_v1  ;;  %6326 = vmatpush3.msra.mxu1 %v994_v2  ;;  %v599_v3 = vld [vmem:[#allocation2 + $0x8] sm:$0xff]  ;;  %v1261_v38 = vunpack.c.l.s4 %v7295_v37  ;;  %v1264_v41 = vshrl.u32 %v1263_v39, 7  ;;  %v7832_v43 = vld [vmem:[#allocation18] ss:$0 sm:$0xff]  ;;  %vm4110_vm2 = vcmask 1042434   ;;  %vm4112_vm3 = vcmask 1043459  }
 0x199   : > { %6276 = vmatpush3.msra.mxu0 %v600_v1  ;;  %vm4114_vm4 = vcmask 1044484   ;;  %vm4116_vm5 = vcmask 1045509   ;;  %vm4118_vm6 = vcmask 1046534   ;;  %vm4120_vm7 = vcmask 1047559  }
 0x19a   : > { %6495 = vmatprep.subr.bf16.mxu0 %v9496_v36  ;;  %v1262_v40 = vunpack.c.0.s8 %v1261_v38  ;;  %vm4171_vm8 = vcmask 31744   ;;  %vm7296_vm10 = vmmov 0   ;;  %vm4653_vm11 = vcmask 523264  }
 0x19b   : > { %vm8432_vm9 = vmpackc.low %vm4171_vm8, %vm4171_vm8 }
 0x19c   : > { %v7834_v44 = vsub.s32 %v1262_v40, %v1264_v41 }
 0x1d4   : > { %640 = vxpose.xlu0.b32.start.end [1/1] (short) %v599_v3, 128 }
 0x217   : > { %v624_v4 = vpop.trf.xlu0 }
 0x218   : > { %6277 = vmatprep.mubr.msk.f32.mxu0 %vm672_vm0, %v624_v4  ;;  %6327 = vmatprep.mubr.msk.f32.mxu1 %vm672_vm0, %v624_v4 }
 0x21b   : > { %v625_v5 = vpop.trf.xlu0 }
 0x21c   : > { %6278 = vmatmul.mubr.msk.f32.vlgmr.msra.gmra.mrb[0].mxu0 %vm672_vm0, %v625_v5  ;;  %6328 = vmatmul.mubr.msk.f32.vlgmr.msra.gmra.mrb[0].mxu1 %vm672_vm0, %v625_v5 }
 0x21f   : > { %v626_v6 = vpop.trf.xlu0 }
 0x220   : > { %6280 = vmatprep.mubr.msk.f32.mxu0 %vm672_vm0, %v626_v6  ;;  %6330 = vmatprep.mubr.msk.f32.mxu1 %vm672_vm0, %v626_v6 }
 0x223   : > { %v627_v7 = vpop.trf.xlu0 }
 0x224   : > { %6281 = vmatmul.mubr.msk.f32.gmra.mrb[2].mxu0 %vm672_vm0, %v627_v7  ;;  %6331 = vmatmul.mubr.msk.f32.gmra.mrb[2].mxu1 %vm672_vm0, %v627_v7 }
 0x227   : > { %v628_v8 = vpop.trf.xlu0 }
 0x228   : > { %6283 = vmatprep.mubr.msk.f32.mxu0 %vm672_vm0, %v628_v8  ;;  %6333 = vmatprep.mubr.msk.f32.mxu1 %vm672_vm0, %v628_v8 }
 0x22b   : > { %v629_v9 = vpop.trf.xlu0 }
 0x22c   : > { %6284 = vmatmul.mubr.msk.f32.gmra.mrb[4].mxu0 %vm672_vm0, %v629_v9  ;;  %6334 = vmatmul.mubr.msk.f32.gmra.mrb[4].mxu1 %vm672_vm0, %v629_v9 }
 0x22f   : > { %v630_v10 = vpop.trf.xlu0 }
 0x230   : > { %6286 = vmatprep.mubr.msk.f32.mxu0 %vm672_vm0, %v630_v10  ;;  %6336 = vmatprep.mubr.msk.f32.mxu1 %vm672_vm0, %v630_v10 }
 0x233   : > { %v631_v11 = vpop.trf.xlu0 }
 0x234   : > { %6287 = vmatmul.mubr.msk.f32.gmra.mrb[6].mxu0 %vm672_vm0, %v631_v11  ;;  %6337 = vmatmul.mubr.msk.f32.gmra.mrb[6].mxu1 %vm672_vm0, %v631_v11 }
 0x237   : > { %v632_v12 = vpop.trf.xlu0 }
 0x238   : > { %6289 = vmatprep.mubr.msk.f32.mxu0 %vm672_vm0, %v632_v12  ;;  %6339 = vmatprep.mubr.msk.f32.mxu1 %vm672_vm0, %v632_v12 }
 0x23b   : > { %v633_v13 = vpop.trf.xlu0 }
 0x23c   : > { %6290 = vmatmul.mubr.msk.f32.gmra.mrb[8].mxu0 %vm672_vm0, %v633_v13  ;;  %6340 = vmatmul.mubr.msk.f32.gmra.mrb[8].mxu1 %vm672_vm0, %v633_v13 }
 0x23f   : > { %v634_v14 = vpop.trf.xlu0 }
 0x240   : > { %6292 = vmatprep.mubr.msk.f32.mxu0 %vm672_vm0, %v634_v14  ;;  %6342 = vmatprep.mubr.msk.f32.mxu1 %vm672_vm0, %v634_v14 }
 0x243   : > { %v635_v15 = vpop.trf.xlu0 }
 0x244   : > { %6293 = vmatmul.mubr.msk.f32.gmra.mrb[10].mxu0 %vm672_vm0, %v635_v15  ;;  %6343 = vmatmul.mubr.msk.f32.gmra.mrb[10].mxu1 %vm672_vm0, %v635_v15 }
 0x247   : > { %v636_v16 = vpop.trf.xlu0 }
 0x248   : > { %6295 = vmatprep.mubr.msk.f32.mxu0 %vm672_vm0, %v636_v16  ;;  %6345 = vmatprep.mubr.msk.f32.mxu1 %vm672_vm0, %v636_v16 }
 0x24b   : > { %v637_v17 = vpop.trf.xlu0 }
 0x24c   : > { %6296 = vmatmul.mubr.msk.f32.gmra.mrb[12].mxu0 %vm672_vm0, %v637_v17  ;;  %6346 = vmatmul.mubr.msk.f32.gmra.mrb[12].mxu1 %vm672_vm0, %v637_v17 }
 0x24f   : > { %v638_v18 = vpop.trf.xlu0 }
 0x250   : > { %6298 = vmatprep.mubr.msk.f32.mxu0 %vm672_vm0, %v638_v18  ;;  %6348 = vmatprep.mubr.msk.f32.mxu1 %vm672_vm0, %v638_v18 }
 0x253   : > { %v639_v19 = vpop.trf.xlu0 }
 0x254   : > { %6299 = vmatmul.mubr.msk.f32.gmra.mrb[14].mxu0 %vm672_vm0, %v639_v19  ;;  %6349 = vmatmul.mubr.msk.f32.gmra.mrb[14].mxu1 %vm672_vm0, %v639_v19 }
 0x257   : > { %v656_v20 = vpop.trf.xlu0 }
 0x258   : > { %6301 = vmatprep.mubr.msk.f32.mxu0 %vm672_vm0, %v656_v20  ;;  %6351 = vmatprep.mubr.msk.f32.mxu1 %vm672_vm0, %v656_v20  ;;  %v7851_v20 = vsub.s32 0, %v1264_v41 }
 0x25b   : > { %v657_v21 = vpop.trf.xlu0 }
 0x25c   : > { %6302 = vmatmul.mubr.msk.f32.gmra.mrb[16].mxu0 %vm672_vm0, %v657_v21  ;;  %6352 = vmatmul.mubr.msk.f32.gmra.mrb[16].mxu1 %vm672_vm0, %v657_v21 }
 0x25f   : > { %v658_v22 = vpop.trf.xlu0 }
 0x260   : > { %6304 = vmatprep.mubr.msk.f32.mxu0 %vm672_vm0, %v658_v22  ;;  %6354 = vmatprep.mubr.msk.f32.mxu1 %vm672_vm0, %v658_v22 }
 0x263   : > { %v659_v23 = vpop.trf.xlu0 }
 0x264   : > { %6305 = vmatmul.mubr.msk.f32.gmra.mrb[18].mxu0 %vm672_vm0, %v659_v23  ;;  %6355 = vmatmul.mubr.msk.f32.gmra.mrb[18].mxu1 %vm672_vm0, %v659_v23 }
 0x267   : > { %v660_v24 = vpop.trf.xlu0 }
 0x268   : > { %6307 = vmatprep.mubr.msk.f32.mxu0 %vm672_vm0, %v660_v24  ;;  %6357 = vmatprep.mubr.msk.f32.mxu1 %vm672_vm0, %v660_v24 }
 0x26b   : > { %v661_v25 = vpop.trf.xlu0 }
 0x26c   : > { %6308 = vmatmul.mubr.msk.f32.gmra.mrb[20].mxu0 %vm672_vm0, %v661_v25  ;;  %6358 = vmatmul.mubr.msk.f32.gmra.mrb[20].mxu1 %vm672_vm0, %v661_v25 }
 0x26f   : > { %v662_v26 = vpop.trf.xlu0 }
 0x270   : > { %6310 = vmatprep.mubr.msk.f32.mxu0 %vm672_vm0, %v662_v26  ;;  %6360 = vmatprep.mubr.msk.f32.mxu1 %vm672_vm0, %v662_v26 }
 0x273   : > { %v663_v27 = vpop.trf.xlu0 }
 0x274   : > { %6311 = vmatmul.mubr.msk.f32.gmra.mrb[22].mxu0 %vm672_vm0, %v663_v27  ;;  %6361 = vmatmul.mubr.msk.f32.gmra.mrb[22].mxu1 %vm672_vm0, %v663_v27 }
 0x277   : > { %v664_v28 = vpop.trf.xlu0 }
 0x278   : > { %6313 = vmatprep.mubr.msk.f32.mxu0 %vm672_vm0, %v664_v28  ;;  %6363 = vmatprep.mubr.msk.f32.mxu1 %vm672_vm0, %v664_v28 }
 0x27b   : > { %v665_v29 = vpop.trf.xlu0 }
 0x27c   : > { %6314 = vmatmul.mubr.msk.f32.gmra.mrb[24].mxu0 %vm672_vm0, %v665_v29  ;;  %6364 = vmatmul.mubr.msk.f32.gmra.mrb[24].mxu1 %vm672_vm0, %v665_v29 }
 0x27f   : > { %v666_v30 = vpop.trf.xlu0 }
 0x280   : > { %6316 = vmatprep.mubr.msk.f32.mxu0 %vm672_vm0, %v666_v30  ;;  %6366 = vmatprep.mubr.msk.f32.mxu1 %vm672_vm0, %v666_v30 }
 0x283   : > { %v667_v31 = vpop.trf.xlu0 }
 0x284   : > { %6317 = vmatmul.mubr.msk.f32.gmra.mrb[26].mxu0 %vm672_vm0, %v667_v31  ;;  %6367 = vmatmul.mubr.msk.f32.gmra.mrb[26].mxu1 %vm672_vm0, %v667_v31 }
 0x287   : > { %v668_v32 = vpop.trf.xlu0 }
 0x288   : > { %6319 = vmatprep.mubr.msk.f32.mxu0 %vm672_vm0, %v668_v32  ;;  %6369 = vmatprep.mubr.msk.f32.mxu1 %vm672_vm0, %v668_v32 }
 0x28b   : > { %v669_v33 = vpop.trf.xlu0 }
 0x28c   : > { %6320 = vmatmul.mubr.msk.f32.gmra.mrb[28].mxu0 %vm672_vm0, %v669_v33  ;;  %6370 = vmatmul.mubr.msk.f32.gmra.mrb[28].mxu1 %vm672_vm0, %v669_v33 }
 0x28f   : > { %v670_v34 = vpop.trf.xlu0 }
 0x290   : > { %6322 = vmatprep.mubr.msk.f32.mxu0 %vm672_vm0, %v670_v34  ;;  %6372 = vmatprep.mubr.msk.f32.mxu1 %vm672_vm0, %v670_v34 }
 0x293   : > { %v671_v35 = vpop.trf.xlu0 }
 0x294   : > { %6323 = vmatmul.mubr.msk.f32.gmra.mrb[30].mxu0 %vm672_vm0, %v671_v35  ;;  %6373 = vmatmul.mubr.msk.f32.gmra.mrb[30].mxu1 %vm672_vm0, %v671_v35 }
 0x2ef   : > { %v6279_v45 = vpop.f32.mrb[0].mxu0  ;;  %v6329_v46 = vpop.f32.mrb[0].mxu1 }
 0x2f0   : > { %v841_v47 = vadd.f32 %v6279_v45, %v7830_v42  ;;  %v1074_v48 = vadd.f32 %v6329_v46, %v7832_v43  ;;  %v835_v49 = vpop.f32.mrb[1].mxu0  ;;  %v1068_v50 = vpop.f32.mrb[1].mxu1 }
 0x2f1   : > { %v836_v51 = vadd.f32 %v7830_v42, %v835_v49  ;;  %v1069_v52 = vadd.f32 %v7832_v43, %v1068_v50 }
 0x2f2   : > { %v1276_v53 = vcombine.high %v841_v47, %v841_v47  ;;  %v1283_v54 = vrot.slane %v841_v47, %v7834_v44  ;;  %v2556_v55 = vcombine.high %v1074_v48, %v1074_v48  ;;  %v2563_v56 = vrot.slane %v1074_v48, %v7834_v44 }
 0x2f3   : > { %v1259_v57 = vcombine.high %v836_v51, %v836_v51  ;;  %v1266_v58 = vrot.slane %v836_v51, %v7834_v44  ;;  %v2539_v4 = vcombine.high %v1069_v52, %v1069_v52  ;;  %v7847_v8 = vrot.slane %v1069_v52, %v7834_v44 }
 0x2f4   : > { %v1290_v59 = vrot.slane %v1276_v53, %v7834_v44  ;;  %v1291_v60 = vcombine.high %v1283_v54, %v1283_v54  ;;  %v2570_v61 = vrot.slane %v2556_v55, %v7834_v44  ;;  %v5812_v62 = vrot.slane %v1283_v54, 9 }
 0x2f5   : > { %v2571_v63 = vcombine.high %v2563_v56, %v2563_v56  ;;  %v1273_v0 = vrot.slane %v1259_v57, %v7834_v44  ;;  %v5940_v2 = vrot.slane %v2563_v56, 9  ;;  %v1274_v3 = vcombine.high %v1266_v58, %v1266_v58 }
 0x2f6   : > { %v1292_v1 = vcombine.high %v1290_v59, %v1290_v59  ;;  %v5813_v5 = vrot.slane %v1291_v60, 9  ;;  %v5814_v6 = vrot.slane %v1290_v59, 9  ;;  %v2572_v7 = vcombine.high %v2570_v61, %v2570_v61 }
 0x2f7   : > { %v6282_v9 = vpop.f32.mrb[2].mxu0  ;;  %v6332_v10 = vpop.f32.mrb[2].mxu1  ;;  %v5941_v12 = vrot.slane %v2571_v63, 9  ;;  %v5942_v13 = vrot.slane %v2570_v61, 9  ;;  %v1275_v14 = vcombine.high %v1273_v0, %v1273_v0  ;;  %v7849_v17 = vmax.f32 %v1283_v54, %v5812_v62 }
 0x2f8   : > { %v5815_v11 = vrot.slane %v1292_v1, 9  ;;  %v845_v15 = vpop.f32.mrb[3].mxu0  ;;  %v1078_v16 = vpop.f32.mrb[3].mxu1  ;;  %v5943_v18 = vrot.slane %v2572_v7, 9  ;;  %v5808_v19 = vrot.slane %v1266_v58, 9  ;;  %v7853_v21 = vmax.f32 %v2563_v56, %v5940_v2 }
 0x2f9   : > { %v5809_v22 = vrot.slane %v1274_v3, 9  ;;  %v5810_v23 = vrot.slane %v1273_v0, 9  ;;  %v5811_v24 = vrot.slane %v1275_v14, 9  ;;  %v7855_v25 = vmax.f32 %v1291_v60, %v5813_v5 }
 0x2fa   : > { %v7857_v26 = vmax.f32 %v1290_v59, %v5814_v6  ;;  %v7860_v27 = vrot.slane %v2539_v4, %v7834_v44  ;;  %v2554_v28 = vcombine.high %v7847_v8, %v7847_v8  ;;  %v7864_v29 = vmax.f32 %v1292_v1, %v5815_v11 }
 0x2fb   : > { %v7866_v30 = vmax.f32 %v2571_v63, %v5941_v12  ;;  %v7868_v31 = vmax.f32 %v2570_v61, %v5942_v13  ;;  %v7870_v32 = vmax.f32 %v2572_v7, %v5943_v18  ;;  %v7872_v33 = vmax.f32 %v1266_v58, %v5808_v19 }
 0x2fc   : > { %v7874_v34 = vmax.f32 %v1274_v3, %v5809_v22  ;;  %v2555_v35 = vcombine.high %v7860_v27, %v7860_v27  ;;  %v851_v37 = vadd.f32 %v6282_v9, %v7830_v42  ;;  %v7879_v38 = vmax.f32 %v1273_v0, %v5810_v23 }
 0x2fd   : > { %v7881_v39 = vmax.f32 %v1275_v14, %v5811_v24  ;;  %v1084_v40 = vadd.f32 %v6332_v10, %v7832_v43  ;;  %v846_v41 = vadd.f32 %v7830_v42, %v845_v15  ;;  %v5936_v45 = vrot.slane %v7847_v8, 9 }
 0x2fe   : > { %v5937_v46 = vrot.slane %v2554_v28, 9  ;;  %v5938_v47 = vrot.slane %v7860_v27, 9  ;;  %v1310_v48 = vcombine.high %v851_v37, %v851_v37  ;;  %v1317_v51 = vrot.slane %v851_v37, %v7834_v44 }
 0x2ff   : > { %v7887_v49 = vpop.f32.mrb[4].mxu0  ;;  %v7889_v50 = vpop.f32.mrb[4].mxu1  ;;  %v2590_v52 = vcombine.high %v1084_v40, %v1084_v40  ;;  %v2597_v53 = vrot.slane %v1084_v40, %v7834_v44  ;;  %v1293_v54 = vcombine.high %v846_v41, %v846_v41  ;;  %v5939_v57 = vrot.slane %v2555_v35, 9 }
 0x300   : > { %v7893_v55 = vpop.f32.mrb[5].mxu0  ;;  %v7895_v56 = vpop.f32.mrb[5].mxu1  ;;  %v1324_v58 = vrot.slane %v1310_v48, %v7834_v44  ;;  %v1300_v59 = vrot.slane %v846_v41, %v7834_v44  ;;  %v1079_v60 = vadd.f32 %v7832_v43, %v1078_v16  ;;  %v1325_v61 = vcombine.high %v1317_v51, %v1317_v51 }
 0x301   : > { %v5820_v62 = vrot.slane %v1317_v51, 9  ;;  %v2604_v63 = vrot.slane %v2590_v52, %v7834_v44  ;;  %v2605_v0 = vcombine.high %v2597_v53, %v2597_v53  ;;  %v5948_v3 = vrot.slane %v2597_v53, 9 }
 0x302   : > { %v1326_v1 = vcombine.high %v1324_v58, %v1324_v58  ;;  %v5822_v2 = vrot.slane %v1324_v58, 9  ;;  %v1307_v4 = vrot.slane %v1293_v54, %v7834_v44  ;;  %v5821_v5 = vrot.slane %v1325_v61, 9 }
 0x303   : > { %v2327_v6 = vmax.f32 %v1317_v51, %v5820_v62  ;;  %v2606_v7 = vcombine.high %v2604_v63, %v2604_v63  ;;  %v5949_v9 = vrot.slane %v2605_v0, 9  ;;  %v5950_v12 = vrot.slane %v2604_v63, 9 }
 0x304   : > { %v5823_v10 = vrot.slane %v1326_v1, 9  ;;  %v2329_v11 = vmax.f32 %v1324_v58, %v5822_v2  ;;  %v3607_v13 = vmax.f32 %v2597_v53, %v5948_v3  ;;  %v7902_v14 = vmax.f32 %v1325_v61, %v5821_v5 }
 0x305   : > { %v2447_v15 = vmax.f32 %v7849_v17, %v2327_v6  ;;  %v5951_v16 = vrot.slane %v2606_v7, 9  ;;  %v7905_v18 = vmax.f32 %v2605_v0, %v5949_v9  ;;  %v7910_v23 = vmax.f32 %v2604_v63, %v5950_v12 }
 0x306   : > { %v7907_v19 = vmax.f32 %v1326_v1, %v5823_v10  ;;  %v2449_v22 = vmax.f32 %v7857_v26, %v2329_v11  ;;  %v3727_v24 = vmax.f32 %v7853_v21, %v3607_v13  ;;  %v7918_v41 = vmax.f32 %v7847_v8, %v5936_v45 }
 0x307   : > { %v7913_v37 = vpop.f32.mrb[6].mxu0  ;;  %v7915_v40 = vpop.f32.mrb[6].mxu1  ;;  %v2448_v17 = vmax.f32 %v7855_v25, %v7902_v14  ;;  %v7922_v48 = vmax.f32 %v2606_v7, %v5951_v16  ;;  %v3728_v51 = vmax.f32 %v7866_v30, %v7905_v18  ;;  %v7930_v21 = vmax.f32 %v2554_v28, %v5937_v46 }
 0x308   : > { %v7926_v26 = vpop.f32.mrb[7].mxu0  ;;  %v7928_v52 = vpop.f32.mrb[7].mxu1  ;;  %v2450_v53 = vmax.f32 %v7864_v29, %v7907_v19  ;;  %v3729_v8 = vmax.f32 %v7868_v31, %v7910_v23  ;;  %v2573_v45 = vcombine.high %v1079_v60, %v1079_v60  ;;  %v3597_v25 = vmax.f32 %v7860_v27, %v5938_v47 }
 0x309   : > { %v7937_v54 = vmax.f32 %v2555_v35, %v5939_v57  ;;  %v3730_v58 = vmax.f32 %v7870_v32, %v7922_v48  ;;  %v1308_v61 = vcombine.high %v1300_v59, %v1300_v59  ;;  %v4344_v28 = vrot.slane %v2447_v15, %v7851_v20 }
 0x30a   : > { %v7943_v46 = vrot.slane %v2449_v22, %v7851_v20  ;;  %v1309_v62 = vcombine.high %v1307_v4, %v1307_v4  ;;  %v5816_v63 = vrot.slane %v1300_v59, 9  ;;  %v7946_v0 = vrot.slane %v3727_v24, %v7851_v20 }
 0x30b   : > { %v5817_v1 = vrot.slane %v1308_v61, 9  ;;  %v5818_v27 = vrot.slane %v1307_v4, 9  ;;  %v2580_v35 = vrot.slane %v1079_v60, %v7834_v44  ;;  %v2587_v2 = vrot.slane %v2573_v45, %v7834_v44 }
 0x30c   : > { %9552 = vst [vmem:[#allocation43_spill] sm:$0xff] %v7946_v0  ;;  %v5819_v47 = vrot.slane %v1309_v62, 9  ;;  %v2323_v57 = vmax.f32 %v1300_v59, %v5816_v63  ;;  %v861_v3 = vadd.f32 %v7887_v49, %v7830_v42  ;;  %v1094_v31 = vadd.f32 %v7889_v50, %v7832_v43 }
 0x30d   : > { %v2324_v5 = vmax.f32 %v1308_v61, %v5817_v1  ;;  %v2325_v6 = vmax.f32 %v1307_v4, %v5818_v27  ;;  %v2588_v7 = vcombine.high %v2580_v35, %v2580_v35  ;;  %v5944_v9 = vrot.slane %v2580_v35, 9 }
 0x30e   : > { %v2326_v10 = vmax.f32 %v1309_v62, %v5819_v47  ;;  %v2443_v11 = vmax.f32 %v7872_v33, %v2323_v57  ;;  %v2589_v12 = vcombine.high %v2587_v2, %v2587_v2  ;;  %v5946_v13 = vrot.slane %v2587_v2, 9 }
 0x30f   : > { %v7953_v60 = vpop.f32.mrb[8].mxu0  ;;  %v7955_v59 = vpop.f32.mrb[8].mxu1  ;;  %v2444_v14 = vmax.f32 %v7874_v34, %v2324_v5  ;;  %v2445_v15 = vmax.f32 %v7879_v38, %v2325_v6  ;;  %v5945_v49 = vrot.slane %v2588_v7, 9  ;;  %v3603_v4 = vmax.f32 %v2580_v35, %v5944_v9 }
 0x310   : > { %v7959_v16 = vpop.f32.mrb[9].mxu0  ;;  %v7961_v22 = vpop.f32.mrb[9].mxu1  ;;  %v2446_v33 = vmax.f32 %v7881_v39, %v2326_v10  ;;  %v4328_v24 = vrot.slane %v2443_v11, %v7851_v20  ;;  %v5947_v45 = vrot.slane %v2589_v12, 9  ;;  %v3605_v61 = vmax.f32 %v2587_v2, %v5946_v13 }
 0x311   : > { %v4332_v62 = vrot.slane %v2444_v14, %v7851_v20  ;;  %v4336_v63 = vrot.slane %v2445_v15, %v7851_v20  ;;  %v3604_v34 = vmax.f32 %v2588_v7, %v5945_v49  ;;  %v3723_v38 = vmax.f32 %v7918_v41, %v3603_v4 }
 0x312   : > { %v4340_v1 = vrot.slane %v2446_v33, %v7851_v20  ;;  %v3606_v27 = vmax.f32 %v2589_v12, %v5947_v45  ;;  %v3725_v35 = vmax.f32 %v3597_v25, %v3605_v61  ;;  %v1344_v47 = vcombine.high %v861_v3, %v861_v3 }
 0x313   : > { %v4348_v57 = vrot.slane %v2448_v17, %v7851_v20  ;;  %v4581_v39 = vsel %vm4108_vm1, %v4332_v62, %v4328_v24  ;;  %v3724_v5 = vmax.f32 %v7930_v21, %v3604_v34  ;;  %v1351_v2 = vrot.slane %v861_v3, %v7834_v44 }
 0x314   : > { %v4582_v6 = vsel %vm4110_vm2, %v4336_v63, %v4581_v39  ;;  %v3726_v9 = vmax.f32 %v7937_v54, %v3606_v27  ;;  %v3863_v7 = vrot.slane %v3725_v35, %v7851_v20  ;;  %v1358_v41 = vrot.slane %v1344_v47, %v7834_v44 }
 0x315   : > { %v4356_v25 = vrot.slane %v2450_v53, %v7851_v20  ;;  %v4583_v17 = vsel %vm4112_vm3, %v4340_v1, %v4582_v6  ;;  %v3855_v10 = vrot.slane %v3723_v38, %v7851_v20  ;;  %v3859_v21 = vrot.slane %v3724_v5, %v7851_v20 }
 0x316   : > { %v4584_v3 = vsel %vm4114_vm4, %v4344_v28, %v4583_v17  ;;  %v3867_v11 = vrot.slane %v3726_v9, %v7851_v20  ;;  %v1359_v54 = vcombine.high %v1351_v2, %v1351_v2  ;;  %v5828_v12 = vrot.slane %v1351_v2, 9 }
 0x317   : > { %v7986_v13 = vpop.f32.mrb[10].mxu0  ;;  %v7988_v14 = vpop.f32.mrb[10].mxu1  ;;  %v4585_v15 = vsel %vm4116_vm5, %v4348_v57, %v4584_v3  ;;  %v4109_v29 = vsel %vm4108_vm1, %v3859_v21, %v3855_v10  ;;  %v1360_v19 = vcombine.high %v1358_v41, %v1358_v41  ;;  %v5830_v53 = vrot.slane %v1358_v41, 9 }
 0x318   : > { %v7992_v49 = vpop.f32.mrb[11].mxu0  ;;  %v7994_v4 = vpop.f32.mrb[11].mxu1  ;;  %v8000_v28 = vrot.slane %v3728_v51, %v7851_v20  ;;  %v8006_v33 = vrot.slane %v3729_v8, %v7851_v20  ;;  %v4586_v24 = vsel %vm4118_vm6, %v7943_v46, %v4585_v15  ;;  %v4111_v45 = vsel %vm4110_vm2, %v3863_v7, %v4109_v29 }
 0x319   : > { %v8015_v61 = vrot.slane %v3730_v58, %v7851_v20  ;;  %v4587_v30 = vsel %vm4120_vm7, %v4356_v25, %v4586_v24  ;;  %v8019_v18 = vsel %vm4112_vm3, %v3867_v11, %v4111_v45  ;;  %v5829_v23 = vrot.slane %v1359_v54, 9 }
 0x31a   : > { %9553 = vst [vmem:[#allocation44_spill] sm:$0xff] %v8000_v28  ;;  %9554 = vst [vmem:[#allocation45_spill] sm:$0xff] %v8006_v33  ;;  %v8024_v51 = vmax.f32 %v1351_v2, %v5828_v12  ;;  %v856_v8 = vadd.f32 %v7830_v42, %v7893_v55  ;;  %v1089_v32 = vadd.f32 %v7832_v43, %v7895_v56  ;;  %v5831_v48 = vrot.slane %v1360_v19, 9 }
 0x31b   : > { %9555 = vst [vmem:[#allocation46_spill] sm:$0xff] %v8015_v61  ;;  %9556 = vst [vmem:[#allocation47_spill] sm:$0xff] %v8019_v18  ;;  %v8030_v58 = vmax.f32 %v1358_v41, %v5830_v53  ;;  %v2624_v46 = vcombine.high %v1094_v31, %v1094_v31  ;;  %v2631_v62 = vrot.slane %v1094_v31, %v7834_v44 }
 0x31c   : > { %4645 = vst.msk [vmem:[#allocation4] sm:$0xff] %vm4171_vm8, %v4587_v30  ;;  %v1327_v63 = vcombine.high %v856_v8, %v856_v8  ;;  %v1334_v50 = vrot.slane %v856_v8, %v7834_v44  ;;  %v2607_v34 = vcombine.high %v1089_v32, %v1089_v32  ;;  %v871_v38 = vadd.f32 %v7913_v37, %v7830_v42 }
 0x31d   : > { %v2638_v1 = vrot.slane %v2624_v46, %v7834_v44  ;;  %v2639_v27 = vcombine.high %v2631_v62, %v2631_v62  ;;  %v5956_v55 = vrot.slane %v2631_v62, 9  ;;  %v8038_v35 = vrot.slane %v1089_v32, %v7834_v44 }
 0x31e   : > { %v1341_v56 = vrot.slane %v1327_v63, %v7834_v44  ;;  %v1342_v47 = vcombine.high %v1334_v50, %v1334_v50  ;;  %v5824_v57 = vrot.slane %v1334_v50, 9  ;;  %v8042_v39 = vrot.slane %v2607_v34, %v7834_v44 }
 0x31f   : > { %v8044_v5 = vpop.f32.mrb[12].mxu0  ;;  %v8046_v2 = vpop.f32.mrb[12].mxu1  ;;  %v8048_v6 = vmax.f32 %v1359_v54, %v5829_v23  ;;  %v2640_v37 = vcombine.high %v2638_v1, %v2638_v1  ;;  %v5957_v9 = vrot.slane %v2639_v27, 9  ;;  %v5958_v7 = vrot.slane %v2638_v1, 9 }
 0x320   : > { %v8050_v41 = vpop.f32.mrb[13].mxu0  ;;  %v8052_v25 = vpop.f32.mrb[13].mxu1  ;;  %v1343_v17 = vcombine.high %v1341_v56, %v1341_v56  ;;  %v5825_v10 = vrot.slane %v1342_v47, 9  ;;  %v5826_v21 = vrot.slane %v1341_v56, 9  ;;  %v1378_v3 = vcombine.high %v871_v38, %v871_v38 }
 0x321   : > { %9557 = vst [vmem:[#allocation48_spill] sm:$0xff] %v8050_v41  ;;  %9558 = vst [vmem:[#allocation49_spill] sm:$0xff] %v8052_v25  ;;  %v8054_v11 = vmax.f32 %v1360_v19, %v5831_v48  ;;  %v5959_v12 = vrot.slane %v2640_v37, 9  ;;  %v2622_v15 = vcombine.high %v8038_v35, %v8038_v35  ;;  %v1104_v54 = vadd.f32 %v7915_v40, %v7832_v43 }
 0x322   : > { %v8060_v29 = vmax.f32 %v2631_v62, %v5956_v55  ;;  %v8062_v53 = vmax.f32 %v1334_v50, %v5824_v57  ;;  %v2623_v24 = vcombine.high %v8042_v39, %v8042_v39  ;;  %v866_v45 = vadd.f32 %v7830_v42, %v7926_v26 }
 0x323   : > { %v8068_v30 = vmax.f32 %v2639_v27, %v5957_v9  ;;  %v8070_v19 = vmax.f32 %v2638_v1, %v5958_v7  ;;  %v5827_v31 = vrot.slane %v1343_v17, 9  ;;  %v8072_v23 = vmax.f32 %v1342_v47, %v5825_v10 }
 0x324   : > { %v8074_v8 = vmax.f32 %v2640_v37, %v5959_v12  ;;  %v8076_v40 = vmax.f32 %v1341_v56, %v5826_v21  ;;  %v1385_v32 = vrot.slane %v871_v38, %v7834_v44  ;;  %v1392_v48 = vrot.slane %v1378_v3, %v7834_v44 }
 0x325   : > { %v5952_v46 = vrot.slane %v8038_v35, 9  ;;  %v5953_v62 = vrot.slane %v2622_v15, 9  ;;  %v5954_v26 = vrot.slane %v8042_v39, 9  ;;  %v2658_v63 = vcombine.high %v1104_v54, %v1104_v54 }
 0x326   : > { %v5955_v50 = vrot.slane %v2623_v24, 9  ;;  %v1393_v34 = vcombine.high %v1385_v32, %v1385_v32  ;;  %v1394_v1 = vcombine.high %v1392_v48, %v1392_v48  ;;  %v5836_v27 = vrot.slane %v1385_v32, 9 }
 0x327   : > { %v8082_v55 = vpop.f32.mrb[14].mxu0  ;;  %v8084_v47 = vpop.f32.mrb[14].mxu1  ;;  %v5838_v56 = vrot.slane %v1392_v48, 9  ;;  %v2665_v57 = vrot.slane %v1104_v54, %v7834_v44  ;;  %v2672_v38 = vrot.slane %v2658_v63, %v7834_v44  ;;  %v1361_v37 = vcombine.high %v866_v45, %v866_v45 }
 0x328   : > { %9559 = vst [vmem:[#allocation50_spill] sm:$0xff] %v8082_v55  ;;  %9560 = vst [vmem:[#allocation51_spill] sm:$0xff] %v8084_v47  ;;  %v8088_v9 = vpop.f32.mrb[15].mxu0  ;;  %v8090_v7 = vpop.f32.mrb[15].mxu1  ;;  %v5837_v10 = vrot.slane %v1393_v34, 9  ;;  %v5839_v21 = vrot.slane %v1394_v1, 9  ;;  %v2343_v3 = vmax.f32 %v1385_v32, %v5836_v27  ;;  %v1368_v12 = vrot.slane %v866_v45, %v7834_v44 }
 0x329   : > { %9561 = vst [vmem:[#allocation52_spill] sm:$0xff] %v8088_v9  ;;  %9562 = vst [vmem:[#allocation53_spill] sm:$0xff] %v8090_v7  ;;  %v2345_v36 = vmax.f32 %v1392_v48, %v5838_v56  ;;  %v2673_v61 = vcombine.high %v2665_v57, %v2665_v57  ;;  %v2674_v55 = vcombine.high %v2672_v38, %v2672_v38  ;;  %v5964_v33 = vrot.slane %v2665_v57, 9 }
 0x32a   : > { %v2344_v47 = vmax.f32 %v1393_v34, %v5837_v10  ;;  %v2346_v28 = vmax.f32 %v1394_v1, %v5839_v21  ;;  %v2455_v54 = vmax.f32 %v8024_v51, %v2343_v3  ;;  %v5966_v0 = vrot.slane %v2672_v38, 9 }
 0x32b   : > { %v2457_v63 = vmax.f32 %v8030_v58, %v2345_v36  ;;  %v5965_v18 = vrot.slane %v2673_v61, 9  ;;  %v5967_v9 = vrot.slane %v2674_v55, 9  ;;  %v3623_v25 = vmax.f32 %v2665_v57, %v5964_v33 }
 0x32c   : > { %v2334_v7 = vmax.f32 %v1343_v17, %v5827_v31  ;;  %v2456_v41 = vmax.f32 %v8048_v6, %v2344_v47  ;;  %v2458_v32 = vmax.f32 %v8054_v11, %v2346_v28  ;;  %v3625_v45 = vmax.f32 %v2672_v38, %v5966_v0 }
 0x32d   : > { %v8098_v48 = vmax.f32 %v8038_v35, %v5952_v46  ;;  %v8100_v27 = vmax.f32 %v2673_v61, %v5965_v18  ;;  %v8102_v34 = vmax.f32 %v2674_v55, %v5967_v9  ;;  %v3735_v51 = vmax.f32 %v8060_v29, %v3623_v25 }
 0x32e   : > { %v8105_v1 = vmax.f32 %v2622_v15, %v5953_v62  ;;  %v8108_v36 = vmax.f32 %v8042_v39, %v5954_v26  ;;  %v3737_v33 = vmax.f32 %v8070_v19, %v3625_v45  ;;  %v1375_v58 = vrot.slane %v1361_v37, %v7834_v44 }
 0x32f   : > { %v8112_v28 = vpop.f32.mrb[16].mxu0  ;;  %v8114_v0 = vpop.f32.mrb[16].mxu1  ;;  %v8116_v35 = vmax.f32 %v2623_v24, %v5955_v50  ;;  %v3736_v61 = vmax.f32 %v8068_v30, %v8100_v27  ;;  %v3738_v18 = vmax.f32 %v8074_v8, %v8102_v34  ;;  %v1376_v6 = vcombine.high %v1368_v12, %v1368_v12 }
 0x330   : > { %v8122_v25 = vpop.f32.mrb[17].mxu0  ;;  %v8124_v39 = vpop.f32.mrb[17].mxu1  ;;  %v4376_v17 = vrot.slane %v2455_v54, %v7851_v20  ;;  %v1377_v11 = vcombine.high %v1375_v58, %v1375_v58  ;;  %v5832_v15 = vrot.slane %v1368_v12, 9  ;;  %v5834_v29 = vrot.slane %v1375_v58, 9 }
 0x331   : > { %v4380_v19 = vrot.slane %v2456_v41, %v7851_v20  ;;  %v4384_v24 = vrot.slane %v2457_v63, %v7851_v20  ;;  %v5833_v31 = vrot.slane %v1376_v6, 9  ;;  %v1099_v46 = vadd.f32 %v7832_v43, %v7928_v52 }
 0x332   : > { %v5835_v62 = vrot.slane %v1377_v11, 9  ;;  %v2339_v26 = vmax.f32 %v1368_v12, %v5832_v15  ;;  %v2341_v50 = vmax.f32 %v1375_v58, %v5834_v29  ;;  %v881_v55 = vadd.f32 %v7953_v60, %v7830_v42 }
 0x333   : > { %v4388_v47 = vrot.slane %v2458_v32, %v7851_v20  ;;  %v2340_v56 = vmax.f32 %v1376_v6, %v5833_v31  ;;  %v2641_v57 = vcombine.high %v1099_v46, %v1099_v46  ;;  %v2648_v38 = vrot.slane %v1099_v46, %v7834_v44 }
 0x334   : > { %v2342_v37 = vmax.f32 %v1377_v11, %v5835_v62  ;;  %v2451_v41 = vmax.f32 %v8062_v53, %v2339_v26  ;;  %v2453_v9 = vmax.f32 %v8076_v40, %v2341_v50  ;;  %v1412_v10 = vcombine.high %v881_v55, %v881_v55 }
 0x335   : > { %v2452_v52 = vmax.f32 %v8072_v23, %v2340_v56  ;;  %v2655_v21 = vrot.slane %v2641_v57, %v7834_v44  ;;  %v2656_v3 = vcombine.high %v2648_v38, %v2648_v38  ;;  %v5960_v12 = vrot.slane %v2648_v38, 9 }
 0x336   : > { %v2454_v54 = vmax.f32 %v2334_v7, %v2342_v37  ;;  %v4360_v60 = vrot.slane %v2451_v41, %v7851_v20  ;;  %v4368_v63 = vrot.slane %v2453_v9, %v7851_v20  ;;  %v1419_v32 = vrot.slane %v881_v55, %v7834_v44 }
 0x337   : > { %v8142_v45 = vpop.f32.mrb[18].mxu0  ;;  %v8144_v58 = vpop.f32.mrb[18].mxu1  ;;  %v4364_v53 = vrot.slane %v2452_v52, %v7851_v20  ;;  %v2657_v40 = vcombine.high %v2655_v21, %v2655_v21  ;;  %v5961_v6 = vrot.slane %v2656_v3, 9  ;;  %v5962_v23 = vrot.slane %v2655_v21, 9 }
 0x338   : > { %9563 = vst [vmem:[#allocation54_spill] sm:$0xff] %v8144_v58  ;;  %v8147_v11 = vpop.f32.mrb[19].mxu0  ;;  %v8149_v15 = vpop.f32.mrb[19].mxu1  ;;  %v8152_v7 = vrot.slane %v3735_v51, %v7851_v20  ;;  %v4372_v29 = vrot.slane %v2454_v54, %v7851_v20  ;;  %v3619_v31 = vmax.f32 %v2648_v38, %v5960_v12  ;;  %v1426_v46 = vrot.slane %v1412_v10, %v7834_v44 }
 0x339   : > { %9564 = vst [vmem:[#allocation55_spill] sm:$0xff] %v8147_v11  ;;  %9565 = vst [vmem:[#allocation56_spill] sm:$0xff] %v8149_v15  ;;  %v4588_v62 = vsel %vm4108_vm1, %v4364_v53, %v4360_v60  ;;  %v5963_v26 = vrot.slane %v2657_v40, 9  ;;  %v3620_v50 = vmax.f32 %v2656_v3, %v5961_v6  ;;  %v3621_v55 = vmax.f32 %v2655_v21, %v5962_v23 }
 0x33a   : > { %v8158_v56 = vrot.slane %v3737_v33, %v7851_v20  ;;  %v4589_v57 = vsel %vm4110_vm2, %v4368_v63, %v4588_v62  ;;  %v3731_v37 = vmax.f32 %v8098_v48, %v3619_v31  ;;  %v1427_v41 = vcombine.high %v1419_v32, %v1419_v32 }
 0x33b   : > { %v4590_v51 = vsel %vm4112_vm3, %v4372_v29, %v4589_v57  ;;  %v3622_v9 = vmax.f32 %v2657_v40, %v5963_v26  ;;  %v3732_v38 = vmax.f32 %v8105_v1, %v3620_v50  ;;  %v3733_v10 = vmax.f32 %v8108_v36, %v3621_v55 }
 0x33c   : > { %v4591_v52 = vsel %vm4114_vm4, %v4376_v17, %v4590_v51  ;;  %v3887_v3 = vrot.slane %v3731_v37, %v7851_v20  ;;  %v1428_v21 = vcombine.high %v1426_v46, %v1426_v46  ;;  %v1114_v33 = vadd.f32 %v7955_v59, %v7832_v43 }
 0x33d   : > { %v4592_v12 = vsel %vm4116_vm5, %v4380_v19, %v4591_v52  ;;  %v3734_v48 = vmax.f32 %v8116_v35, %v3622_v9  ;;  %v3891_v54 = vrot.slane %v3732_v38, %v7851_v20  ;;  %v3895_v60 = vrot.slane %v3733_v10, %v7851_v20 }
 0x33e   : > { %v8177_v1 = vrot.slane %v3736_v61, %v7851_v20  ;;  %v4593_v36 = vsel %vm4118_vm6, %v4384_v24, %v4592_v12  ;;  %v5844_v17 = vrot.slane %v1419_v32, 9  ;;  %v5845_v63 = vrot.slane %v1427_v41, 9 }
 0x33f   : > { %v8180_v53 = vpop.f32.mrb[20].mxu0  ;;  %v8182_v59 = vpop.f32.mrb[20].mxu1  ;;  %v8188_v35 = vrot.slane %v3738_v18, %v7851_v20  ;;  %v4594_v19 = vsel %vm4120_vm7, %v4388_v47, %v4593_v36  ;;  %v3899_v30 = vrot.slane %v3734_v48, %v7851_v20  ;;  %v4122_v27 = vsel %vm4108_vm1, %v3891_v54, %v3887_v3 }
 0x340   : > { %9566 = vst [vmem:[#allocation57_spill] sm:$0xff] %v8180_v53  ;;  %9567 = vst [vmem:[#allocation58_spill] sm:$0xff] %v8182_v59  ;;  %v8193_v61 = vpop.f32.mrb[21].mxu0  ;;  %v8195_v24 = vpop.f32.mrb[21].mxu1  ;;  %v4123_v40 = vsel %vm4110_vm2, %v3895_v60, %v4122_v27  ;;  %v5846_v6 = vrot.slane %v1426_v46, 9  ;;  %v2692_v23 = vcombine.high %v1114_v33, %v1114_v33  ;;  %v2699_v8 = vrot.slane %v1114_v33, %v7834_v44 }
 0x341   : > { %9568 = vst [vmem:[#allocation59_spill] sm:$0xff] %v8193_v61  ;;  %9569 = vst [vmem:[#allocation60_spill] sm:$0xff] %v8195_v24  ;;  %v8201_v34 = vsel %vm4112_vm3, %v3899_v30, %v4123_v40  ;;  %v5847_v18 = vrot.slane %v1428_v21, 9  ;;  %v876_v47 = vadd.f32 %v7830_v42, %v7959_v16  ;;  %v1109_v29 = vadd.f32 %v7832_v43, %v7961_v22 }
 0x342   : > { %4646 = vst.msk [vmem:[#allocation4 + $0x8] sm:$0xff] %vm4171_vm8, %v4594_v19  ;;  %v8207_v31 = vmax.f32 %v1419_v32, %v5844_v17  ;;  %v8209_v62 = vmax.f32 %v1427_v41, %v5845_v63  ;;  %v2706_v26 = vrot.slane %v2692_v23, %v7834_v44  ;;  %v2707_v50 = vcombine.high %v2699_v8, %v2699_v8 }
 0x343   : > { %v1395_v55 = vcombine.high %v876_v47, %v876_v47  ;;  %v1402_v57 = vrot.slane %v876_v47, %v7834_v44  ;;  %v2675_v37 = vcombine.high %v1109_v29, %v1109_v29  ;;  %v8214_v51 = vrot.slane %v1109_v29, %v7834_v44 }
 0x344   : > { %v2708_v9 = vcombine.high %v2706_v26, %v2706_v26  ;;  %v5972_v38 = vrot.slane %v2699_v8, 9  ;;  %v5973_v16 = vrot.slane %v2707_v50, 9  ;;  %v5974_v10 = vrot.slane %v2706_v26, 9 }
 0x345   : > { %v1409_v22 = vrot.slane %v1395_v55, %v7834_v44  ;;  %v1410_v32 = vcombine.high %v1402_v57, %v1402_v57  ;;  %v5840_v52 = vrot.slane %v1402_v57, 9  ;;  %v8218_v41 = vrot.slane %v2675_v37, %v7834_v44 }
 0x346   : > { %v8220_v3 = vmax.f32 %v1426_v46, %v5846_v6  ;;  %v5975_v33 = vrot.slane %v2708_v9, 9  ;;  %v2690_v12 = vcombine.high %v8214_v51, %v8214_v51  ;;  %v891_v48 = vadd.f32 %v7986_v13, %v7830_v42 }
 0x347   : > { %v8226_v54 = vpop.f32.mrb[22].mxu0  ;;  %v1411_v60 = vcombine.high %v1409_v22, %v1409_v22  ;;  %v5841_v36 = vrot.slane %v1410_v32, 9  ;;  %v5842_v17 = vrot.slane %v1409_v22, 9  ;;  %v1124_v63 = vadd.f32 %v7988_v14, %v7832_v43 }
 0x348   : > { %9570 = vst [vmem:[#allocation61_spill] sm:$0xff] %v8226_v54  ;;  %v8230_v19 = vmax.f32 %v1428_v21, %v5847_v18  ;;  %v8232_v30 = vmax.f32 %v2699_v8, %v5972_v38  ;;  %v8234_v46 = vmax.f32 %v2707_v50, %v5973_v16  ;;  %v2691_v27 = vcombine.high %v8218_v41, %v8218_v41 }
 0x349   : > { %v8238_v40 = vmax.f32 %v2706_v26, %v5974_v10  ;;  %v8240_v13 = vmax.f32 %v2708_v9, %v5975_v33  ;;  %v8242_v6 = vmax.f32 %v1402_v57, %v5840_v52  ;;  %v5968_v23 = vrot.slane %v8214_v51, 9 }
 0x34a   : > { %v5843_v47 = vrot.slane %v1411_v60, 9  ;;  %v8245_v29 = vmax.f32 %v1410_v32, %v5841_v36  ;;  %v5969_v14 = vrot.slane %v2690_v12, 9  ;;  %v1446_v21 = vcombine.high %v891_v48, %v891_v48 }
 0x34b   : > { %v8247_v8 = vmax.f32 %v1409_v22, %v5842_v17  ;;  %v5970_v18 = vrot.slane %v8218_v41, 9  ;;  %v1453_v50 = vrot.slane %v891_v48, %v7834_v44  ;;  %v2726_v55 = vcombine.high %v1124_v63, %v1124_v63 }
 0x34c   : > { %v5971_v26 = vrot.slane %v2691_v27, 9  ;;  %v1460_v37 = vrot.slane %v1446_v21, %v7834_v44  ;;  %v2733_v57 = vrot.slane %v1124_v63, %v7834_v44  ;;  %v886_v9 = vadd.f32 %v7830_v42, %v7992_v49  ;;  %v8258_v49 = vpop.f32.mrb[22].mxu1 }
 0x34d   : > { %v1461_v38 = vcombine.high %v1453_v50, %v1453_v50  ;;  %v5852_v16 = vrot.slane %v1453_v50, 9  ;;  %v2740_v10 = vrot.slane %v2726_v55, %v7834_v44  ;;  %v1119_v22 = vadd.f32 %v7832_v43, %v7994_v4  ;;  %v8263_v4 = vpop.f32.mrb[23].mxu0 }
 0x34e   : > { %v1462_v32 = vcombine.high %v1460_v37, %v1460_v37  ;;  %v5854_v52 = vrot.slane %v1460_v37, 9  ;;  %v2741_v33 = vcombine.high %v2733_v57, %v2733_v57  ;;  %v5980_v48 = vrot.slane %v2733_v57, 9  ;;  %9571 = vst [vmem:[#allocation62_spill] sm:$0xff] %v8263_v4 }
 0x34f   : > { %v5853_v36 = vrot.slane %v1461_v38, 9  ;;  %v2359_v17 = vmax.f32 %v1453_v50, %v5852_v16  ;;  %v2742_v54 = vcombine.high %v2740_v10, %v2740_v10  ;;  %v5982_v21 = vrot.slane %v2740_v10, 9 }
 0x350   : > { %v5855_v24 = vrot.slane %v1462_v32, 9  ;;  %v2361_v63 = vmax.f32 %v1460_v37, %v5854_v52  ;;  %v5981_v61 = vrot.slane %v2741_v33, 9  ;;  %v3639_v59 = vmax.f32 %v2733_v57, %v5980_v48 }
 0x351   : > { %v2360_v53 = vmax.f32 %v1461_v38, %v5853_v36  ;;  %v2463_v55 = vmax.f32 %v8207_v31, %v2359_v17  ;;  %v5983_v15 = vrot.slane %v2742_v54, 9  ;;  %v8261_v11 = vmax.f32 %v2740_v10, %v5982_v21 }
 0x352   : > { %v8265_v58 = vmax.f32 %v1462_v32, %v5855_v24  ;;  %v2465_v50 = vmax.f32 %v8220_v3, %v2361_v63  ;;  %v8268_v16 = vmax.f32 %v2741_v33, %v5981_v61  ;;  %v3743_v37 = vmax.f32 %v8232_v30, %v3639_v59  ;;  %v8303_v61 = vpop.f32.mrb[23].mxu1 }
 0x353   : > { %v3627_v57 = vmax.f32 %v8214_v51, %v5968_v23  ;;  %v2464_v52 = vmax.f32 %v8209_v62, %v2360_v53  ;;  %v8273_v38 = vmax.f32 %v2742_v54, %v5983_v15  ;;  %v2350_v10 = vmax.f32 %v1411_v60, %v5843_v47 }
 0x354   : > { %v3628_v48 = vmax.f32 %v2690_v12, %v5969_v14  ;;  %v3629_v3 = vmax.f32 %v8218_v41, %v5970_v18  ;;  %v3630_v59 = vmax.f32 %v2691_v27, %v5971_v26  ;;  %v1429_v53 = vcombine.high %v886_v9, %v886_v9 }
 0x355   : > { %v8285_v15 = vrot.slane %v2463_v55, %v7851_v20  ;;  %v8288_v62 = vrot.slane %v2465_v50, %v7851_v20  ;;  %v1436_v12 = vrot.slane %v886_v9, %v7834_v44  ;;  %v2709_v54 = vcombine.high %v1119_v22, %v1119_v22 }
 0x356   : > { %v8292_v60 = vrot.slane %v2464_v52, %v7851_v20  ;;  %v8295_v30 = vrot.slane %v3743_v37, %v7851_v20  ;;  %v1443_v41 = vrot.slane %v1429_v53, %v7834_v44  ;;  %v2716_v27 = vrot.slane %v1119_v22, %v7834_v44 }
 0x357   : > { %v1444_v23 = vcombine.high %v1436_v12, %v1436_v12  ;;  %v5848_v47 = vrot.slane %v1436_v12, 9  ;;  %v2723_v14 = vrot.slane %v2709_v54, %v7834_v44  ;;  %v901_v18 = vadd.f32 %v8044_v5, %v7830_v42 }
 0x358   : > { %v1445_v26 = vcombine.high %v1443_v41, %v1443_v41  ;;  %v5850_v9 = vrot.slane %v1443_v41, 9  ;;  %v2724_v32 = vcombine.high %v2716_v27, %v2716_v27  ;;  %v5976_v33 = vrot.slane %v2716_v27, 9 }
 0x359   : > { %v5849_v36 = vrot.slane %v1444_v23, 9  ;;  %v2355_v17 = vmax.f32 %v1436_v12, %v5848_v47  ;;  %v2725_v21 = vcombine.high %v2723_v14, %v2723_v14  ;;  %v5978_v63 = vrot.slane %v2723_v14, 9 }
 0x35a   : > { %v5851_v55 = vrot.slane %v1445_v26, 9  ;;  %v2357_v50 = vmax.f32 %v1443_v41, %v5850_v9  ;;  %v5977_v37 = vrot.slane %v2724_v32, 9  ;;  %v3635_v52 = vmax.f32 %v2716_v27, %v5976_v33  ;;  %v8311_v9 = vpop.f32.mrb[24].mxu0 }
 0x35b   : > { %v2356_v22 = vmax.f32 %v1444_v23, %v5849_v36  ;;  %v2459_v53 = vmax.f32 %v8242_v6, %v2355_v17  ;;  %v5979_v51 = vrot.slane %v2725_v21, 9  ;;  %v3637_v54 = vmax.f32 %v2723_v14, %v5978_v63  ;;  %9572 = vst [vmem:[#allocation63_spill] sm:$0xff] %v8311_v9 }
 0x35c   : > { %v2358_v42 = vmax.f32 %v1445_v26, %v5851_v55  ;;  %v2461_v5 = vmax.f32 %v8247_v8, %v2357_v50  ;;  %v3636_v31 = vmax.f32 %v2724_v32, %v5977_v37  ;;  %v3739_v24 = vmax.f32 %v3627_v57, %v3635_v52  ;;  %v8313_v26 = vpop.f32.mrb[24].mxu1  ;;  %v8329_v55 = vpop.f32.mrb[25].mxu0 }
 0x35d   : > { %v2460_v12 = vmax.f32 %v8245_v29, %v2356_v22  ;;  %v3638_v47 = vmax.f32 %v2725_v21, %v5979_v51  ;;  %v3741_v4 = vmax.f32 %v3629_v3, %v3637_v54  ;;  %v1134_v41 = vadd.f32 %v8046_v2, %v7832_v43  ;;  %9573 = vst [vmem:[#allocation64_spill] sm:$0xff] %v8313_v26  ;;  %v8331_v50 = vpop.f32.mrb[25].mxu1 }
 0x35e   : > { %v2462_v27 = vmax.f32 %v2350_v10, %v2358_v42  ;;  %v4392_v23 = vrot.slane %v2459_v53, %v7851_v20  ;;  %v4400_v6 = vrot.slane %v2461_v5, %v7851_v20  ;;  %v3740_v14 = vmax.f32 %v3628_v48, %v3636_v31  ;;  %9574 = vst [vmem:[#allocation65_spill] sm:$0xff] %v8329_v55 }
 0x35f   : > { %v4396_v8 = vrot.slane %v2460_v12, %v7851_v20  ;;  %v3742_v57 = vmax.f32 %v3630_v59, %v3638_v47  ;;  %v3927_v29 = vrot.slane %v3741_v4, %v7851_v20  ;;  %v1480_v51 = vcombine.high %v901_v18, %v901_v18  ;;  %9575 = vst [vmem:[#allocation66_spill] sm:$0xff] %v8331_v50 }
 0x360   : > { %v4404_v3 = vrot.slane %v2462_v27, %v7851_v20  ;;  %v3919_v43 = vrot.slane %v3739_v24, %v7851_v20  ;;  %v3923_v2 = vrot.slane %v3740_v14, %v7851_v20  ;;  %v1487_v10 = vrot.slane %v901_v18, %v7834_v44 }
 0x361   : > { %v4595_v31 = vsel %vm4108_vm1, %v4396_v8, %v4392_v23  ;;  %v3931_v48 = vrot.slane %v3742_v57, %v7851_v20  ;;  %v1494_v32 = vrot.slane %v1480_v51, %v7834_v44  ;;  %v2760_v33 = vcombine.high %v1134_v41, %v1134_v41  ;;  %v8373_v8 = vld [vmem:[#allocation15] ss:$0 sm:$0xff]  ;;  %v8377_v57 = vld [vmem:[#allocation18] ss:$0 sm:$0xff] }
 0x362   : > { %v4596_v59 = vsel %vm4110_vm2, %v4400_v6, %v4595_v31  ;;  %v4129_v4 = vsel %vm4108_vm1, %v3923_v2, %v3919_v43  ;;  %v1495_v36 = vcombine.high %v1487_v10, %v1487_v10  ;;  %v2767_v17 = vrot.slane %v1134_v41, %v7834_v44  ;;  %v9582_v43 = vld [vmem:[#allocation47_spill] sm:$0xff] }
 0x363   : > { %v4597_v24 = vsel %vm4112_vm3, %v4404_v3, %v4596_v59  ;;  %v4130_v21 = vsel %vm4110_vm2, %v3927_v29, %v4129_v4  ;;  %v1496_v63 = vcombine.high %v1494_v32, %v1494_v32  ;;  %v5860_v18 = vrot.slane %v1487_v10, 9  ;;  %v9583_v2 = vld [vmem:[#allocation43_spill] sm:$0xff]  ;;  %v8388_v4 = vpop.f32.mrb[26].mxu0 }
 0x364   : > { %v4598_v37 = vsel %vm4114_vm4, %v8285_v15, %v4597_v24  ;;  %v8336_v52 = vsel %vm4112_vm3, %v3931_v48, %v4130_v21  ;;  %v5861_v22 = vrot.slane %v1495_v36, 9  ;;  %v5862_v53 = vrot.slane %v1494_v32, 9 }
 0x365   : > { %v9576_v54 = vmax.f32 %v8230_v19, %v8265_v58  ;;  %v9577_v5 = vmax.f32 %v8238_v40, %v8261_v11  ;;  %v4599_v47 = vsel %vm4116_vm5, %v8292_v60, %v4598_v37  ;;  %v2774_v15 = vrot.slane %v2760_v33, %v7834_v44 }
 0x366   : > { %v9578_v41 = vmax.f32 %v8234_v46, %v8268_v16  ;;  %v9579_v58 = vmax.f32 %v8240_v13, %v8273_v38  ;;  %v4600_v11 = vsel %vm4118_vm6, %v8288_v62, %v4599_v47  ;;  %v2775_v40 = vcombine.high %v2767_v17, %v2767_v17  ;;  %v9580_v13 = vld [vmem:[#allocation48_spill] sm:$0xff]  ;;  %v9581_v62 = vld [vmem:[#allocation49_spill] sm:$0xff] }
 0x367   : > { %v4420_v42 = vrot.slane %v9576_v54, %v7851_v20  ;;  %v8346_v12 = vrot.slane %v9577_v5, %v7851_v20  ;;  %v5863_v23 = vrot.slane %v1496_v63, 9  ;;  %v8366_v6 = vmax.f32 %v1487_v10, %v5860_v18  ;;  %9584 = vst [vmem:[#allocation48_spill] sm:$0xff] %v8388_v4  ;;  %v9586_v18 = vld [vmem:[#allocation44_spill] sm:$0xff] }
 0x368   : > { %v8355_v27 = vrot.slane %v9578_v41, %v7851_v20  ;;  %v8361_v19 = vrot.slane %v9579_v58, %v7851_v20  ;;  %v2776_v14 = vcombine.high %v2774_v15, %v2774_v15  ;;  %v8369_v46 = vmax.f32 %v1495_v36, %v5861_v22  ;;  %v8390_v36 = vpop.f32.mrb[26].mxu1  ;;  %v9588_v41 = vld [vmem:[#allocation45_spill] sm:$0xff] }
 0x369   : > { %v4601_v60 = vsel %vm4120_vm7, %v4420_v42, %v4600_v11  ;;  %v8371_v16 = vmax.f32 %v1494_v32, %v5862_v53  ;;  %v896_v38 = vadd.f32 %v8373_v8, %v9580_v13  ;;  %v1129_v29 = vadd.f32 %v8377_v57, %v9581_v62  ;;  %9585 = vst [vmem:[#allocation49_spill] sm:$0xff] %v8390_v36  ;;  %v8397_v53 = vpop.f32.mrb[27].mxu0 }
 0x36a   : > { %4647 = vst.msk [vmem:[#allocation4 + $0x10] sm:$0xff] %vm4171_vm8, %v4601_v60  ;;  %v5988_v51 = vrot.slane %v2767_v17, 9  ;;  %v5990_v3 = vrot.slane %v2774_v15, 9  ;;  %v4115_v10 = vsel %vm4114_vm4, %v9583_v2, %v9582_v43  ;;  %v4125_v31 = vsel %vm4114_vm4, %v8152_v7, %v8201_v34  ;;  %9587 = vst [vmem:[#allocation47_spill] sm:$0xff] %v8397_v53 }
 0x36b   : > { %v5989_v48 = vrot.slane %v2775_v40, 9  ;;  %v1463_v32 = vcombine.high %v896_v38, %v896_v38  ;;  %v1470_v33 = vrot.slane %v896_v38, %v7834_v44  ;;  %v2743_v59 = vcombine.high %v1129_v29, %v1129_v29 }
 0x36c   : > { %v5991_v24 = vrot.slane %v2776_v14, 9  ;;  %v2750_v21 = vrot.slane %v1129_v29, %v7834_v44  ;;  %v4117_v37 = vsel %vm4116_vm5, %v9586_v18, %v4115_v10  ;;  %v4126_v22 = vsel %vm4116_vm5, %v8177_v1, %v4125_v31  ;;  %v8417_v10 = vpop.f32.mrb[27].mxu1 }
 0x36d   : > { %v1477_v7 = vrot.slane %v1463_v32, %v7834_v44  ;;  %v1478_v34 = vcombine.high %v1470_v33, %v1470_v33  ;;  %v5856_v54 = vrot.slane %v1470_v33, 9  ;;  %v2757_v42 = vrot.slane %v2743_v59, %v7834_v44  ;;  %9589 = vst [vmem:[#allocation43_spill] sm:$0xff] %v8417_v10 }
 0x36e   : > { %v2758_v5 = vcombine.high %v2750_v21, %v2750_v21  ;;  %v5984_v47 = vrot.slane %v2750_v21, 9  ;;  %v4119_v58 = vsel %vm4118_vm6, %v9588_v41, %v4117_v37  ;;  %v4127_v11 = vsel %vm4118_vm6, %v8158_v56, %v4126_v22 }
 0x36f   : > { %v8405_v60 = vmax.f32 %v1496_v63, %v5863_v23  ;;  %v8407_v13 = vmax.f32 %v2767_v17, %v5988_v51  ;;  %v8409_v1 = vcombine.high %v1477_v7, %v1477_v7  ;;  %v5857_v38 = vrot.slane %v1478_v34, 9  ;;  %v9590_v63 = vld [vmem:[#allocation46_spill] sm:$0xff] }
 0x370   : > { %v8411_v62 = vmax.f32 %v2775_v40, %v5989_v48  ;;  %v8413_v29 = vmax.f32 %v2774_v15, %v5990_v3  ;;  %v5858_v43 = vrot.slane %v1477_v7, 9  ;;  %v8415_v2 = vcombine.high %v2757_v42, %v2757_v42 }
 0x371   : > { %v8419_v31 = vmax.f32 %v2776_v14, %v5991_v24  ;;  %v8421_v32 = vmax.f32 %v1470_v33, %v5856_v54  ;;  %v5985_v56 = vrot.slane %v2758_v5, 9  ;;  %v4121_v17 = vsel %vm4120_vm7, %v9590_v63, %v4119_v58  ;;  %v9594_v33 = vld [vmem:[#allocation50_spill] sm:$0xff]  ;;  %v9595_v24 = vld [vmem:[#allocation51_spill] sm:$0xff]  ;;  %v9597_v54 = vld [vmem:[#allocation53_spill] sm:$0xff] }
 0x372   : > { %v5859_v23 = vrot.slane %v8409_v1, 9  ;;  %v5986_v51 = vrot.slane %v2757_v42, 9  ;;  %v8426_v40 = vmax.f32 %v2750_v21, %v5984_v47  ;;  %v4128_v15 = vsel %vm4120_vm7, %v8188_v35, %v4127_v11  ;;  %v9596_v35 = vld [vmem:[#allocation52_spill] sm:$0xff] }
 0x373   : > { %v9591_v3 = vmov 0  ;;  %v8436_v14 = vmax.f32 %v1478_v34, %v5857_v38  ;;  %v6496_v48 = vpack.c.bf16 %v4128_v15, %v4121_v17  ;;  %v911_v59 = vadd.f32 %v8373_v8, %v9594_v33 }
 0x374   : > { %v9592_v3 = vsel %vm8432_vm9, 4294967295, %v9591_v3  ;;  %v1144_v18 = vadd.f32 %v8377_v57, %v9595_v24  ;;  %v8442_v21 = vmax.f32 %v1477_v7, %v5858_v43  ;;  %v5987_v37 = vrot.slane %v8415_v2, 9 }
 0x375   : > { %9593 = vst [vmem:[#allocation44_spill] sm:$0xff] %v9592_v3  ;;  %v906_v22 = vadd.f32 %v8373_v8, %v9596_v35  ;;  %v1139_v47 = vadd.f32 %v8377_v57, %v9597_v54  ;;  %6498 = vmatpush3.bf16.xpose.msk.msra.mxu0 %vm8432_vm9, %v6496_v48  ;;  %v1514_v34 = vcombine.high %v911_v59, %v911_v59  ;;  %v9598_v17 = vmov 0.0|0.0  }
 0x376   : > { %v1521_v41 = vrot.slane %v911_v59, %v7834_v44  ;;  %v2794_v58 = vcombine.high %v1144_v18, %v1144_v18  ;;  %v2801_v11 = vrot.slane %v1144_v18, %v7834_v44  ;;  %v8453_v38 = vmax.f32 %v2758_v5, %v5985_v56  ;;  %6499 = vmatprep.subr.bf16.mxu0 %v9598_v17  ;;  %v8471_v17 = vpop.f32.mrb[28].mxu0 }
 0x377   : > { %v8455_v7 = vmax.f32 %v2757_v42, %v5986_v51  ;;  %v1497_v43 = vcombine.high %v906_v22, %v906_v22  ;;  %v1504_v63 = vrot.slane %v906_v22, %v7834_v44  ;;  %v1528_v15 = vrot.slane %v1514_v34, %v7834_v44 }
 0x378   : > { %v1529_v33 = vcombine.high %v1521_v41, %v1521_v41  ;;  %v5868_v24 = vrot.slane %v1521_v41, 9  ;;  %v2808_v48 = vrot.slane %v2794_v58, %v7834_v44  ;;  %v2809_v35 = vcombine.high %v2801_v11, %v2801_v11 }
 0x379   : > { %v5996_v59 = vrot.slane %v2801_v11, 9  ;;  %v1511_v54 = vrot.slane %v1497_v43, %v7834_v44  ;;  %v2777_v18 = vcombine.high %v1139_v47, %v1139_v47  ;;  %v1530_v5 = vcombine.high %v1528_v15, %v1528_v15 }
 0x37a   : > { %v5869_v56 = vrot.slane %v1529_v33, 9  ;;  %v5870_v42 = vrot.slane %v1528_v15, 9  ;;  %v2375_v51 = vmax.f32 %v1521_v41, %v5868_v24  ;;  %v2810_v10 = vcombine.high %v2808_v48, %v2808_v48  ;;  %v8473_v41 = vpop.f32.mrb[28].mxu1 }
 0x37b   : > { %v5997_v53 = vrot.slane %v2809_v35, 9  ;;  %v5998_v22 = vrot.slane %v2808_v48, 9  ;;  %v8462_v36 = vmax.f32 %v2801_v11, %v5996_v59  ;;  %v5871_v4 = vrot.slane %v1530_v5, 9  ;;  %9599 = vst [vmem:[#allocation45_spill] sm:$0xff] %v8473_v41 }
 0x37c   : > { %v2376_v34 = vmax.f32 %v1529_v33, %v5869_v56  ;;  %v2377_v50 = vmax.f32 %v1528_v15, %v5870_v42  ;;  %v2471_v55 = vmax.f32 %v8366_v6, %v2375_v51  ;;  %v5999_v58 = vrot.slane %v2810_v10, 9 }
 0x37d   : > { %v8465_v26 = vmax.f32 %v2809_v35, %v5997_v53  ;;  %v8467_v9 = vmax.f32 %v2808_v48, %v5998_v22  ;;  %v2378_v24 = vmax.f32 %v1530_v5, %v5871_v4  ;;  %v1512_v15 = vcombine.high %v1504_v63, %v1504_v63 }
 0x37e   : > { %v2472_v11 = vmax.f32 %v8369_v46, %v2376_v34  ;;  %v2473_v33 = vmax.f32 %v8371_v16, %v2377_v50  ;;  %v8477_v59 = vmax.f32 %v2810_v10, %v5999_v58  ;;  %v2784_v48 = vrot.slane %v1139_v47, %v7834_v44 }
 0x37f   : > { %v2366_v35 = vmax.f32 %v8409_v1, %v5859_v23  ;;  %v3646_v56 = vmax.f32 %v8415_v2, %v5987_v37  ;;  %v2474_v4 = vmax.f32 %v8405_v60, %v2378_v24  ;;  %v1513_v46 = vcombine.high %v1511_v54, %v1511_v54 }
 0x380   : > { %v4440_v50 = vrot.slane %v2471_v55, %v7851_v20  ;;  %v5864_v10 = vrot.slane %v1504_v63, 9  ;;  %v921_v5 = vadd.f32 %v8373_v8, %v8112_v28  ;;  %v4444_v42 = vrot.slane %v2472_v11, %v7851_v20 }
 0x381   : > { %v5865_v51 = vrot.slane %v1512_v15, 9  ;;  %v5866_v47 = vrot.slane %v1511_v54, 9  ;;  %v5867_v22 = vrot.slane %v1513_v46, 9  ;;  %v4448_v1 = vrot.slane %v2473_v33, %v7851_v20  ;;  %v8498_v33 = vpop.f32.mrb[29].mxu0 }
 0x382   : > { %v2371_v2 = vmax.f32 %v1504_v63, %v5864_v10  ;;  %v2791_v60 = vrot.slane %v2777_v18, %v7834_v44  ;;  %v2792_v23 = vcombine.high %v2784_v48, %v2784_v48  ;;  %v5992_v58 = vrot.slane %v2784_v48, 9  ;;  %v8500_v63 = vpop.f32.mrb[29].mxu1 }
 0x383   : > { %v2372_v37 = vmax.f32 %v1512_v15, %v5865_v51  ;;  %v2373_v55 = vmax.f32 %v1511_v54, %v5866_v47  ;;  %v2374_v34 = vmax.f32 %v1513_v46, %v5867_v22  ;;  %9600 = vst [vmem:[#allocation46_spill] sm:$0xff] %v8500_v63  ;;  %v1548_v47 = vcombine.high %v921_v5, %v921_v5 }
 0x384   : > { %v2467_v24 = vmax.f32 %v8421_v32, %v2371_v2  ;;  %v2793_v16 = vcombine.high %v2791_v60, %v2791_v60  ;;  %v5993_v53 = vrot.slane %v2792_v23, 9  ;;  %v5994_v28 = vrot.slane %v2791_v60, 9 }
 0x385   : > { %v2468_v11 = vmax.f32 %v8436_v14, %v2372_v37  ;;  %v2469_v6 = vmax.f32 %v8442_v21, %v2373_v55  ;;  %v2470_v43 = vmax.f32 %v2366_v35, %v2374_v34  ;;  %v3651_v41 = vmax.f32 %v2784_v48, %v5992_v58 }
 0x386   : > { %v4424_v18 = vrot.slane %v2467_v24, %v7851_v20  ;;  %v5995_v54 = vrot.slane %v2793_v16, 9  ;;  %v3652_v15 = vmax.f32 %v2792_v23, %v5993_v53  ;;  %v3653_v46 = vmax.f32 %v2791_v60, %v5994_v28 }
 0x387   : > { %v4428_v32 = vrot.slane %v2468_v11, %v7851_v20  ;;  %v4432_v10 = vrot.slane %v2469_v6, %v7851_v20  ;;  %v4436_v51 = vrot.slane %v2470_v43, %v7851_v20  ;;  %v3747_v14 = vmax.f32 %v8426_v40, %v3651_v41 }
 0x388   : > { %v3654_v21 = vmax.f32 %v2793_v16, %v5995_v54  ;;  %v3748_v48 = vmax.f32 %v8453_v38, %v3652_v15  ;;  %v3749_v35 = vmax.f32 %v8455_v7, %v3653_v46  ;;  %v1555_v53 = vrot.slane %v921_v5, %v7834_v44 }
 0x389   : > { %v4602_v22 = vsel %vm4108_vm1, %v4428_v32, %v4424_v18  ;;  %v3951_v2 = vrot.slane %v3747_v14, %v7851_v20  ;;  %v1154_v60 = vadd.f32 %v8377_v57, %v8114_v0  ;;  %v4452_v38 = vrot.slane %v2474_v4, %v7851_v20 }
 0x38a   : > { %v4603_v6 = vsel %vm4110_vm2, %v4432_v10, %v4602_v22  ;;  %v3750_v43 = vmax.f32 %v3646_v56, %v3654_v21  ;;  %v3955_v40 = vrot.slane %v3748_v48, %v7851_v20  ;;  %v3959_v41 = vrot.slane %v3749_v35, %v7851_v20 }
 0x38b   : > { %v4604_v7 = vsel %vm4112_vm3, %v4436_v51, %v4603_v6  ;;  %v1562_v16 = vrot.slane %v1548_v47, %v7834_v44  ;;  %v1563_v23 = vcombine.high %v1555_v53, %v1555_v53  ;;  %v2828_v55 = vcombine.high %v1154_v60, %v1154_v60 }
 0x38c   : > { %v4605_v37 = vsel %vm4114_vm4, %v4440_v50, %v4604_v7  ;;  %v3963_v5 = vrot.slane %v3750_v43, %v7851_v20  ;;  %v4136_v0 = vsel %vm4108_vm1, %v3955_v40, %v3951_v2  ;;  %v5876_v24 = vrot.slane %v1555_v53, 9 }
 0x38d   : > { %v4606_v56 = vsel %vm4116_vm5, %v4444_v42, %v4605_v37  ;;  %v4137_v34 = vsel %vm4110_vm2, %v3959_v41, %v4136_v0  ;;  %v1564_v58 = vcombine.high %v1562_v16, %v1562_v16  ;;  %v9601_v4 = vmax.f32 %v8407_v13, %v8462_v36 }
 0x38e   : > { %v4607_v11 = vsel %vm4118_vm6, %v4448_v1, %v4606_v56  ;;  %v8533_v50 = vsel %vm4112_vm3, %v3963_v5, %v4137_v34  ;;  %v5877_v18 = vrot.slane %v1563_v23, 9  ;;  %v9602_v42 = vmax.f32 %v8411_v62, %v8465_v26 }
 0x38f   : > { %v8529_v28 = vrot.slane %v9601_v4, %v7851_v20  ;;  %v9603_v15 = vmax.f32 %v8413_v29, %v8467_v9  ;;  %v4608_v36 = vsel %vm4120_vm7, %v4452_v38, %v4607_v11  ;;  %v2835_v13 = vrot.slane %v1154_v60, %v7834_v44  ;;  %v8573_v38 = vpop.f32.mrb[30].mxu0 }
 0x390   : > { %v8539_v54 = vrot.slane %v9602_v42, %v7851_v20  ;;  %v9604_v1 = vmax.f32 %v8419_v31, %v8477_v59  ;;  %4648 = vst.msk [vmem:[#allocation4 + $0x18] sm:$0xff] %vm4171_vm8, %v4608_v36  ;;  %v2842_v26 = vrot.slane %v2828_v55, %v7834_v44  ;;  %v916_v62 = vadd.f32 %v8373_v8, %v8122_v25 }
 0x391   : > { %v8545_v46 = vrot.slane %v9603_v15, %v7851_v20  ;;  %v1149_v9 = vadd.f32 %v8377_v57, %v8124_v39  ;;  %v5878_v29 = vrot.slane %v1562_v16, 9  ;;  %v5879_v10 = vrot.slane %v1564_v58, 9  ;;  %9605 = vst [vmem:[#allocation50_spill] sm:$0xff] %v8573_v38 }
 0x392   : > { %v8553_v32 = vrot.slane %v9604_v1, %v7851_v20  ;;  %v8561_v51 = vmax.f32 %v1555_v53, %v5876_v24  ;;  %v2843_v14 = vcombine.high %v2835_v13, %v2835_v13  ;;  %v8563_v21 = vmax.f32 %v1563_v23, %v5877_v18  ;;  %v9606_v1 = vld [vmem:[#allocation54_spill] sm:$0xff] }
 0x393   : > { %v2844_v31 = vcombine.high %v2842_v26, %v2842_v26  ;;  %v1531_v59 = vcombine.high %v916_v62, %v916_v62  ;;  %v1538_v48 = vrot.slane %v916_v62, %v7834_v44  ;;  %v6004_v35 = vrot.slane %v2835_v13, 9 }
 0x394   : > { %v6006_v47 = vrot.slane %v2842_v26, 9  ;;  %v2811_v22 = vcombine.high %v1149_v9, %v1149_v9  ;;  %v2818_v2 = vrot.slane %v1149_v9, %v7834_v44  ;;  %v6005_v25 = vrot.slane %v2843_v14, 9 }
 0x395   : > { %v6007_v60 = vrot.slane %v2844_v31, 9  ;;  %v1545_v39 = vrot.slane %v1531_v59, %v7834_v44  ;;  %v1546_v6 = vcombine.high %v1538_v48, %v1538_v48  ;;  %v5872_v43 = vrot.slane %v1538_v48, 9 }
 0x396   : > { %v8569_v53 = vrot.slane %v2811_v22, %v7834_v44  ;;  %v2826_v40 = vcombine.high %v2818_v2, %v2818_v2  ;;  %v931_v41 = vadd.f32 %v8373_v8, %v8142_v45  ;;  %v8575_v7 = vmax.f32 %v1562_v16, %v5878_v29 }
 0x397   : > { %v1547_v23 = vcombine.high %v1545_v39, %v1545_v39  ;;  %v5873_v37 = vrot.slane %v1546_v6, 9  ;;  %v5874_v5 = vrot.slane %v1545_v39, 9  ;;  %v8577_v0 = vmax.f32 %v1564_v58, %v5879_v10  ;;  %v9607_v10 = vld [vmem:[#allocation55_spill] sm:$0xff] }
 0x398   : > { %v8579_v55 = vmax.f32 %v2835_v13, %v6004_v35  ;;  %v2827_v56 = vcombine.high %v8569_v53, %v8569_v53  ;;  %v6000_v34 = vrot.slane %v2818_v2, 9  ;;  %v8583_v24 = vmax.f32 %v2843_v14, %v6005_v25 }
 0x399   : > { %v8585_v4 = vmax.f32 %v2842_v26, %v6006_v47  ;;  %v8587_v45 = vmax.f32 %v2844_v31, %v6007_v60  ;;  %v8589_v11 = vmax.f32 %v1538_v48, %v5872_v43  ;;  %v5875_v16 = vrot.slane %v1547_v23, 9 }
 0x39a   : > { %v8591_v18 = vmax.f32 %v1546_v6, %v5873_v37  ;;  %v6001_v42 = vrot.slane %v2826_v40, 9  ;;  %v1582_v58 = vcombine.high %v931_v41, %v931_v41  ;;  %v8593_v15 = vmax.f32 %v1545_v39, %v5874_v5 }
 0x39b   : > { %v6002_v36 = vrot.slane %v8569_v53, 9  ;;  %v1589_v13 = vrot.slane %v931_v41, %v7834_v44  ;;  %v1164_v62 = vadd.f32 %v8377_v57, %v9606_v1  ;;  %v6003_v26 = vrot.slane %v2827_v56, 9  ;;  %v8607_v41 = vpop.f32.mrb[30].mxu1 }
 0x39c   : > { %v8599_v9 = vmax.f32 %v2818_v2, %v6000_v34  ;;  %v1596_v29 = vrot.slane %v1582_v58, %v7834_v44  ;;  %v926_v14 = vadd.f32 %v8373_v8, %v9607_v10  ;;  %9608 = vst [vmem:[#allocation51_spill] sm:$0xff] %v8607_v41  ;;  %v8618_v41 = vmax.f32 %v2826_v40, %v6001_v42 }
 0x39d   : > { %v1597_v31 = vcombine.high %v1589_v13, %v1589_v13  ;;  %v5884_v59 = vrot.slane %v1589_v13, 9  ;;  %v2862_v48 = vcombine.high %v1164_v62, %v1164_v62  ;;  %v2869_v35 = vrot.slane %v1164_v62, %v7834_v44 }
 0x39e   : > { %v1598_v47 = vcombine.high %v1596_v29, %v1596_v29  ;;  %v5886_v22 = vrot.slane %v1596_v29, 9  ;;  %v1565_v25 = vcombine.high %v926_v14, %v926_v14  ;;  %v1572_v60 = vrot.slane %v926_v14, %v7834_v44 }
 0x39f   : > { %v5885_v39 = vrot.slane %v1597_v31, 9  ;;  %v2391_v6 = vmax.f32 %v1589_v13, %v5884_v59  ;;  %v2876_v2 = vrot.slane %v2862_v48, %v7834_v44  ;;  %v2877_v43 = vcombine.high %v2869_v35, %v2869_v35  ;;  %v8616_v48 = vpop.f32.mrb[31].mxu0 }
 0x3a0   : > { %v5887_v37 = vrot.slane %v1598_v47, 9  ;;  %v2393_v5 = vmax.f32 %v1596_v29, %v5886_v22  ;;  %v6012_v34 = vrot.slane %v2869_v35, 9  ;;  %v1579_v58 = vrot.slane %v1565_v25, %v7834_v44  ;;  %9609 = vst [vmem:[#allocation52_spill] sm:$0xff] %v8616_v48 }
 0x3a1   : > { %v2392_v1 = vmax.f32 %v1597_v31, %v5885_v39  ;;  %v2479_v62 = vmax.f32 %v8561_v51, %v2391_v6  ;;  %v2878_v10 = vcombine.high %v2876_v2, %v2876_v2  ;;  %v6013_v38 = vrot.slane %v2877_v43, 9 }
 0x3a2   : > { %v8611_v63 = vmax.f32 %v1598_v47, %v5887_v37  ;;  %v2481_v14 = vmax.f32 %v8575_v7, %v2393_v5  ;;  %v6014_v13 = vrot.slane %v2876_v2, 9  ;;  %v8614_v59 = vmax.f32 %v2869_v35, %v6012_v34  ;;  %v9610_v47 = vld [vmem:[#allocation56_spill] sm:$0xff] }
 0x3a3   : > { %v2480_v29 = vmax.f32 %v8563_v21, %v2392_v1  ;;  %v6015_v22 = vrot.slane %v2878_v10, 9  ;;  %v8621_v25 = vmax.f32 %v2877_v43, %v6013_v38  ;;  %v1159_v35 = vadd.f32 %v8377_v57, %v9610_v47 }
 0x3a4   : > { %v2482_v51 = vmax.f32 %v8577_v0, %v8611_v63  ;;  %v8625_v31 = vmax.f32 %v2876_v2, %v6014_v13  ;;  %v3759_v7 = vmax.f32 %v8579_v55, %v8614_v59  ;;  %v2382_v39 = vmax.f32 %v1547_v23, %v5875_v16 }
 0x3a5   : > { %v8631_v6 = vmax.f32 %v2878_v10, %v6015_v22  ;;  %v3760_v21 = vmax.f32 %v8583_v24, %v8621_v25  ;;  %v1580_v40 = vcombine.high %v1572_v60, %v1572_v60  ;;  %v3661_v38 = vmax.f32 %v8569_v53, %v6002_v36 }
 0x3a6   : > { %v3662_v42 = vmax.f32 %v2827_v56, %v6003_v26  ;;  %v3761_v63 = vmax.f32 %v8585_v4, %v8625_v31  ;;  %v1581_v0 = vcombine.high %v1579_v58, %v1579_v58  ;;  %v4472_v2 = vrot.slane %v2479_v62, %v7851_v20  ;;  %v9611_v62 = vld [vmem:[#allocation57_spill] sm:$0xff] }
 0x3a7   : > { %v3762_v55 = vmax.f32 %v8587_v45, %v8631_v6  ;;  %v5880_v43 = vrot.slane %v1572_v60, 9  ;;  %v5881_v23 = vrot.slane %v1580_v40, 9  ;;  %v4480_v16 = vrot.slane %v2481_v14, %v7851_v20  ;;  %v8652_v6 = vpop.f32.mrb[31].mxu1 }
 0x3a8   : > { %v5882_v37 = vrot.slane %v1579_v58, 9  ;;  %v5883_v5 = vrot.slane %v1581_v0, 9  ;;  %v2845_v24 = vcombine.high %v1159_v35, %v1159_v35  ;;  %v4476_v34 = vrot.slane %v2480_v29, %v7851_v20  ;;  %9612 = vst [vmem:[#allocation53_spill] sm:$0xff] %v8652_v6 }
 0x3a9   : > { %v2387_v53 = vmax.f32 %v1572_v60, %v5880_v43  ;;  %v2388_v56 = vmax.f32 %v1580_v40, %v5881_v23  ;;  %v2852_v36 = vrot.slane %v1159_v35, %v7834_v44  ;;  %v941_v45 = vadd.f32 %v8373_v8, %v9611_v62 }
 0x3aa   : > { %v2389_v4 = vmax.f32 %v1579_v58, %v5882_v37  ;;  %v2390_v26 = vmax.f32 %v1581_v0, %v5883_v5  ;;  %v2859_v1 = vrot.slane %v2845_v24, %v7834_v44 }
 0x3ab   : > { %v2475_v10 = vmax.f32 %v8589_v11, %v2387_v53  ;;  %v2476_v14 = vmax.f32 %v8591_v18, %v2388_v56  ;;  %v2860_v13 = vcombine.high %v2852_v36, %v2852_v36  ;;  %v6008_v59 = vrot.slane %v2852_v36, 9 }
 0x3ac   : > { %v2477_v22 = vmax.f32 %v8593_v15, %v2389_v4  ;;  %v2478_v29 = vmax.f32 %v2382_v39, %v2390_v26  ;;  %v2861_v60 = vcombine.high %v2859_v1, %v2859_v1  ;;  %v6010_v25 = vrot.slane %v2859_v1, 9 }
 0x3ad   : > { %v4456_v31 = vrot.slane %v2475_v10, %v7851_v20  ;;  %v4460_v58 = vrot.slane %v2476_v14, %v7851_v20  ;;  %v6009_v47 = vrot.slane %v2860_v13, 9  ;;  %v3667_v35 = vmax.f32 %v2852_v36, %v6008_v59 }
 0x3ae   : > { %v4464_v40 = vrot.slane %v2477_v22, %v7851_v20  ;;  %v4468_v11 = vrot.slane %v2478_v29, %v7851_v20  ;;  %v6011_v18 = vrot.slane %v2861_v60, 9  ;;  %v3669_v0 = vmax.f32 %v2859_v1, %v6010_v25 }
 0x3af   : > { %v4609_v43 = vsel %vm4108_vm1, %v4460_v58, %v4456_v31  ;;  %v3668_v15 = vmax.f32 %v2860_v13, %v6009_v47  ;;  %v3755_v39 = vmax.f32 %v8599_v9, %v3667_v35  ;;  %v1616_v23 = vcombine.high %v941_v45, %v941_v45  ;;  %v9616_v47 = vld [vmem:[#allocation60_spill] sm:$0xff] }
 0x3b0   : > { %v4610_v37 = vsel %vm4110_vm2, %v4464_v40, %v4609_v43  ;;  %v3670_v5 = vmax.f32 %v2861_v60, %v6011_v18  ;;  %v3757_v24 = vmax.f32 %v3661_v38, %v3669_v0  ;;  %v1623_v53 = vrot.slane %v941_v45, %v7834_v44 }
 0x3b1   : > { %v4484_v56 = vrot.slane %v2482_v51, %v7851_v20  ;;  %v4611_v36 = vsel %vm4112_vm3, %v4468_v11, %v4610_v37  ;;  %v3756_v4 = vmax.f32 %v8618_v41, %v3668_v15  ;;  %v1630_v26 = vrot.slane %v1616_v23, %v7834_v44 }
 0x3b2   : > { %v4612_v1 = vsel %vm4114_vm4, %v4472_v2, %v4611_v36  ;;  %v3758_v62 = vmax.f32 %v3662_v42, %v3670_v5  ;;  %v3991_v9 = vrot.slane %v3757_v24, %v7851_v20  ;;  %v1631_v10 = vcombine.high %v1623_v53, %v1623_v53 }
 0x3b3   : > { %v8667_v14 = vrot.slane %v3759_v7, %v7851_v20  ;;  %v4613_v38 = vsel %vm4116_vm5, %v4476_v34, %v4612_v1  ;;  %v3983_v45 = vrot.slane %v3755_v39, %v7851_v20  ;;  %v3987_v51 = vrot.slane %v3756_v4, %v7851_v20 }
 0x3b4   : > { %v8673_v13 = vrot.slane %v3760_v21, %v7851_v20  ;;  %v8676_v41 = vrot.slane %v3761_v63, %v7851_v20  ;;  %v4614_v42 = vsel %vm4118_vm6, %v4480_v16, %v4613_v38  ;;  %v3995_v2 = vrot.slane %v3758_v62, %v7851_v20  ;;  %v9614_v63 = vld [vmem:[#allocation58_spill] sm:$0xff] }
 0x3b5   : > { %v8681_v59 = vrot.slane %v3762_v55, %v7851_v20  ;;  %v4615_v7 = vsel %vm4120_vm7, %v4484_v56, %v4614_v42  ;;  %v4143_v34 = vsel %vm4108_vm1, %v3987_v51, %v3983_v45  ;;  %v1632_v22 = vcombine.high %v1630_v26, %v1630_v26  ;;  %v9615_v55 = vld [vmem:[#allocation59_spill] sm:$0xff] }
 0x3b6   : > { %4649 = vst.msk [vmem:[#allocation4 + $0x20] sm:$0xff] %vm4171_vm8, %v4615_v7  ;;  %v4144_v21 = vsel %vm4110_vm2, %v3991_v9, %v4143_v34  ;;  %v5892_v29 = vrot.slane %v1623_v53, 9  ;;  %v5893_v60 = vrot.slane %v1631_v10, 9  ;;  %v1174_v25 = vadd.f32 %v8377_v57, %v9614_v63 }
 0x3b7   : > { %9613 = vst [vmem:[#allocation54_spill] sm:$0xff] %v8681_v59  ;;  %v8690_v16 = vsel %vm4112_vm3, %v3995_v2, %v4144_v21  ;;  %v5894_v31 = vrot.slane %v1630_v26, 9  ;;  %v936_v58 = vadd.f32 %v8373_v8, %v9615_v55  ;;  %v1169_v35 = vadd.f32 %v8377_v57, %v9616_v47 }
 0x3b8   : > { %v2896_v40 = vcombine.high %v1174_v25, %v1174_v25  ;;  %v2903_v11 = vrot.slane %v1174_v25, %v7834_v44  ;;  %v4132_v18 = vsel %vm4114_vm4, %v8295_v30, %v8336_v52  ;;  %v4139_v0 = vsel %vm4114_vm4, %v8529_v28, %v8533_v50 }
 0x3b9   : > { %v5895_v43 = vrot.slane %v1632_v22, 9  ;;  %v1599_v15 = vcombine.high %v936_v58, %v936_v58  ;;  %v1606_v39 = vrot.slane %v936_v58, %v7834_v44  ;;  %v2879_v23 = vcombine.high %v1169_v35, %v1169_v35 }
 0x3ba   : > { %v2910_v37 = vrot.slane %v2896_v40, %v7834_v44  ;;  %v2911_v5 = vcombine.high %v2903_v11, %v2903_v11  ;;  %v2886_v24 = vrot.slane %v1169_v35, %v7834_v44  ;;  %v4133_v56 = vsel %vm4116_vm5, %v8355_v27, %v4132_v18 }
 0x3bb   : > { %v6020_v36 = vrot.slane %v2903_v11, 9  ;;  %v1613_v30 = vrot.slane %v1599_v15, %v7834_v44  ;;  %v1614_v52 = vcombine.high %v1606_v39, %v1606_v39  ;;  %v5888_v4 = vrot.slane %v1606_v39, 9 }
 0x3bc   : > { %v2912_v1 = vcombine.high %v2910_v37, %v2910_v37  ;;  %v6021_v28 = vrot.slane %v2911_v5, 9  ;;  %v6022_v50 = vrot.slane %v2910_v37, 9  ;;  %v8710_v62 = vrot.slane %v2879_v23, %v7834_v44  ;;  %v9618_v23 = vld [vmem:[#allocation62_spill] sm:$0xff] }
 0x3bd   : > { %v8712_v9 = vmax.f32 %v1623_v53, %v5892_v29  ;;  %v1615_v38 = vcombine.high %v1613_v30, %v1613_v30  ;;  %v5889_v45 = vrot.slane %v1614_v52, 9  ;;  %v5890_v51 = vrot.slane %v1613_v30, 9 }
 0x3be   : > { %v8714_v42 = vmax.f32 %v1631_v10, %v5893_v60  ;;  %v8716_v2 = vmax.f32 %v1630_v26, %v5894_v31  ;;  %v6023_v27 = vrot.slane %v2912_v1, 9  ;;  %v2894_v7 = vcombine.high %v2886_v24, %v2886_v24 }
 0x3bf   : > { %v8718_v34 = vmax.f32 %v1632_v22, %v5895_v43  ;;  %v8720_v21 = vmax.f32 %v2903_v11, %v6020_v36  ;;  %v5891_v63 = vrot.slane %v1615_v38, 9  ;;  %v8722_v25 = vmax.f32 %v1606_v39, %v5888_v4  ;;  %v9617_v43 = vld [vmem:[#allocation61_spill] sm:$0xff] }
 0x3c0   : > { %v8724_v55 = vmax.f32 %v2911_v5, %v6021_v28  ;;  %v8726_v53 = vmax.f32 %v2910_v37, %v6022_v50  ;;  %v8730_v29 = vcombine.high %v8710_v62, %v8710_v62  ;;  %v6016_v10 = vrot.slane %v2886_v24, 9 }
 0x3c1   : > { %v8732_v26 = vmax.f32 %v1614_v52, %v5889_v45  ;;  %v8734_v60 = vmax.f32 %v1613_v30, %v5890_v51  ;;  %v4134_v22 = vsel %vm4118_vm6, %v8346_v12, %v4133_v56  ;;  %v4140_v31 = vsel %vm4116_vm5, %v8539_v54, %v4139_v0 }
 0x3c2   : > { %v8740_v58 = vmax.f32 %v2912_v1, %v6023_v27  ;;  %v6017_v47 = vrot.slane %v2894_v7, 9  ;;  %v6018_v35 = vrot.slane %v8710_v62, 9  ;;  %v4135_v40 = vsel %vm4120_vm7, %v8361_v19, %v4134_v22 }
 0x3c3   : > { %v8745_v11 = vmax.f32 %v1615_v38, %v5891_v63  ;;  %v4141_v18 = vsel %vm4118_vm6, %v8545_v46, %v4140_v31  ;;  %v951_v15 = vadd.f32 %v8373_v8, %v9617_v43  ;;  %v1184_v12 = vadd.f32 %v8377_v57, %v8258_v49 }
 0x3c4   : > { %v6019_v54 = vrot.slane %v8730_v29, 9  ;;  %v8754_v0 = vmax.f32 %v2886_v24, %v6016_v10  ;;  %v4142_v39 = vsel %vm4120_vm7, %v8553_v32, %v4141_v18  ;;  %v946_v19 = vadd.f32 %v8373_v8, %v9618_v23 }
 0x3c5   : > { %v6500_v37 = vpack.c.bf16 %v4142_v39, %v4135_v40  ;;  %v1650_v5 = vcombine.high %v951_v15, %v951_v15  ;;  %v1657_v46 = vrot.slane %v951_v15, %v7834_v44  ;;  %v2930_v56 = vcombine.high %v1184_v12, %v1184_v12 }
 0x3c6   : > { %v8761_v36 = vmax.f32 %v2894_v7, %v6017_v47  ;;  %v2937_v30 = vrot.slane %v1184_v12, %v7834_v44  ;;  %v1633_v49 = vcombine.high %v946_v19, %v946_v19  ;;  %v1179_v24 = vadd.f32 %v8377_v57, %v8303_v61 }
 0x3c7   : > { %6502 = vmatpush3.bf16.xpose.msk.msra.mxu0 %vm8432_vm9, %v6500_v37  ;;  %v1664_v32 = vrot.slane %v1650_v5, %v7834_v44  ;;  %v1665_v52 = vcombine.high %v1657_v46, %v1657_v46  ;;  %v5900_v4 = vrot.slane %v1657_v46, 9  ;;  %v2944_v1 = vrot.slane %v2930_v56, %v7834_v44 }
 0x3c8   : > { %v2945_v28 = vcombine.high %v2937_v30, %v2937_v30  ;;  %v6028_v50 = vrot.slane %v2937_v30, 9  ;;  %v1640_v38 = vrot.slane %v946_v19, %v7834_v44  ;;  %v1647_v45 = vrot.slane %v1633_v49, %v7834_v44 }
 0x3c9   : > { %v9619_v51 = vmov 0.0|0.0   ;;  %v1666_v27 = vcombine.high %v1664_v32, %v1664_v32  ;;  %v5901_v7 = vrot.slane %v1665_v52, 9  ;;  %v5902_v61 = vrot.slane %v1664_v32, 9 }
 0x3ca   : > { %6503 = vmatprep.subr.bf16.mxu0 %v9619_v51  ;;  %v2407_v63 = vmax.f32 %v1657_v46, %v5900_v4  ;;  %v2946_v10 = vcombine.high %v2944_v1, %v2944_v1  ;;  %v6029_v22 = vrot.slane %v2945_v28, 9  ;;  %v6030_v31 = vrot.slane %v2944_v1, 9 }
 0x3cb   : > { %v3687_v47 = vmax.f32 %v2937_v30, %v6028_v50  ;;  %v5903_v40 = vrot.slane %v1666_v27, 9  ;;  %v2408_v18 = vmax.f32 %v1665_v52, %v5901_v7  ;;  %v2409_v43 = vmax.f32 %v1664_v32, %v5902_v61 }
 0x3cc   : > { %v2487_v15 = vmax.f32 %v8712_v9, %v2407_v63  ;;  %v6031_v12 = vrot.slane %v2946_v10, 9  ;;  %v3688_v39 = vmax.f32 %v2945_v28, %v6029_v22  ;;  %v8774_v23 = vmax.f32 %v2944_v1, %v6030_v31  ;;  %v9620_v1 = vld [vmem:[#allocation63_spill] sm:$0xff] }
 0x3cd   : > { %v3767_v19 = vmax.f32 %v8720_v21, %v3687_v47  ;;  %v8777_v37 = vmax.f32 %v1666_v27, %v5903_v40  ;;  %v2488_v5 = vmax.f32 %v8714_v42, %v2408_v18  ;;  %v2489_v46 = vmax.f32 %v8716_v2, %v2409_v43 }
 0x3ce   : > { %v1648_v56 = vcombine.high %v1640_v38, %v1640_v38  ;;  %v8781_v49 = vmax.f32 %v2946_v10, %v6031_v12  ;;  %v3768_v30 = vmax.f32 %v8724_v55, %v3688_v39  ;;  %v3769_v9 = vmax.f32 %v8726_v53, %v8774_v23 }
 0x3cf   : > { %v2913_v32 = vcombine.high %v1179_v24, %v1179_v24  ;;  %v3677_v52 = vmax.f32 %v8710_v62, %v6018_v35  ;;  %v2490_v21 = vmax.f32 %v8718_v34, %v8777_v37  ;;  %v1649_v4 = vcombine.high %v1647_v45, %v1647_v45 }
 0x3d0   : > { %v961_v42 = vadd.f32 %v8373_v8, %v9620_v1  ;;  %v3678_v2 = vmax.f32 %v8730_v29, %v6019_v54  ;;  %v4504_v28 = vrot.slane %v2487_v15, %v7851_v20  ;;  %v3770_v55 = vmax.f32 %v8740_v58, %v8781_v49 }
 0x3d1   : > { %v5896_v50 = vrot.slane %v1640_v38, 9  ;;  %v8796_v27 = vrot.slane %v3767_v19, %v7851_v20  ;;  %v5897_v7 = vrot.slane %v1648_v56, 9  ;;  %v5898_v62 = vrot.slane %v1647_v45, 9 }
 0x3d2   : > { %v5899_v35 = vrot.slane %v1649_v4, 9  ;;  %v4508_v34 = vrot.slane %v2488_v5, %v7851_v20  ;;  %v2920_v63 = vrot.slane %v1179_v24, %v7834_v44  ;;  %v2927_v10 = vrot.slane %v2913_v32, %v7834_v44 }
 0x3d3   : > { %v2403_v61 = vmax.f32 %v1640_v38, %v5896_v50  ;;  %v2404_v29 = vmax.f32 %v1648_v56, %v5897_v7  ;;  %v2405_v54 = vmax.f32 %v1647_v45, %v5898_v62  ;;  %v1684_v31 = vcombine.high %v961_v42, %v961_v42 }
 0x3d4   : > { %v2406_v22 = vmax.f32 %v1649_v4, %v5899_v35  ;;  %v2928_v47 = vcombine.high %v2920_v63, %v2920_v63  ;;  %v2929_v40 = vcombine.high %v2927_v10, %v2927_v10  ;;  %v6024_v18 = vrot.slane %v2920_v63, 9 }
 0x3d5   : > { %v2483_v58 = vmax.f32 %v8722_v25, %v2403_v61  ;;  %v2484_v43 = vmax.f32 %v8732_v26, %v2404_v29  ;;  %v2485_v15 = vmax.f32 %v8734_v60, %v2405_v54  ;;  %v6026_v38 = vrot.slane %v2927_v10, 9  ;;  %v9621_v61 = vld [vmem:[#allocation64_spill] sm:$0xff] }
 0x3d6   : > { %v2486_v12 = vmax.f32 %v8745_v11, %v2406_v22  ;;  %v6025_v39 = vrot.slane %v2928_v47, 9  ;;  %v6027_v19 = vrot.slane %v2929_v40, 9  ;;  %v3683_v37 = vmax.f32 %v2920_v63, %v6024_v18 }
 0x3d7   : > { %v4488_v24 = vrot.slane %v2483_v58, %v7851_v20  ;;  %v4492_v45 = vrot.slane %v2484_v43, %v7851_v20  ;;  %v4496_v5 = vrot.slane %v2485_v15, %v7851_v20  ;;  %v3685_v56 = vmax.f32 %v2927_v10, %v6026_v38 }
 0x3d8   : > { %v4500_v25 = vrot.slane %v2486_v12, %v7851_v20  ;;  %v3684_v49 = vmax.f32 %v2928_v47, %v6025_v39  ;;  %v3686_v32 = vmax.f32 %v2929_v40, %v6027_v19  ;;  %v3763_v26 = vmax.f32 %v8754_v0, %v3683_v37  ;;  %v9624_v39 = vld [vmem:[#allocation66_spill] sm:$0xff] }
 0x3d9   : > { %v1691_v60 = vrot.slane %v961_v42, %v7834_v44  ;;  %v4512_v11 = vrot.slane %v2489_v46, %v7851_v20  ;;  %v4616_v4 = vsel %vm4108_vm1, %v4492_v45, %v4488_v24  ;;  %v3765_v1 = vmax.f32 %v3677_v52, %v3685_v56 }
 0x3da   : > { %v1698_v50 = vrot.slane %v1684_v31, %v7834_v44  ;;  %v4617_v7 = vsel %vm4110_vm2, %v4496_v5, %v4616_v4  ;;  %v3764_v62 = vmax.f32 %v8761_v36, %v3684_v49  ;;  %v3766_v35 = vmax.f32 %v3678_v2, %v3686_v32 }
 0x3db   : > { %v1194_v63 = vadd.f32 %v8377_v57, %v9621_v61  ;;  %v8819_v10 = vrot.slane %v3768_v30, %v7851_v20  ;;  %v4618_v0 = vsel %vm4112_vm3, %v4500_v25, %v4617_v7  ;;  %v4023_v46 = vrot.slane %v3765_v1, %v7851_v20  ;;  %v9625_v1 = vld [vmem:[#allocation48_spill] sm:$0xff] }
 0x3dc   : > { %v1699_v42 = vcombine.high %v1691_v60, %v1691_v60  ;;  %v4619_v52 = vsel %vm4114_vm4, %v4504_v28, %v4618_v0  ;;  %v4015_v29 = vrot.slane %v3763_v26, %v7851_v20  ;;  %v4019_v54 = vrot.slane %v3764_v62, %v7851_v20 }
 0x3dd   : > { %v4027_v36 = vrot.slane %v3766_v35, %v7851_v20  ;;  %v4516_v2 = vrot.slane %v2490_v21, %v7851_v20  ;;  %v4620_v22 = vsel %vm4116_vm5, %v4508_v34, %v4619_v52  ;;  %v1700_v31 = vcombine.high %v1698_v50, %v1698_v50 }
 0x3de   : > { %v5908_v30 = vrot.slane %v1691_v60, 9  ;;  %v4621_v58 = vsel %vm4118_vm6, %v4512_v11, %v4620_v22  ;;  %v4150_v47 = vsel %vm4108_vm1, %v4019_v54, %v4015_v29  ;;  %v5909_v40 = vrot.slane %v1699_v42, 9 }
 0x3df   : > { %v2964_v18 = vcombine.high %v1194_v63, %v1194_v63  ;;  %v8835_v28 = vrot.slane %v3769_v9, %v7851_v20  ;;  %v8838_v43 = vrot.slane %v3770_v55, %v7851_v20  ;;  %v4622_v21 = vsel %vm4120_vm7, %v4516_v2, %v4621_v58  ;;  %v9623_v9 = vld [vmem:[#allocation65_spill] sm:$0xff] }
 0x3e0   : > { %v4151_v34 = vsel %vm4110_vm2, %v4023_v46, %v4150_v47  ;;  %4650 = vst.msk [vmem:[#allocation4 + $0x28] sm:$0xff] %vm4171_vm8, %v4622_v21  ;;  %v5910_v12 = vrot.slane %v1698_v50, 9  ;;  %v2971_v38 = vrot.slane %v1194_v63, %v7834_v44  ;;  %v5911_v53 = vrot.slane %v1700_v31, 9  ;;  %v9626_v2 = vld [vmem:[#allocation49_spill] sm:$0xff] }
 0x3e1   : > { %9622 = vst [vmem:[#allocation55_spill] sm:$0xff] %v8838_v43  ;;  %v8844_v15 = vsel %vm4112_vm3, %v4027_v36, %v4151_v34  ;;  %v2978_v24 = vrot.slane %v2964_v18, %v7834_v44  ;;  %v8848_v23 = vmax.f32 %v1691_v60, %v5908_v30  ;;  %v956_v55 = vadd.f32 %v8373_v8, %v9623_v9  ;;  %v8868_v36 = vld [vmem:[#allocation18] ss:$0 sm:$0xff] }
 0x3e2   : > { %v1189_v19 = vadd.f32 %v8377_v57, %v9624_v39  ;;  %v8854_v37 = vmax.f32 %v1699_v42, %v5909_v40  ;;  %v2979_v45 = vcombine.high %v2971_v38, %v2971_v38  ;;  %v6036_v25 = vrot.slane %v2971_v38, 9 }
 0x3e3   : > { %v2980_v5 = vcombine.high %v2978_v24, %v2978_v24  ;;  %v1667_v56 = vcombine.high %v956_v55, %v956_v55  ;;  %v1674_v49 = vrot.slane %v956_v55, %v7834_v44  ;;  %v6038_v60 = vrot.slane %v2978_v24, 9 }
 0x3e4   : > { %v2947_v32 = vcombine.high %v1189_v19, %v1189_v19  ;;  %v2954_v26 = vrot.slane %v1189_v19, %v7834_v44  ;;  %v6037_v11 = vrot.slane %v2979_v45, 9  ;;  %v971_v7 = vadd.f32 %v8373_v8, %v9625_v1 }
 0x3e5   : > { %v6039_v4 = vrot.slane %v2980_v5, 9  ;;  %v1681_v62 = vrot.slane %v1667_v56, %v7834_v44  ;;  %v1682_v57 = vcombine.high %v1674_v49, %v1674_v49  ;;  %v5904_v35 = vrot.slane %v1674_v49, 9 }
 0x3e6   : > { %v2961_v61 = vrot.slane %v2947_v32, %v7834_v44  ;;  %v8862_v63 = vmax.f32 %v1698_v50, %v5910_v12  ;;  %v8864_v0 = vmax.f32 %v1700_v31, %v5911_v53  ;;  %v2962_v46 = vcombine.high %v2954_v26, %v2954_v26 }
 0x3e7   : > { %v6032_v42 = vrot.slane %v2954_v26, 9  ;;  %v8866_v52 = vmax.f32 %v2971_v38, %v6036_v25  ;;  %v1683_v29 = vcombine.high %v1681_v62, %v1681_v62  ;;  %v5905_v54 = vrot.slane %v1682_v57, 9  ;;  %v9627_v25 = vld [vmem:[#allocation47_spill] sm:$0xff] }
 0x3e8   : > { %v1204_v8 = vadd.f32 %v8868_v36, %v9626_v2  ;;  %v8872_v22 = vmax.f32 %v2979_v45, %v6037_v11  ;;  %v8874_v30 = vmax.f32 %v2978_v24, %v6038_v60  ;;  %v8876_v58 = vmax.f32 %v2980_v5, %v6039_v4  ;;  %v8887_v5 = vld [vmem:[#allocation15] ss:$0 sm:$0xff] }
 0x3e9   : > { %v2963_v50 = vcombine.high %v2961_v61, %v2961_v61  ;;  %v5906_v31 = vrot.slane %v1681_v62, 9  ;;  %v8878_v47 = vmax.f32 %v1674_v49, %v5904_v35  ;;  %v6033_v40 = vrot.slane %v2962_v46, 9 }
 0x3ea   : > { %v1718_v18 = vcombine.high %v971_v7, %v971_v7  ;;  %v5907_v21 = vrot.slane %v1683_v29, 9  ;;  %v6034_v34 = vrot.slane %v2961_v61, 9  ;;  %v8880_v12 = vmax.f32 %v2954_v26, %v6032_v42 }
 0x3eb   : > { %v1725_v38 = vrot.slane %v971_v7, %v7834_v44  ;;  %v8883_v53 = vmax.f32 %v1682_v57, %v5905_v54  ;;  %v2998_v24 = vcombine.high %v1204_v8, %v1204_v8  ;;  %v3005_v55 = vrot.slane %v1204_v8, %v7834_v44 }
 0x3ec   : > { %v1732_v9 = vrot.slane %v1718_v18, %v7834_v44  ;;  %v6035_v39 = vrot.slane %v2963_v50, 9  ;;  %v966_v56 = vadd.f32 %v8887_v5, %v9627_v25  ;;  %v8896_v59 = vmax.f32 %v2962_v46, %v6033_v40 }
 0x3ed   : > { %v1733_v19 = vcombine.high %v1725_v38, %v1725_v38  ;;  %v5916_v45 = vrot.slane %v1725_v38, 9  ;;  %v3012_v26 = vrot.slane %v2998_v24, %v7834_v44  ;;  %v3013_v11 = vcombine.high %v3005_v55, %v3005_v55 }
 0x3ee   : > { %v1734_v49 = vcombine.high %v1732_v9, %v1732_v9  ;;  %v5918_v32 = vrot.slane %v1732_v9, 9  ;;  %v6044_v1 = vrot.slane %v3005_v55, 9  ;;  %v1701_v7 = vcombine.high %v966_v56, %v966_v56 }
 0x3ef   : > { %v5917_v60 = vrot.slane %v1733_v19, 9  ;;  %v2423_v4 = vmax.f32 %v1725_v38, %v5916_v45  ;;  %v3014_v42 = vcombine.high %v3012_v26, %v3012_v26  ;;  %v6045_v54 = vrot.slane %v3013_v11, 9 }
 0x3f0   : > { %v5919_v57 = vrot.slane %v1734_v49, 9  ;;  %v2425_v35 = vmax.f32 %v1732_v9, %v5918_v32  ;;  %v6046_v18 = vrot.slane %v3012_v26, 9  ;;  %v3703_v51 = vmax.f32 %v3005_v55, %v6044_v1 }
 0x3f1   : > { %v2424_v2 = vmax.f32 %v1733_v19, %v5917_v60  ;;  %v2495_v8 = vmax.f32 %v8848_v23, %v2423_v4  ;;  %v6047_v3 = vrot.slane %v3014_v42, 9  ;;  %v3704_v48 = vmax.f32 %v3013_v11, %v6045_v54 }
 0x3f2   : > { %v2426_v6 = vmax.f32 %v1734_v49, %v5919_v57  ;;  %v2497_v25 = vmax.f32 %v8862_v63, %v2425_v35  ;;  %v2413_v24 = vmax.f32 %v1681_v62, %v5906_v31  ;;  %v3705_v38 = vmax.f32 %v3012_v26, %v6046_v18 }
 0x3f3   : > { %v2496_v43 = vmax.f32 %v8854_v37, %v2424_v2  ;;  %v3775_v45 = vmax.f32 %v8866_v52, %v3703_v51  ;;  %v8899_v19 = vmax.f32 %v3014_v42, %v6047_v3  ;;  %v3776_v23 = vmax.f32 %v8872_v22, %v3704_v48  ;;  %v9628_v52 = vld [vmem:[#allocation43_spill] sm:$0xff] }
 0x3f4   : > { %v2498_v9 = vmax.f32 %v8864_v0, %v2426_v6  ;;  %v2414_v55 = vmax.f32 %v1683_v29, %v5907_v21  ;;  %v3693_v49 = vmax.f32 %v2961_v61, %v6034_v34  ;;  %v3777_v63 = vmax.f32 %v8874_v30, %v3705_v38 }
 0x3f5   : > { %v1708_v32 = vrot.slane %v966_v56, %v7834_v44  ;;  %v3694_v62 = vmax.f32 %v2963_v50, %v6035_v39  ;;  %v4536_v37 = vrot.slane %v2495_v8, %v7851_v20  ;;  %v3778_v51 = vmax.f32 %v8876_v58, %v8899_v19 }
 0x3f6   : > { %v1715_v46 = vrot.slane %v1701_v7, %v7834_v44  ;;  %v4544_v6 = vrot.slane %v2497_v25, %v7851_v20  ;;  %v1199_v48 = vadd.f32 %v8868_v36, %v9628_v52  ;;  %v4540_v61 = vrot.slane %v2496_v43, %v7851_v20 }
 0x3f7   : > { %v1716_v3 = vcombine.high %v1708_v32, %v1708_v32  ;;  %v5912_v0 = vrot.slane %v1708_v32, 9  ;;  %v981_v30 = vadd.f32 %v8887_v5, %v8471_v17  ;;  %v4548_v21 = vrot.slane %v2498_v9, %v7851_v20 }
 0x3f8   : > { %v1717_v29 = vcombine.high %v1715_v46, %v1715_v46  ;;  %v5914_v22 = vrot.slane %v1715_v46, 9  ;;  %v2981_v40 = vcombine.high %v1199_v48, %v1199_v48  ;;  %v2988_v58 = vrot.slane %v1199_v48, %v7834_v44 }
 0x3f9   : > { %v5913_v50 = vrot.slane %v1716_v3, 9  ;;  %v2419_v31 = vmax.f32 %v1708_v32, %v5912_v0  ;;  %v8917_v34 = vrot.slane %v3775_v45, %v7851_v20  ;;  %v1752_v7 = vcombine.high %v981_v30, %v981_v30 }
 0x3fa   : > { %v5915_v39 = vrot.slane %v1717_v29, 9  ;;  %v2421_v56 = vmax.f32 %v1715_v46, %v5914_v22  ;;  %v2995_v11 = vrot.slane %v2981_v40, %v7834_v44  ;;  %v2996_v60 = vcombine.high %v2988_v58, %v2988_v58 }
 0x3fb   : > { %v2420_v26 = vmax.f32 %v1716_v3, %v5913_v50  ;;  %v2491_v43 = vmax.f32 %v8878_v47, %v2419_v31  ;;  %v6040_v1 = vrot.slane %v2988_v58, 9  ;;  %v1759_v54 = vrot.slane %v981_v30, %v7834_v44 }
 0x3fc   : > { %v2422_v4 = vmax.f32 %v1717_v29, %v5915_v39  ;;  %v2493_v17 = vmax.f32 %v2413_v24, %v2421_v56  ;;  %v2997_v35 = vcombine.high %v2995_v11, %v2995_v11  ;;  %v6041_v42 = vrot.slane %v2996_v60, 9 }
 0x3fd   : > { %v2492_v57 = vmax.f32 %v8883_v53, %v2420_v26  ;;  %v6042_v18 = vrot.slane %v2995_v11, 9  ;;  %v3699_v25 = vmax.f32 %v2988_v58, %v6040_v1  ;;  %v4520_v47 = vrot.slane %v2491_v43, %v7851_v20  ;;  %v9630_v1 = vld [vmem:[#allocation46_spill] sm:$0xff] }
 0x3fe   : > { %v2494_v2 = vmax.f32 %v2414_v55, %v2422_v4  ;;  %v4528_v8 = vrot.slane %v2493_v17, %v7851_v20  ;;  %v6043_v45 = vrot.slane %v2997_v35, 9  ;;  %v3700_v9 = vmax.f32 %v2996_v60, %v6041_v42  ;;  %v9629_v60 = vld [vmem:[#allocation45_spill] sm:$0xff] }
 0x3ff   : > { %v4524_v38 = vrot.slane %v2492_v57, %v7851_v20  ;;  %v3701_v19 = vmax.f32 %v2995_v11, %v6042_v18  ;;  %v3771_v53 = vmax.f32 %v8880_v12, %v3699_v25  ;;  %v1766_v32 = vrot.slane %v1752_v7, %v7834_v44 }
 0x400   : > { %v4532_v24 = vrot.slane %v2494_v2, %v7851_v20  ;;  %v8930_v46 = vrot.slane %v3776_v23, %v7851_v20  ;;  %v3702_v3 = vmax.f32 %v2997_v35, %v6043_v45  ;;  %v3772_v0 = vmax.f32 %v8896_v59, %v3700_v9 }
 0x401   : > { %v4623_v55 = vsel %vm4108_vm1, %v4524_v38, %v4520_v47  ;;  %v8935_v52 = vrot.slane %v3777_v63, %v7851_v20  ;;  %v3773_v29 = vmax.f32 %v3693_v49, %v3701_v19  ;;  %v1767_v22 = vcombine.high %v1759_v54, %v1759_v54 }
 0x402   : > { %v4624_v48 = vsel %vm4110_vm2, %v4528_v8, %v4623_v55  ;;  %v3774_v12 = vmax.f32 %v3694_v62, %v3702_v3  ;;  %v4047_v50 = vrot.slane %v3771_v53, %v7851_v20  ;;  %v4051_v23 = vrot.slane %v3772_v0, %v7851_v20 }
 0x403   : > { %v4625_v30 = vsel %vm4112_vm3, %v4532_v24, %v4624_v48  ;;  %v8942_v31 = vrot.slane %v3778_v51, %v7851_v20  ;;  %v4055_v59 = vrot.slane %v3773_v29, %v7851_v20  ;;  %v1768_v63 = vcombine.high %v1766_v32, %v1766_v32 }
 0x404   : > { %v4626_v40 = vsel %vm4114_vm4, %v4536_v37, %v4625_v30  ;;  %v4059_v49 = vrot.slane %v3774_v12, %v7851_v20  ;;  %v4157_v39 = vsel %vm4108_vm1, %v4051_v23, %v4047_v50  ;;  %v5924_v56 = vrot.slane %v1759_v54, 9  ;;  %v9631_v23 = vld [vmem:[#allocation50_spill] sm:$0xff] }
 0x405   : > { %v4627_v58 = vsel %vm4116_vm5, %v4540_v61, %v4626_v40  ;;  %v4158_v26 = vsel %vm4110_vm2, %v4055_v59, %v4157_v39  ;;  %v5925_v43 = vrot.slane %v1767_v22, 9  ;;  %v5926_v11 = vrot.slane %v1766_v32, 9 }
 0x406   : > { %v4628_v62 = vsel %vm4118_vm6, %v4544_v6, %v4627_v58  ;;  %v4159_v37 = vsel %vm4112_vm3, %v4059_v49, %v4158_v26  ;;  %v1214_v4 = vadd.f32 %v8868_v36, %v9629_v60  ;;  %v976_v61 = vadd.f32 %v8887_v5, %v8498_v33 }
 0x407   : > { %v4629_v51 = vsel %vm4120_vm7, %v4548_v21, %v4628_v62  ;;  %v5927_v17 = vrot.slane %v1768_v63, 9  ;;  %v1209_v6 = vadd.f32 %v8868_v36, %v9630_v1  ;;  %v4146_v7 = vsel %vm4114_vm4, %v8667_v14, %v8690_v16 }
 0x408   : > { %4651 = vst.msk [vmem:[#allocation4 + $0x30] sm:$0xff] %vm4171_vm8, %v4629_v51  ;;  %v4153_v21 = vsel %vm4114_vm4, %v8796_v27, %v8844_v15  ;;  %v3032_v57 = vcombine.high %v1214_v4, %v1214_v4  ;;  %v3039_v35 = vrot.slane %v1214_v4, %v7834_v44  ;;  %v1735_v42 = vcombine.high %v976_v61, %v976_v61  ;;  %v9632_v51 = vld [vmem:[#allocation54_spill] sm:$0xff]  ;;  %v9633_v4 = vld [vmem:[#allocation55_spill] sm:$0xff] }
 0x409   : > { %v1742_v33 = vrot.slane %v976_v61, %v7834_v44  ;;  %v8968_v2 = vmax.f32 %v1759_v54, %v5924_v56  ;;  %v3015_v8 = vcombine.high %v1209_v6, %v1209_v6  ;;  %v4147_v18 = vsel %vm4116_vm5, %v8673_v13, %v4146_v7 }
 0x40a   : > { %v4154_v25 = vsel %vm4116_vm5, %v8819_v10, %v4153_v21  ;;  %v3046_v14 = vrot.slane %v3032_v57, %v7834_v44  ;;  %v3047_v16 = vcombine.high %v3039_v35, %v3039_v35  ;;  %v1749_v27 = vrot.slane %v1735_v42, %v7834_v44  ;;  %v9635_v21 = vld [vmem:[#allocation52_spill] sm:$0xff] }
 0x40b   : > { %v3022_v15 = vrot.slane %v1209_v6, %v7834_v44  ;;  %v6052_v47 = vrot.slane %v3039_v35, 9  ;;  %v1750_v38 = vcombine.high %v1742_v33, %v1742_v33  ;;  %v5920_v45 = vrot.slane %v1742_v33, 9  ;;  %v9634_v6 = vld [vmem:[#allocation51_spill] sm:$0xff] }
 0x40c   : > { %v8978_v54 = vrot.slane %v3015_v8, %v7834_v44  ;;  %v8980_v9 = vmax.f32 %v1767_v22, %v5925_v43  ;;  %v3048_v24 = vcombine.high %v3046_v14, %v3046_v14  ;;  %v6053_v13 = vrot.slane %v3047_v16, 9 }
 0x40d   : > { %v6054_v19 = vrot.slane %v3046_v14, 9  ;;  %v8982_v53 = vmax.f32 %v1766_v32, %v5926_v11  ;;  %v1751_v10 = vcombine.high %v1749_v27, %v1749_v27  ;;  %v5921_v55 = vrot.slane %v1750_v38, 9 }
 0x40e   : > { %v5922_v3 = vrot.slane %v1749_v27, 9  ;;  %v8984_v0 = vmax.f32 %v1768_v63, %v5927_v17  ;;  %v6055_v48 = vrot.slane %v3048_v24, 9  ;;  %v3030_v29 = vcombine.high %v3022_v15, %v3022_v15 }
 0x40f   : > { %v8988_v30 = vcombine.high %v8978_v54, %v8978_v54  ;;  %v8990_v12 = vmax.f32 %v3039_v35, %v6052_v47  ;;  %v8992_v22 = vmax.f32 %v3047_v16, %v6053_v13  ;;  %v8994_v50 = vmax.f32 %v1742_v33, %v5920_v45  ;;  %v9637_v47 = vld [vmem:[#allocation53_spill] sm:$0xff] }
 0x410   : > { %v991_v32 = vadd.f32 %v8887_v5, %v9631_v23  ;;  %v8998_v40 = vmax.f32 %v3046_v14, %v6054_v19  ;;  %v5923_v59 = vrot.slane %v1751_v10, 9  ;;  %v9000_v63 = vmax.f32 %v1750_v38, %v5921_v55 }
 0x411   : > { %v9002_v58 = vmax.f32 %v1749_v27, %v5922_v3  ;;  %v9004_v49 = vmax.f32 %v3048_v24, %v6055_v48  ;;  %v6048_v39 = vrot.slane %v3022_v15, 9  ;;  %v4148_v56 = vsel %vm4118_vm6, %v8676_v41, %v4147_v18 }
 0x412   : > { %v4155_v62 = vsel %vm4118_vm6, %v8835_v28, %v4154_v25  ;;  %v6049_v26 = vrot.slane %v3030_v29, 9  ;;  %v6050_v43 = vrot.slane %v8978_v54, 9  ;;  %v6051_v11 = vrot.slane %v8988_v30, 9 }
 0x413   : > { %v4149_v60 = vsel %vm4120_vm7, %v9632_v51, %v4148_v56  ;;  %v4156_v61 = vsel %vm4120_vm7, %v9633_v4, %v4155_v62  ;;  %v1786_v17 = vcombine.high %v991_v32, %v991_v32  ;;  %v1793_v1 = vrot.slane %v991_v32, %v7834_v44 }
 0x414   : > { %v1224_v41 = vadd.f32 %v8868_v36, %v9634_v6  ;;  %v9019_v7 = vmax.f32 %v1751_v10, %v5923_v59  ;;  %v6504_v28 = vpack.c.bf16 %v4156_v61, %v4149_v60  ;;  %v986_v57 = vadd.f32 %v8887_v5, %v9635_v21 }
 0x415   : > { %v4160_v35 = vsel %vm4114_vm4, %v8917_v34, %v4159_v37  ;;  %v1800_v42 = vrot.slane %v1786_v17, %v7834_v44  ;;  %v1801_v33 = vcombine.high %v1793_v1, %v1793_v1  ;;  %v5932_v8 = vrot.slane %v1793_v1, 9 }
 0x416   : > { %v3066_v18 = vcombine.high %v1224_v41, %v1224_v41  ;;  %v9026_v25 = vmax.f32 %v3022_v15, %v6048_v39  ;;  %6506 = vmatpush3.bf16.xpose.msk.msra.mxu0 %vm8432_vm9, %v6504_v28  ;;  %v3073_v16 = vrot.slane %v1224_v41, %v7834_v44  ;;  %v1769_v27 = vcombine.high %v986_v57, %v986_v57 }
 0x417   : > { %v1219_v38 = vadd.f32 %v8868_v36, %v9637_v47  ;;  %v1802_v5 = vcombine.high %v1800_v42, %v1800_v42  ;;  %v5933_v45 = vrot.slane %v1801_v33, 9  ;;  %v5934_v24 = vrot.slane %v1800_v42, 9 }
 0x418   : > { %v2439_v34 = vmax.f32 %v1793_v1, %v5932_v8  ;;  %v9638_v37 = vmov 0.0|0.0   ;;  %v3080_v13 = vrot.slane %v3066_v18, %v7834_v44  ;;  %v3081_v19 = vcombine.high %v3073_v16, %v3073_v16 }
 0x419   : > { %6507 = vmatprep.subr.bf16.mxu0 %v9638_v37  ;;  %v6060_v15 = vrot.slane %v3073_v16, 9  ;;  %v1776_v10 = vrot.slane %v986_v57, %v7834_v44  ;;  %v5935_v55 = vrot.slane %v1802_v5, 9  ;;  %v2440_v3 = vmax.f32 %v1801_v33, %v5933_v45 }
 0x41a   : > { %v2441_v48 = vmax.f32 %v1800_v42, %v5934_v24  ;;  %v2503_v23 = vmax.f32 %v8968_v2, %v2439_v34  ;;  %v3082_v32 = vcombine.high %v3080_v13, %v3080_v13  ;;  %v6061_v59 = vrot.slane %v3081_v19, 9 }
 0x41b   : > { %v6062_v36 = vrot.slane %v3080_v13, 9  ;;  %v9037_v39 = vmax.f32 %v3073_v16, %v6060_v15  ;;  %v2442_v56 = vmax.f32 %v1802_v5, %v5935_v55  ;;  %v2504_v62 = vmax.f32 %v8980_v9, %v2440_v3 }
 0x41c   : > { %v2505_v51 = vmax.f32 %v8982_v53, %v2441_v48  ;;  %v1783_v60 = vrot.slane %v1769_v27, %v7834_v44  ;;  %v6063_v4 = vrot.slane %v3082_v32, 9  ;;  %v9042_v61 = vmax.f32 %v3081_v19, %v6061_v59 }
 0x41d   : > { %v9044_v17 = vmax.f32 %v3080_v13, %v6062_v36  ;;  %v3783_v2 = vmax.f32 %v8990_v12, %v9037_v39  ;;  %v3708_v1 = vmax.f32 %v3030_v29, %v6049_v26  ;;  %v3709_v6 = vmax.f32 %v8978_v54, %v6050_v43 }
 0x41e   : > { %v2506_v41 = vmax.f32 %v8984_v0, %v2442_v56  ;;  %v1784_v28 = vcombine.high %v1776_v10, %v1776_v10  ;;  %v9050_v21 = vmax.f32 %v3082_v32, %v6063_v4  ;;  %v3784_v9 = vmax.f32 %v8992_v22, %v9042_v61  ;;  %v3787_v22 = vld [vmem:[#allocation20] sm:$0xff] }
 0x41f   : > { %v3785_v53 = vmax.f32 %v8998_v40, %v9044_v17  ;;  %v3049_v57 = vcombine.high %v1219_v38, %v1219_v38  ;;  %v3710_v42 = vmax.f32 %v8988_v30, %v6051_v11  ;;  %v1785_v33 = vcombine.high %v1783_v60, %v1783_v60 }
 0x420   : > { %v5928_v8 = vrot.slane %v1776_v10, 9  ;;  %v5929_v18 = vrot.slane %v1784_v28, 9  ;;  %v4568_v29 = vrot.slane %v2503_v23, %v7851_v20  ;;  %v4572_v54 = vrot.slane %v2504_v62, %v7851_v20 }
 0x421   : > { %v3786_v0 = vmax.f32 %v9004_v49, %v9050_v21  ;;  %v5930_v26 = vrot.slane %v1783_v60, 9  ;;  %v5931_v43 = vrot.slane %v1785_v33, 9  ;;  %v3056_v47 = vrot.slane %v1219_v38, %v7834_v44 }
 0x422   : > { %v2435_v16 = vmax.f32 %v1776_v10, %v5928_v8  ;;  %v2436_v27 = vmax.f32 %v1784_v28, %v5929_v18  ;;  %v4576_v5 = vrot.slane %v2505_v51, %v7851_v20  ;;  %v3063_v30 = vrot.slane %v3049_v57, %v7834_v44 }
 0x423   : > { %v2437_v45 = vmax.f32 %v1783_v60, %v5930_v26  ;;  %v4161_v11 = vsel %vm4116_vm5, %v8930_v46, %v4160_v35  ;;  %v2438_v24 = vmax.f32 %v1785_v33, %v5931_v43  ;;  %v3064_v49 = vcombine.high %v3056_v47, %v3056_v47 }
 0x424   : > { %v2499_v34 = vmax.f32 %v8994_v50, %v2435_v16  ;;  %v2500_v37 = vmax.f32 %v9000_v63, %v2436_v27  ;;  %v3065_v19 = vcombine.high %v3063_v30, %v3063_v30  ;;  %v6056_v15 = vrot.slane %v3056_v47, 9 }
 0x425   : > { %v2501_v13 = vmax.f32 %v9002_v58, %v2437_v45  ;;  %v6058_v10 = vrot.slane %v3063_v30, 9  ;;  %v2502_v38 = vmax.f32 %v9019_v7, %v2438_v24  ;;  %v6057_v3 = vrot.slane %v3064_v49, 9 }
 0x426   : > { %v4552_v55 = vrot.slane %v2499_v34, %v7851_v20  ;;  %v4556_v44 = vrot.slane %v2500_v37, %v7851_v20  ;;  %v6059_v35 = vrot.slane %v3065_v19, 9  ;;  %v3715_v48 = vmax.f32 %v3056_v47, %v6056_v15 }
 0x427   : > { %v4560_v46 = vrot.slane %v2501_v13, %v7851_v20  ;;  %v3717_v50 = vmax.f32 %v3063_v30, %v6058_v10  ;;  %v4564_v63 = vrot.slane %v2502_v38, %v7851_v20  ;;  %v3716_v58 = vmax.f32 %v3064_v49, %v6057_v3 }
 0x428   : > { %v4630_v23 = vsel %vm4108_vm1, %v4556_v44, %v4552_v55  ;;  %v4162_v32 = vsel %vm4118_vm6, %v8935_v52, %v4161_v11  ;;  %v3718_v59 = vmax.f32 %v3065_v19, %v6059_v35  ;;  %v3779_v36 = vmax.f32 %v9026_v25, %v3715_v48 }
 0x429   : > { %v4631_v7 = vsel %vm4110_vm2, %v4560_v46, %v4630_v23  ;;  %v3781_v56 = vmax.f32 %v3709_v6, %v3717_v50  ;;  %v3780_v51 = vmax.f32 %v3708_v1, %v3716_v58  ;;  %v4163_v60 = vsel %vm4120_vm7, %v8942_v31, %v4162_v32 }
 0x42a   : > { %v4632_v62 = vsel %vm4112_vm3, %v4564_v63, %v4631_v7  ;;  %v4580_v4 = vrot.slane %v2506_v41, %v7851_v20  ;;  %v3782_v21 = vmax.f32 %v3710_v42, %v3718_v59  ;;  %v4079_v33 = vrot.slane %v3779_v36, %v7851_v20 }
 0x42b   : > { %v4633_v28 = vsel %vm4114_vm4, %v4568_v29, %v4632_v62  ;;  %v4087_v57 = vrot.slane %v3781_v56, %v7851_v20  ;;  %v4083_v25 = vrot.slane %v3780_v51, %v7851_v20  ;;  %v7297_v8 = vmov 0.0  }
 0x42c   : > { %v4634_v52 = vsel %vm4116_vm5, %v4572_v54, %v4633_v28  ;;  %v4091_v1 = vrot.slane %v3782_v21, %v7851_v20  ;;  %6391 = vmatprep.mubr.msk.f32.mxu0 %vm7296_vm10, %v7297_v8  ;;  %v4095_v42 = vrot.slane %v3783_v2, %v7851_v20  ;;  %v4099_v29 = vrot.slane %v3784_v9, %v7851_v20 }
 0x42d   : > { %v4635_v6 = vsel %vm4118_vm6, %v4576_v5, %v4634_v52  ;;  %v4164_v41 = vsel %vm4108_vm1, %v4083_v25, %v4079_v33  ;;  %v4103_v26 = vrot.slane %v3785_v53, %v7851_v20  ;;  %v4107_v12 = vrot.slane %v3786_v0, %v7851_v20 }
 0x42e   : > { %v4636_v31 = vsel %vm4120_vm7, %v4580_v4, %v4635_v6  ;;  %v4165_v18 = vsel %vm4110_vm2, %v4087_v57, %v4164_v41 }
 0x42f   : > { %4652 = vst.msk [vmem:[#allocation4 + $0x38] sm:$0xff] %vm4171_vm8, %v4636_v31  ;;  %v4166_v54 = vsel %vm4112_vm3, %v4091_v1, %v4165_v18 }
 0x430   : > { %v4167_v43 = vsel %vm4114_vm4, %v4095_v42, %v4166_v54 }
 0x431   : > { %v4168_v39 = vsel %vm4116_vm5, %v4099_v29, %v4167_v43 }
 0x432   : > { %v4169_v2 = vsel %vm4118_vm6, %v4103_v26, %v4168_v39 }
 0x433   : > { %v4170_v16 = vsel %vm4120_vm7, %v4107_v12, %v4169_v2 }
 0x434   : > { %v6508_v27 = vpack.c.bf16 %v4170_v16, %v4163_v60 }
 0x436   : > { %6510 = vmatpush3.bf16.xpose.msk.msra.mxu0 %vm8432_vm9, %v6508_v27 }
 0x43d   : > { %6392 = vmatmul.mubr.msk.f32.vlgmr.msra.gmra.mrb[32].mxu0 %vm4171_vm8, %v3787_v22 }
 0x510   : > { %v4257_v40 = vpop.f32.mrb[32].mxu0 }
 0x511   : > { %4654 = vst.msk [vmem:[#allocation5] sm:$0xff] %vm4653_vm11, %v4257_v40  ;;  %v6393_v61 = vpop.f32.mrb[33].mxu0 }
 0x512 PF: > { %s9639_s5 = scalar_lea.vmem [#allocation6], %s7716_s12  ;;  %v4656_v17 = vld [vmem:[#allocation11] sm:$0xff]  ;;  %v4890_v9 = vld [vmem:[#allocation4] sm:$0xff]  ;;  %vm4898_vm12 = vcmask 31744   ;;  %vm4696_vm14 = vcmask 64512   ;;  %v4892_v5 = vld [vmem:[#allocation4 + $0x10] sm:$0xff] }
 0x513   : > { %v4655_v20 = vld [vmem:[%s9639_s5] sm:$0xff]  ;;  %6394 = vmatprep.subr.mxu1 %v4656_v17  ;;  %vm9119_vm13 = vmpackc.low %vm4898_vm12, %vm4898_vm12  ;;  %v4893_v45 = vld [vmem:[#allocation4 + $0x18] sm:$0xff]  ;;  %vm5116_vm15 = vcmask 523264   ;;  %vm7299_vm0 = vmmov 0   ;;  %s9644_s24 = sld [smem:[#allocation40_spill]]  ;;  %s9645_s3 = sld [smem:[#allocation41_spill]] }
 0x514   : > { %4664 = vxpose.xlu0.b32.start.end [1/1] (short) %v4655_v20, 128  ;;  %6395 = vmatpush3.msra.mxu1 %v4656_v17  ;;  %v4891_v53 = vld [vmem:[#allocation4 + $0x8] sm:$0xff]  ;;  %v6517_v30 = vpack.c.bf16 %v4893_v45, %v4892_v5  ;;  %v4894_v34 = vld [vmem:[#allocation4 + $0x20] sm:$0xff]  ;;  %v4896_v15 = vld [vmem:[#allocation4 + $0x30] sm:$0xff]  ;;  %s5476_s16 = sshll.u32 %s7752_s8, 4  ;;  %s9646_s29 = sld [smem:[#allocation79_spill]]  ;;  %s9377_s16 = int_to_ptr.vmem [resolvable:$true] %s5476_s16 }
 0x515   : > { %v6511_v14 = vpack.c.bf16 %v4891_v53, %v4890_v9  ;;  %v4895_v37 = vld [vmem:[#allocation4 + $0x28] sm:$0xff]  ;;  %v4897_v10 = vld [vmem:[#allocation4 + $0x38] sm:$0xff]  ;;  %v6073_v7 = vld [vmem:[#allocation12] ss:$0 sm:$0xff]  ;;  %s5446_s11 = scalar_lea.sflag [#allocation25], %s7713_s9  ;;  %s7125_s19 = scalar_lea.vmem %s9377_s16, 2048 }
 0x516   : > { %v6523_v49 = vpack.c.bf16 %v4895_v37, %v4894_v34  ;;  %v6529_v38 = vpack.c.bf16 %v4897_v10, %v4896_v15  ;;  %vm9302_vm1 = vmpackc.low %vm5116_vm15, %vm5116_vm15  ;;  %p7126_p4 = scmp.ne.s32.totalorder %s9377_s16, %s7125_s19  ;;  %p9647_p0 = scmp.ne.s32.totalorder %s9531_s14, 0 }
 0x517   : > { %6513 = vmatprep.subr.msk.bf16.mxu1 %vm9119_vm13, %v6511_v14  ;;  %s7302_s5 = smov [#allocation24]  }
 0x518   : > { %p7127_p13 = pnand %p7126_p4, %p9647_p0 }
 0x519   : > { %s6135_s10 = sshll.u32 %s9644_s24, 4  ;;  %s6136_s7 = sshll.u32 %s9645_s3, 5 }
 0x51a   : > { %s5473_s20 = sadd.s32 %s6136_s7, %s6135_s10  ;;  %p7128_p5 = pneg %p7127_p13 }
 0x51b   : > { %s6137_s15 = sshll.u32 %s5473_s20, 7  ;;  %s7129_s10 = sshll.u32 %s7302_s5, 4  ;;  %s7130_s10 = int_to_ptr.vmem [resolvable:$false] %s7129_s10 }
 0x51c   : > { %s9382_s6 = scalar_lea.hbm %s9646_s29, %s6137_s15  ;;  %p7132_p11 = scmp.lt.s32.totalorder %s9377_s16, %s7130_s10 }
 0x594   : > { %v4680_v47 = vpop.trf.xlu0 }
 0x595   : > { %6396 = vmatprep.mubr.msk.f32.mxu1 %vm4696_vm14, %v4680_v47 }
 0x598   : > { %v4681_v11 = vpop.trf.xlu0 }
 0x599   : > { %6397 = vmatmul.mubr.msk.f32.vlgmr.msra.gmra.mrb[0].mxu1 %vm4696_vm14, %v4681_v11 }
 0x59a   : > { %6516 = vmatpush3.bf16.xpose.msk.msra.mxu1 %vm9119_vm13, %v6511_v14 }
 0x59b   : > { %6519 = vmatprep.subr.msk.bf16.mxu1 %vm9119_vm13, %v6517_v30 }
 0x59c   : > { %v4682_v24 = vpop.trf.xlu0 }
 0x59d   : > { %6399 = vmatprep.mubr.msk.f32.mxu1 %vm4696_vm14, %v4682_v24 }
 0x5a0   : > { %v4683_v13 = vpop.trf.xlu0 }
 0x5a1   : > { %6400 = vmatmul.mubr.msk.f32.gmra.mrb[2].mxu1 %vm4696_vm14, %v4683_v13 }
 0x5a2   : > { %6522 = vmatpush3.bf16.xpose.msk.msra.mxu1 %vm9119_vm13, %v6517_v30 }
 0x5a3   : > { %6525 = vmatprep.subr.msk.bf16.mxu1 %vm9119_vm13, %v6523_v49 }
 0x5a4   : > { %v4684_v19 = vpop.trf.xlu0 }
 0x5a5   : > { %6402 = vmatprep.mubr.msk.f32.mxu1 %vm4696_vm14, %v4684_v19 }
 0x5a8   : > { %v4685_v55 = vpop.trf.xlu0 }
 0x5a9   : > { %6403 = vmatmul.mubr.msk.f32.gmra.mrb[4].mxu1 %vm4696_vm14, %v4685_v55 }
 0x5aa   : > { %6528 = vmatpush3.bf16.xpose.msk.msra.mxu1 %vm9119_vm13, %v6523_v49 }
 0x5ab   : > { %6531 = vmatprep.subr.msk.bf16.mxu1 %vm9119_vm13, %v6529_v38 }
 0x5ac   : > { %v4686_v44 = vpop.trf.xlu0 }
 0x5ad   : > { %6405 = vmatprep.mubr.msk.f32.mxu1 %vm4696_vm14, %v4686_v44 }
 0x5b0   : > { %v4687_v3 = vpop.trf.xlu0 }
 0x5b1   : > { %6406 = vmatmul.mubr.msk.f32.gmra.mrb[6].mxu1 %vm4696_vm14, %v4687_v3 }
 0x5b2   : > { %6534 = vmatpush3.bf16.xpose.msk.msra.mxu1 %vm9119_vm13, %v6529_v38 }
 0x5b4   : > { %v4688_v46 = vpop.trf.xlu0 }
 0x5b5   : > { %6408 = vmatprep.mubr.msk.f32.mxu1 %vm4696_vm14, %v4688_v46 }
 0x5b8   : > { %v4689_v35 = vpop.trf.xlu0 }
 0x5b9   : > { %6409 = vmatmul.mubr.msk.f32.gmra.mrb[8].mxu1 %vm4696_vm14, %v4689_v35 }
 0x5bc   : > { %v4690_v48 = vpop.trf.xlu0 }
 0x5bd   : > { %6411 = vmatprep.mubr.msk.f32.mxu1 %vm4696_vm14, %v4690_v48 }
 0x5c0   : > { %v4691_v50 = vpop.trf.xlu0 }
 0x5c1   : > { %6412 = vmatmul.mubr.msk.f32.gmra.mrb[10].mxu1 %vm4696_vm14, %v4691_v50 }
 0x5c4   : > { %v4692_v63 = vpop.trf.xlu0 }
 0x5c5   : > { %6414 = vmatprep.mubr.msk.f32.mxu1 %vm4696_vm14, %v4692_v63 }
 0x5c8   : > { %v4693_v23 = vpop.trf.xlu0 }
 0x5c9   : > { %6415 = vmatmul.mubr.msk.f32.gmra.mrb[12].mxu1 %vm4696_vm14, %v4693_v23 }
 0x5cc   : > { %v4694_v58 = vpop.trf.xlu0 }
 0x5cd   : > { %6417 = vmatprep.mubr.msk.f32.mxu1 %vm4696_vm14, %v4694_v58 }
 0x5d0   : > { %v4695_v32 = vpop.trf.xlu0 }
 0x5d1   : > { %6418 = vmatmul.mubr.msk.f32.gmra.mrb[14].mxu1 %vm4696_vm14, %v4695_v32 }
 0x66c   : > { %v6398_v59 = vpop.f32.mrb[0].mxu1 }
 0x66d   : > { %v4811_v36 = vpop.f32.mrb[1].mxu1  ;;  %v4817_v62 = vadd.f32 %v6398_v59, %v6073_v7 }
 0x66e   : > { %v4812_v56 = vadd.f32 %v6073_v7, %v4811_v36 }
 0x670   : > { %6436 = vmatprep.mubr.msk.f32.mxu1 %vm4898_vm12, %v4812_v56 }
 0x671   : > { %6437 = vmatmul.mubr.msk.f32.vlgmr.msra.gmra.mrb[16].mxu1 %vm4898_vm12, %v4817_v62 }
 0x674   : > { %v6401_v51 = vpop.f32.mrb[2].mxu1 }
 0x675   : > { %v4821_v60 = vpop.f32.mrb[3].mxu1  ;;  %v4827_v28 = vadd.f32 %v6401_v51, %v6073_v7 }
 0x676   : > { %v4822_v4 = vadd.f32 %v6073_v7, %v4821_v60 }
 0x678   : > { %6439 = vmatprep.mubr.msk.f32.mxu1 %vm4898_vm12, %v4822_v4 }
 0x679   : > { %6440 = vmatmul.mubr.msk.f32.gmra.mrb[18].mxu1 %vm4898_vm12, %v4827_v28 }
 0x67c   : > { %v6404_v21 = vpop.f32.mrb[4].mxu1 }
 0x67d   : > { %v4831_v57 = vpop.f32.mrb[5].mxu1  ;;  %v4837_v33 = vadd.f32 %v6404_v21, %v6073_v7 }
 0x67e   : > { %v4832_v52 = vadd.f32 %v6073_v7, %v4831_v57 }
 0x680   : > { %6442 = vmatprep.mubr.msk.f32.mxu1 %vm4898_vm12, %v4832_v52 }
 0x681   : > { %6443 = vmatmul.mubr.msk.f32.gmra.mrb[20].mxu1 %vm4898_vm12, %v4837_v33 }
 0x684   : > { %v6407_v25 = vpop.f32.mrb[6].mxu1 }
 0x685   : > { %v4841_v6 = vpop.f32.mrb[7].mxu1  ;;  %v4847_v8 = vadd.f32 %v6407_v25, %v6073_v7 }
 0x686   : > { %v4842_v1 = vadd.f32 %v6073_v7, %v4841_v6 }
 0x688   : > { %6445 = vmatprep.mubr.msk.f32.mxu1 %vm4898_vm12, %v4842_v1 }
 0x689   : > { %6446 = vmatmul.mubr.msk.f32.gmra.mrb[22].mxu1 %vm4898_vm12, %v4847_v8 }
 0x68c   : > { %v6410_v31 = vpop.f32.mrb[8].mxu1 }
 0x68d   : > { %v4851_v41 = vpop.f32.mrb[9].mxu1  ;;  %v4857_v18 = vadd.f32 %v6410_v31, %v6073_v7 }
 0x68e   : > { %v4852_v42 = vadd.f32 %v6073_v7, %v4851_v41 }
 0x690   : > { %6448 = vmatprep.mubr.msk.f32.mxu1 %vm4898_vm12, %v4852_v42 }
 0x691   : > { %6449 = vmatmul.mubr.msk.f32.gmra.mrb[24].mxu1 %vm4898_vm12, %v4857_v18 }
 0x694   : > { %v6413_v29 = vpop.f32.mrb[10].mxu1 }
 0x695   : > { %v4861_v54 = vpop.f32.mrb[11].mxu1  ;;  %v4867_v43 = vadd.f32 %v6413_v29, %v6073_v7 }
 0x696   : > { %v4862_v26 = vadd.f32 %v6073_v7, %v4861_v54 }
 0x698   : > { %6451 = vmatprep.mubr.msk.f32.mxu1 %vm4898_vm12, %v4862_v26 }
 0x699   : > { %6452 = vmatmul.mubr.msk.f32.gmra.mrb[26].mxu1 %vm4898_vm12, %v4867_v43 }
 0x69c   : > { %v6416_v12 = vpop.f32.mrb[12].mxu1 }
 0x69d   : > { %v4877_v39 = vadd.f32 %v6416_v12, %v6073_v7  ;;  %v4871_v2 = vpop.f32.mrb[13].mxu1 }
 0x69e   : > { %v4872_v16 = vadd.f32 %v6073_v7, %v4871_v2 }
 0x6a0   : > { %6454 = vmatprep.mubr.msk.f32.mxu1 %vm4898_vm12, %v4872_v16 }
 0x6a1   : > { %6455 = vmatmul.mubr.msk.f32.gmra.mrb[28].mxu1 %vm4898_vm12, %v4877_v39 }
 0x6a4   : > { %v6419_v27 = vpop.f32.mrb[14].mxu1 }
 0x6a5   : > { %v4887_v22 = vadd.f32 %v6419_v27, %v6073_v7  ;;  %v4881_v40 = vpop.f32.mrb[15].mxu1 }
 0x6a6   : > { %v4882_v61 = vadd.f32 %v6073_v7, %v4881_v40 }
 0x6a8   : > { %6457 = vmatprep.mubr.msk.f32.mxu1 %vm4898_vm12, %v4882_v61 }
 0x6a9   : > { %6458 = vmatmul.mubr.msk.f32.gmra.mrb[30].mxu1 %vm4898_vm12, %v4887_v22 }
 0x744   : > { %v6438_v20 = vpop.f32.mrb[16].mxu1 }
 0x745   : > { %v5037_v17 = vpop.f32.mrb[17].mxu1  ;;  %v5120_v9 = vsel %vm5116_vm15, %v6438_v20, -inf }
 0x746   : > { %5121 = vmax.xlane.f32.xlu1 %v5120_v9  ;;  %v5117_v53 = vsel %vm5116_vm15, %v5037_v17, -inf }
 0x747   : > { %5118 = vmax.xlane.f32.xlu0 %v5117_v53 }
 0x74c   : > { %v6441_v14 = vpop.f32.mrb[18].mxu1 }
 0x74d   : > { %v5047_v0 = vpop.f32.mrb[19].mxu1  ;;  %v5126_v47 = vsel %vm5116_vm15, %v6441_v14, -inf }
 0x74e   : > { %5127 = vmax.xlane.f32.xlu1 %v5126_v47  ;;  %v5123_v5 = vsel %vm5116_vm15, %v5047_v0, -inf }
 0x752   : > { %5124 = vmax.xlane.f32.xlu1 %v5123_v5 }
 0x754   : > { %v6444_v45 = vpop.f32.mrb[20].mxu1 }
 0x755   : > { %v9175_v30 = vpop.f32.mrb[21].mxu1  ;;  %v5132_v11 = vsel %vm5116_vm15, %v6444_v45, -inf }
 0x756   : > { %5133 = vmax.xlane.f32.xlu1 %v5132_v11  ;;  %v5129_v24 = vsel %vm5116_vm15, %v9175_v30, -inf }
 0x75a   : > { %5130 = vmax.xlane.f32.xlu1 %v5129_v24 }
 0x75c   : > { %v9180_v34 = vpop.f32.mrb[22].mxu1 }
 0x75d   : > { %v9182_v37 = vpop.f32.mrb[23].mxu1  ;;  %v5138_v49 = vsel %vm5116_vm15, %v9180_v34, -inf }
 0x75e   : > { %5139 = vmax.xlane.f32.xlu1 %v5138_v49  ;;  %v5135_v13 = vsel %vm5116_vm15, %v9182_v37, -inf }
 0x762   : > { %5136 = vmax.xlane.f32.xlu1 %v5135_v13 }
 0x764   : > { %v9188_v19 = vpop.f32.mrb[24].mxu1 }
 0x765   : > { %v9190_v15 = vpop.f32.mrb[25].mxu1  ;;  %v5144_v10 = vsel %vm5116_vm15, %v9188_v19, -inf }
 0x766   : > { %5145 = vmax.xlane.f32.xlu1 %v5144_v10  ;;  %v5141_v38 = vsel %vm5116_vm15, %v9190_v15, -inf }
 0x76a   : > { %5142 = vmax.xlane.f32.xlu1 %v5141_v38 }
 0x76c   : > { %v9196_v55 = vpop.f32.mrb[26].mxu1 }
 0x76d   : > { %v9198_v44 = vpop.f32.mrb[27].mxu1  ;;  %v5150_v3 = vsel %vm5116_vm15, %v9196_v55, -inf }
 0x76e   : > { %5151 = vmax.xlane.f32.xlu1 %v5150_v3  ;;  %v5147_v46 = vsel %vm5116_vm15, %v9198_v44, -inf }
 0x772   : > { %5148 = vmax.xlane.f32.xlu1 %v5147_v46 }
 0x774   : > { %v9204_v35 = vpop.f32.mrb[28].mxu1 }
 0x775   : > { %v9206_v48 = vpop.f32.mrb[29].mxu1  ;;  %v5156_v50 = vsel %vm5116_vm15, %v9204_v35, -inf }
 0x776   : > { %5157 = vmax.xlane.f32.xlu1 %v5156_v50  ;;  %v5153_v63 = vsel %vm5116_vm15, %v9206_v48, -inf }
 0x77a   : > { %5154 = vmax.xlane.f32.xlu1 %v5153_v63  ;;  %v7298_v63 = vmov 0.0|0.0  }
 0x77b   : > { %6535 = vmatprep.subr.bf16.mxu0 %v7298_v63 }
 0x77c   : > { %v9212_v23 = vpop.f32.mrb[30].mxu1 }
 0x77d   : > { %v9214_v58 = vpop.f32.mrb[31].mxu1  ;;  %v5162_v7 = vsel %vm5116_vm15, %v9212_v23, -inf }
 0x77e   : > { %v5159_v32 = vsel %vm5116_vm15, %v9214_v58, -inf }
 0x77f   : > { %5160 = vmax.xlane.f32.xlu1 %v5159_v32 }
 0x783   : > { %5163 = vmax.xlane.f32.xlu1 %v5162_v7 }
 0x7d3   : > { %v5122_v59 = vpop.xlane.xlu1 %5121 }
 0x7d4   : > { %v5166_v36 = vsub.f32 %v6438_v20, %v5122_v59  ;;  %v5119_v56 = vpop.xlane.xlu0 %5118 }
 0x7d5   : > { %v5165_v62 = vsub.f32 %v5037_v17, %v5119_v56 }
 0x7d6   : > { %v5183_v51 = vmul.f32 1.442695, %v5166_v36 }
 0x7d7   : > { %v5181_v60 = vmul.f32 1.442695, %v5165_v62 }
 0x7d8   : > { %6753 = vpow2.f32 %v5183_v51 }
 0x7d9   : > { %6755 = vpow2.f32 %v5181_v60 }
 0x7db   : > { %v5128_v4 = vpop.xlane.xlu1 %5127 }
 0x7dc   : > { %v5168_v28 = vsub.f32 %v6441_v14, %v5128_v4 }
 0x7de   : > { %v5187_v21 = vmul.f32 1.442695, %v5168_v28 }
 0x7df   : > { %v5125_v57 = vpop.xlane.xlu1 %5124 }
 0x7e0   : > { %6757 = vpow2.f32 %v5187_v21  ;;  %v5167_v52 = vsub.f32 %v5047_v0, %v5125_v57 }
 0x7e2   : > { %v9220_v33 = vpop.eup %6753  ;;  %v5185_v25 = vmul.f32 1.442695, %v5167_v52 }
 0x7e3   : > { %v5134_v6 = vpop.xlane.xlu1 %5133  ;;  %v5216_v1 = vsel %vm5116_vm15, %v9220_v33, 0.0  ;;  %v9224_v8 = vpop.eup %6755 }
 0x7e4   : > { %6759 = vpow2.f32 %v5185_v25  ;;  %v5170_v31 = vsub.f32 %v6444_v45, %v5134_v6  ;;  %5217 = vadd.xlane.f32.xlu1 %v5216_v1  ;;  %v5213_v18 = vsel %vm5116_vm15, %v9224_v8, 0.0 }
 0x7e6   : > { %v5191_v41 = vmul.f32 1.442695, %v5170_v31 }
 0x7e7   : > { %v5131_v42 = vpop.xlane.xlu1 %5130 }
 0x7e8   : > { %6761 = vpow2.f32 %v5191_v41  ;;  %v5169_v29 = vsub.f32 %v9175_v30, %v5131_v42  ;;  %5214 = vadd.xlane.f32.xlu1 %v5213_v18  ;;  %v7300_v18 = vmov 0.0  }
 0x7e9   : > { %6492 = vmatprep.mubr.msk.f32.mxu0 %vm7299_vm0, %v7300_v18 }
 0x7ea   : > { %v9229_v54 = vpop.eup %6757  ;;  %v5189_v26 = vmul.f32 1.442695, %v5169_v29  ;;  %v5294_v29 = vld [vmem:[#allocation21] sm:$0xff] }
 0x7eb   : > { %v5140_v43 = vpop.xlane.xlu1 %5139  ;;  %v5222_v12 = vsel %vm5116_vm15, %v9229_v54, 0.0 }
 0x7ec   : > { %6763 = vpow2.f32 %v5189_v26  ;;  %v5172_v39 = vsub.f32 %v9180_v34, %v5140_v43  ;;  %5223 = vadd.xlane.f32.xlu1 %v5222_v12  ;;  %v7301_v26 = vmov 0  }
 0x7ed   : > { %6751 = vset.pattern.permute.xlu1 %v7301_v26  ;;  %6752 = vset.pattern.permute.xlu0 %v7301_v26 }
 0x7ee   : > { %v9234_v2 = vpop.eup %6759  ;;  %v5195_v16 = vmul.f32 1.442695, %v5172_v39 }
 0x7ef   : > { %v5137_v27 = vpop.xlane.xlu1 %5136  ;;  %v5219_v22 = vsel %vm5116_vm15, %v9234_v2, 0.0 }
 0x7f0   : > { %6765 = vpow2.f32 %v5195_v16  ;;  %v5171_v40 = vsub.f32 %v9182_v37, %v5137_v27  ;;  %5220 = vadd.xlane.f32.xlu1 %v5219_v22 }
 0x7f2   : > { %v9239_v61 = vpop.eup %6761  ;;  %v5193_v20 = vmul.f32 1.442695, %v5171_v40 }
 0x7f3   : > { %v5146_v17 = vpop.xlane.xlu1 %5145  ;;  %v5228_v9 = vsel %vm5116_vm15, %v9239_v61, 0.0 }
 0x7f4   : > { %6767 = vpow2.f32 %v5193_v20  ;;  %v5174_v53 = vsub.f32 %v9188_v19, %v5146_v17  ;;  %5229 = vadd.xlane.f32.xlu1 %v5228_v9 }
 0x7f6   : > { %v9244_v14 = vpop.eup %6763  ;;  %v5199_v0 = vmul.f32 1.442695, %v5174_v53 }
 0x7f7   : > { %v5143_v47 = vpop.xlane.xlu1 %5142  ;;  %v5225_v5 = vsel %vm5116_vm15, %v9244_v14, 0.0 }
 0x7f8   : > { %6769 = vpow2.f32 %v5199_v0  ;;  %v5173_v45 = vsub.f32 %v9190_v15, %v5143_v47  ;;  %5226 = vadd.xlane.f32.xlu1 %v5225_v5 }
 0x7fa   : > { %v9249_v30 = vpop.eup %6765  ;;  %v5197_v11 = vmul.f32 1.442695, %v5173_v45 }
 0x7fb   : > { %v5152_v24 = vpop.xlane.xlu1 %5151  ;;  %v5234_v34 = vsel %vm5116_vm15, %v9249_v30, 0.0 }
 0x7fc   : > { %6771 = vpow2.f32 %v5197_v11  ;;  %5235 = vadd.xlane.f32.xlu1 %v5234_v34  ;;  %v5176_v49 = vsub.f32 %v9196_v55, %v5152_v24 }
 0x7fe   : > { %v9253_v37 = vpop.eup %6767  ;;  %v5203_v38 = vmul.f32 1.442695, %v5176_v49 }
 0x7ff   : > { %v5149_v13 = vpop.xlane.xlu1 %5148  ;;  %v5231_v19 = vsel %vm5116_vm15, %v9253_v37, 0.0 }
 0x800   : > { %v5175_v15 = vsub.f32 %v9198_v44, %v5149_v13  ;;  %5232 = vadd.xlane.f32.xlu1 %v5231_v19 }
 0x802   : > { %v9259_v10 = vpop.eup %6769  ;;  %v5201_v3 = vmul.f32 1.442695, %v5175_v15 }
 0x803   : > { %v5158_v46 = vpop.xlane.xlu1 %5157  ;;  %v5240_v50 = vsel %vm5116_vm15, %v9259_v10, 0.0 }
 0x804   : > { %6773 = vpow2.f32 %v5201_v3  ;;  %v5178_v55 = vsub.f32 %v9204_v35, %v5158_v46  ;;  %5241 = vadd.xlane.f32.xlu1 %v5240_v50 }
 0x805   : > { %6775 = vpow2.f32 %v5203_v38 }
 0x806   : > { %v9265_v32 = vpop.eup %6771  ;;  %v5207_v44 = vmul.f32 1.442695, %v5178_v55 }
 0x807   : > { %v5155_v7 = vpop.xlane.xlu1 %5154  ;;  %v5237_v59 = vsel %vm5116_vm15, %v9265_v32, 0.0 }
 0x808   : > { %6777 = vpow2.f32 %v5207_v44  ;;  %v5177_v36 = vsub.f32 %v9206_v48, %v5155_v7  ;;  %5238 = vadd.xlane.f32.xlu1 %v5237_v59 }
 0x80a   : > { %v5205_v56 = vmul.f32 1.442695, %v5177_v36 }
 0x80c   : > { %6779 = vpow2.f32 %v5205_v56  ;;  %v5161_v62 = vpop.xlane.xlu1 %5160 }
 0x80d   : > { %v5179_v51 = vsub.f32 %v9214_v58, %v5161_v62 }
 0x80e   : > { %v9271_v60 = vpop.eup %6773 }
 0x80f   : > { %v5209_v35 = vmul.f32 1.442695, %v5179_v51  ;;  %v5243_v4 = vsel %vm5116_vm15, %v9271_v60, 0.0  ;;  %v9275_v28 = vpop.eup %6775 }
 0x810   : > { %5244 = vadd.xlane.f32.xlu1 %v5243_v4  ;;  %v5164_v21 = vpop.xlane.xlu1 %5163  ;;  %v5246_v58 = vsel %vm5116_vm15, %v9275_v28, 0.0 }
 0x811   : > { %6781 = vpow2.f32 %v5209_v35  ;;  %v5180_v57 = vsub.f32 %v9212_v23, %v5164_v21 }
 0x812   : > { %v9278_v48 = vpop.eup %6777 }
 0x813   : > { %v5211_v52 = vmul.f32 1.442695, %v5180_v57  ;;  %v5252_v25 = vsel %vm5116_vm15, %v9278_v48, 0.0 }
 0x814   : > { %5253 = vadd.xlane.f32.xlu0 %v5252_v25  ;;  %5247 = vadd.xlane.f32.xlu1 %v5246_v58 }
 0x815   : > { %6783 = vpow2.f32 %v5211_v52 }
 0x816   : > { %v9284_v6 = vpop.eup %6779 }
 0x817   : > { %v5249_v1 = vsel %vm5116_vm15, %v9284_v6, 0.0 }
 0x818   : > { %5250 = vadd.xlane.f32.xlu1 %v5249_v1 }
 0x81b   : > { %v9288_v31 = vpop.eup %6781 }
 0x81c   : > { %v5255_v23 = vsel %vm5116_vm15, %v9288_v31, 0.0 }
 0x81d   : > { %5256 = vadd.xlane.f32.xlu1 %v5255_v23 }
 0x81f   : > { %v9292_v41 = vpop.eup %6783 }
 0x820   : > { %v5258_v42 = vsel %vm5116_vm15, %v9292_v41, 0.0 }
 0x821   : > { %5259 = vadd.xlane.f32.xlu0 %v5258_v42 }
 0x82e   : > { %5297 = vperm.xlu1 %6751, %v5294_v29  }
 0x871   : > { %v5218_v43 = vpop.xlane.xlu1 %5217 }
 0x872   : > { %6785 = vrcp.f32 %v5218_v43 }
 0x875   : > { %v5215_v12 = vpop.xlane.xlu1 %5214 }
 0x876   : > { %6787 = vrcp.f32 %v5215_v12 }
 0x879   : > { %v5224_v39 = vpop.xlane.xlu1 %5223 }
 0x87a   : > { %6789 = vrcp.f32 %v5224_v39 }
 0x87c   : > { %v6786_v16 = vpop.eup %6785 }
 0x87d   : > { %v5221_v27 = vpop.xlane.xlu1 %5220  ;;  %v5278_v22 = vmul.f32 %v6786_v16, %v9220_v33 }
 0x87e   : > { %6791 = vrcp.f32 %v5221_v27 }
 0x87f   : > { %5425 = vst.msk [vmem:[%s7752_s8 + $0x8] sm:$0xff] %vm5116_vm15, %v5278_v22 }
 0x880   : > { %v6788_v40 = vpop.eup %6787 }
 0x881   : > { %v5230_v20 = vpop.xlane.xlu1 %5229  ;;  %v5277_v17 = vmul.f32 %v6788_v40, %v9224_v8 }
 0x882   : > { %6793 = vrcp.f32 %v5230_v20 }
 0x883   : > { %v6536_v53 = vpack.c.bf16 %v5278_v22, %v5277_v17  ;;  %5424 = vst.msk [vmem:[%s7752_s8] sm:$0xff] %vm5116_vm15, %v5277_v17 }
 0x884   : > { %v6790_v33 = vpop.eup %6789 }
 0x885   : > { %6538 = vmatpush3.bf16.xpose.msk.msra.mxu0 %vm9302_vm1, %v6536_v53  ;;  %v5227_v0 = vpop.xlane.xlu1 %5226  ;;  %v5280_v47 = vmul.f32 %v6790_v33, %v9229_v54 }
 0x886   : > { %6795 = vrcp.f32 %v5227_v0  ;;  %6539 = vmatprep.subr.bf16.mxu0 %v7298_v63 }
 0x887   : > { %5427 = vst.msk [vmem:[%s7752_s8 + $0x18] sm:$0xff] %vm5116_vm15, %v5280_v47 }
 0x888   : > { %v6792_v8 = vpop.eup %6791 }
 0x889   : > { %v5236_v5 = vpop.xlane.xlu1 %5235  ;;  %v5279_v45 = vmul.f32 %v6792_v8, %v9234_v2 }
 0x88a   : > { %6797 = vrcp.f32 %v5236_v5 }
 0x88b   : > { %v6540_v11 = vpack.c.bf16 %v5280_v47, %v5279_v45  ;;  %5426 = vst.msk [vmem:[%s7752_s8 + $0x10] sm:$0xff] %vm5116_vm15, %v5279_v45 }
 0x88c   : > { %v6794_v24 = vpop.eup %6793 }
 0x88d   : > { %6542 = vmatpush3.bf16.xpose.msk.msra.mxu0 %vm9302_vm1, %v6540_v11  ;;  %v5233_v54 = vpop.xlane.xlu1 %5232  ;;  %v5282_v34 = vmul.f32 %v6794_v24, %v9239_v61 }
 0x88e   : > { %6799 = vrcp.f32 %v5233_v54  ;;  %6543 = vmatprep.subr.bf16.mxu0 %v7298_v63 }
 0x88f   : > { %5429 = vst.msk [vmem:[%s7752_s8 + $0x28] sm:$0xff] %vm5116_vm15, %v5282_v34 }
 0x890   : > { %v6796_v49 = vpop.eup %6795 }
 0x891   : > { %v5242_v2 = vpop.xlane.xlu1 %5241  ;;  %v5281_v13 = vmul.f32 %v6796_v49, %v9244_v14 }
 0x892   : > { %6801 = vrcp.f32 %v5242_v2 }
 0x893   : > { %v6544_v19 = vpack.c.bf16 %v5282_v34, %v5281_v13  ;;  %5428 = vst.msk [vmem:[%s7752_s8 + $0x20] sm:$0xff] %vm5116_vm15, %v5281_v13 }
 0x894   : > { %v6798_v15 = vpop.eup %6797 }
 0x895   : > { %6546 = vmatpush3.bf16.xpose.msk.msra.mxu0 %vm9302_vm1, %v6544_v19  ;;  %v5239_v61 = vpop.xlane.xlu1 %5238  ;;  %v5284_v38 = vmul.f32 %v6798_v15, %v9249_v30 }
 0x896   : > { %6803 = vrcp.f32 %v5239_v61  ;;  %6547 = vmatprep.subr.bf16.mxu0 %v7298_v63 }
 0x897   : > { %5431 = vst.msk [vmem:[%s7752_s8 + $0x38] sm:$0xff] %vm5116_vm15, %v5284_v38 }
 0x898   : > { %v6800_v3 = vpop.eup %6799 }
 0x899   : > { %v5283_v14 = vmul.f32 %v6800_v3, %v9253_v37 }
 0x89b   : > { %v6548_v46 = vpack.c.bf16 %v5284_v38, %v5283_v14  ;;  %5430 = vst.msk [vmem:[%s7752_s8 + $0x30] sm:$0xff] %vm5116_vm15, %v5283_v14 }
 0x89c   : > { %v6802_v50 = vpop.eup %6801 }
 0x89d   : > { %6550 = vmatpush3.bf16.xpose.msk.msra.mxu0 %vm9302_vm1, %v6548_v46  ;;  %v5245_v55 = vpop.xlane.xlu1 %5244  ;;  %v5286_v44 = vmul.f32 %v6802_v50, %v9259_v10 }
 0x89e   : > { %6805 = vrcp.f32 %v5245_v55  ;;  %6551 = vmatprep.subr.bf16.mxu0 %v7298_v63 }
 0x89f   : > { %5433 = vst.msk [vmem:[%s7752_s8 + $0x48] sm:$0xff] %vm5116_vm15, %v5286_v44 }
 0x8a0   : > { %v6804_v30 = vpop.eup %6803 }
 0x8a1   : > { %v5254_v7 = vpop.xlane.xlu0 %5253  ;;  %v5248_v37 = vpop.xlane.xlu1 %5247  ;;  %v5285_v59 = vmul.f32 %v6804_v30, %v9265_v32 }
 0x8a2   : > { %6807 = vrcp.f32 %v5254_v7 }
 0x8a3   : > { %6809 = vrcp.f32 %v5248_v37  ;;  %v6552_v36 = vpack.c.bf16 %v5286_v44, %v5285_v59  ;;  %5432 = vst.msk [vmem:[%s7752_s8 + $0x40] sm:$0xff] %vm5116_vm15, %v5285_v59 }
 0x8a5   : > { %6554 = vmatpush3.bf16.xpose.msk.msra.mxu0 %vm9302_vm1, %v6552_v36  ;;  %v5251_v10 = vpop.xlane.xlu1 %5250 }
 0x8a6   : > { %6811 = vrcp.f32 %v5251_v10  ;;  %6555 = vmatprep.subr.bf16.mxu0 %v7298_v63 }
 0x8a8   : > { %v6806_v56 = vpop.eup %6805 }
 0x8a9   : > { %v5287_v62 = vmul.f32 %v6806_v56, %v9271_v60 }
 0x8aa   : > { %v5257_v51 = vpop.xlane.xlu1 %5256 }
 0x8ab   : > { %6813 = vrcp.f32 %v5257_v51  ;;  %5434 = vst.msk [vmem:[%s7752_s8 + $0x50] sm:$0xff] %vm5116_vm15, %v5287_v62 }
 0x8ac   : > { %v6808_v32 = vpop.eup %6807 }
 0x8ad   : > { %v6810_v35 = vpop.eup %6809  ;;  %v5290_v4 = vmul.f32 %v6808_v32, %v9278_v48 }
 0x8ae   : > { %v5260_v21 = vpop.xlane.xlu0 %5259  ;;  %v5288_v57 = vmul.f32 %v6810_v35, %v9275_v28 }
 0x8af   : > { %6815 = vrcp.f32 %v5260_v21  ;;  %5437 = vst.msk [vmem:[%s7752_s8 + $0x68] sm:$0xff] %vm5116_vm15, %v5290_v4 }
 0x8b0   : > { %v6812_v52 = vpop.eup %6811  ;;  %v6556_v25 = vpack.c.bf16 %v5288_v57, %v5287_v62  ;;  %5435 = vst.msk [vmem:[%s7752_s8 + $0x58] sm:$0xff] %vm5116_vm15, %v5288_v57 }
 0x8b1   : > { %v5289_v60 = vmul.f32 %v6812_v52, %v9284_v6 }
 0x8b2   : > { %6558 = vmatpush3.bf16.xpose.msk.msra.mxu0 %vm9302_vm1, %v6556_v25 }
 0x8b3   : > { %6559 = vmatprep.subr.bf16.mxu0 %v7298_v63  ;;  %5436 = vst.msk [vmem:[%s7752_s8 + $0x60] sm:$0xff] %vm5116_vm15, %v5289_v60  ;;  %v6560_v58 = vpack.c.bf16 %v5290_v4, %v5289_v60 }
 0x8b5   : > { %v6814_v28 = vpop.eup %6813 }
 0x8b6   : > { %v5291_v48 = vmul.f32 %v6814_v28, %v9288_v31  ;;  %v5293_v31 = vld [vmem:[#allocation5] sm:$0xff] }
 0x8b8   : > { %5438 = vst.msk [vmem:[%s7752_s8 + $0x70] sm:$0xff] %vm5116_vm15, %v5291_v48 }
 0x8b9   : > { %v6816_v1 = vpop.eup %6815 }
 0x8ba   : > { %6562 = vmatpush3.bf16.xpose.msk.msra.mxu0 %vm9302_vm1, %v6560_v58  ;;  %v5292_v6 = vmul.f32 %v6816_v1, %v9292_v41 }
 0x8bb   : > { %6563 = vmatprep.subr.bf16.mxu0 %v7298_v63 }
 0x8bc   : > { %5439 = vst.msk [vmem:[%s7752_s8 + $0x78] sm:$0xff] %vm5116_vm15, %v5292_v6  ;;  %v6564_v23 = vpack.c.bf16 %v5292_v6, %v5291_v48  ;;  %s7131_s8 = scalar_lea.vmem %s7130_s10, 4096 }
 0x8bd   : > { %p7133_p7 = scmp.lt.s32.totalorder %s7131_s8, %s7125_s19 }
 0x8bf   : > { %p7134_p8 = por %p7133_p7, %p7132_p11 }
 0x8c1   : > { %p7135_p2 = pnand %p7134_p8, %p7128_p5 }
 0x8c2   : > { %6566 = vmatpush3.bf16.xpose.msk.msra.mxu0 %vm9302_vm1, %v6564_v23 }
 0x8c9   : > { %6493 = vmatmul.mubr.msk.f32.vlgmr.msra.gmra.mrb[0].mxu0 %vm5116_vm15, %v5293_v31 }
 0x8ca   : > { %7138 = shalt.err (!%p7135_p2)
}
 0x8cb   : > { %s7139_s7 = scalar_lea.hbm %s9382_s6, 2048  ;;  %s7143_s4 = scalar_lea.hbm %s9646_s29, 8192 }
 0x8cc   : > { %p7140_p6 = scmp.ne.s32.totalorder %s9382_s6, %s7139_s7  ;;  %p7144_p3 = scmp.lt.u32.totalorder %s9382_s6, %s9646_s29 }
 0x8cd   : > { %p7145_p10 = scmp.lt.u32.totalorder %s7143_s4, %s7139_s7  ;;  %p7147_p4 = scmp.lt.u32.totalorder %s7139_s7, %s9382_s6 }
 0x8ce   : > { %p7141_p9 = pnand %p7140_p6, %p9647_p0 }
 0x8cf   : > { %p7146_p12 = por %p7145_p10, %p7144_p3 }
 0x8d0   : > { %p7142_p1 = pneg %p7141_p9 }
 0x8d1   : > { %p7148_p13 = por %p7147_p4, %p7146_p12 }
 0x8d3   : > { %p7149_p5 = pnand %p7148_p13, %p7142_p1 }
 0x8d5   : > { %7152 = shalt.err (!%p7149_p5)
}
 0x8d6   : > { %s7303_s19 = smov 128   ;;  %s7304_s10 = smov 8   ;;  %v5298_v63 = vpop.permute.xlu1 %5297 }
 0x8d7   : > { %6604 = dma.vmem_to_hbm [thread:$0]  (%p9647_p0), %s9377_s16, 2048, %s9382_s6, %s5446_s11, %s7303_s19, %s7303_s19, %s7304_s10  }
 0x8d8   : > { %s6133_s8 = sshll.u32 %s9645_s3, 1  ;;  %s9648_s20 = scalar_lea.vmem [#allocation9], %s7716_s12 }
 0x8d9   : > { %s5457_s7 = sadd.s32 %s9644_s24, %s6133_s8  ;;  %v5421_v42 = vld [vmem:[%s9648_s20] sm:$0xff]  ;;  %s9649_s4 = scalar_lea.vmem [#allocation23], %s7716_s12 }
 0x8da   : > { %s6134_s15 = sshll.u32 %s5457_s7, 7  ;;  %s5461_s2 = sshll.u32 %s9649_s4, 4  ;;  %s9419_s2 = int_to_ptr.vmem [resolvable:$true] %s5461_s2 }
 0x8db   : > { %s9650_s1 = sld [smem:[#allocation78_spill]]  ;;  %s9651_s3 = smov %s9649_s4 }
 0x8dc   : > { %s5441_s24 = scalar_lea.sflag [#allocation8], %s7713_s9  ;;  %s7153_s16 = scalar_lea.vmem %s9419_s2, 128 }
 0x8dd   : > { %p7154_p11 = scmp.ne.s32.totalorder %s9419_s2, %s7153_s16  ;;  %s7305_s6 = smov [#allocation23]  }
 0x8de   : > { %s7157_s11 = sshll.u32 %s7305_s6, 4  ;;  %s7158_s11 = int_to_ptr.vmem [resolvable:$false] %s7157_s11 }
 0x8df   : > { %p7155_p7 = pnand %p7154_p11, %p9647_p0  ;;  %s7159_s19 = scalar_lea.vmem %s7158_s11, 256 }
 0x8e0   : > { %p7160_p2 = scmp.lt.s32.totalorder %s9419_s2, %s7158_s11  ;;  %p7161_p6 = scmp.lt.s32.totalorder %s7159_s19, %s7153_s16 }
 0x8e1   : > { %s9417_s18 = scalar_lea.hbm %s9650_s1, %s6134_s15  ;;  %p7156_p8 = pneg %p7155_p7 }
 0x8e2   : > { %p7162_p9 = por %p7161_p6, %p7160_p2 }
 0x8e4   : > { %p7163_p1 = pnand %p7162_p9, %p7156_p8 }
 0x99c   : > { %v5417_v41 = vpop.f32.mrb[0].mxu0 }
 0x99d   : > { %v5418_v18 = vadd.f32 %v5417_v41, %v5298_v63  ;;  %v6494_v29 = vpop.f32.mrb[1].mxu0 }
 0x99f   : > { %v5422_v26 = vadd.f32 %v5421_v42, %v5418_v18 }
 0x9a1   : > { %5423 = vst [vmem:[%s9651_s3] sm:$0xff] %v5422_v26 }
 0x9a2   : > { %7166 = shalt.err (!%p7163_p1)
}
 0x9a3   : > { %s7167_s0 = scalar_lea.hbm %s9417_s18, 128  ;;  %s7171_s10 = scalar_lea.hbm %s9650_s1, 512 }
 0x9a4   : > { %p7168_p3 = scmp.ne.s32.totalorder %s9417_s18, %s7167_s0  ;;  %p7172_p4 = scmp.lt.u32.totalorder %s9417_s18, %s9650_s1 }
 0x9a5   : > { %p7173_p13 = scmp.lt.u32.totalorder %s7171_s10, %s7167_s0  ;;  %p7175_p11 = scmp.lt.u32.totalorder %s7167_s0, %s9417_s18 }
 0x9a6   : > { %p7169_p10 = pnand %p7168_p3, %p9647_p0 }
 0x9a7   : > { %p7174_p5 = por %p7173_p13, %p7172_p4 }
 0x9a8   : > { %p7170_p12 = pneg %p7169_p10 }
 0x9a9   : > { %p7176_p7 = por %p7175_p11, %p7174_p5 }
 0x9ab   : > { %p7177_p8 = pnand %p7176_p7, %p7170_p12 }
 0x9ad   : > { %7180 = shalt.err (!%p7177_p8)
}
 0x9ae   : > { %6603 = dma.vmem_to_hbm [thread:$0]  (%p9647_p0), %s9419_s2, 128, %s9417_s18, %s5441_s24  }
 0x9af PF: > { %p6663_p2 = scmp.ge.s32.totalorder %s7281_s28, 2  ;;  %s5491_s20 = sand.u32 1, %s7253_s21  }
 0x9b0   : > { %p9652_p6 = scmp.ne.s32.totalorder %s9532_s30, 0  ;;  %s5492_s15 = scalar_lea.sflag [#allocation8], %s5491_s20 }
 0x9b2   : > { %p6640_p9 = pnand %p6663_p2, %p9652_p6 }
 0x9b4   : > { %7244 = dma.done.wait (!%p6640_p9), %s5492_s15, 128  }
 0x9b5   : > { %7246 = vsyncadd (!%p6640_p9), %s5492_s15, 4294967168  ;;  %s5501_s4 = scalar_lea.sflag [#allocation25], %s5491_s20 }
 0x9b6   : > { %7248 = dma.done.wait (!%p6640_p9), %s5501_s4, 2048  }
 0x9b7   : > { %7250 = vsyncadd (!%p6640_p9), %s5501_s4, 4294965248  ;;  %s39_s28 = sadd.s32 1, %s7281_s28   ;;  %s9653_s21 = smov %s7257_s22 }
 0x9b8   : > { %p36_p1 = scmp.ge.s32.totalorder %s39_s28, 6   ;;  %s9654_s22 = smov %s7261_s23 }
 0x9b9   : > { %s9655_s23 = smov %s7636_s25  ;;  %s9656_s24 = smov %s7273_s26 }
 0x9ba   : > { %s9657_s25 = smov %s7277_s27  ;;  %s9658_s26 = smov %s9661_s13 }
 0x9bb   : > { %s9659_s27 = smov %s9665_s17  ;;  %38 = sbr.rel (!%p36_p1) target bundleno = 29 (0x1d), region = 176 }
 0x9c2   :  { %5506 = vsyncpa [#allocation7], 1 }
 0x9c3   :  { %5508 = vsyncpa [#allocation7 + $0x1], 1 }
 0x9c4   :  { %5509 = vsyncpa [#allocation10], 1 }
 0x9c5   :  { %5511 = vsyncpa [#allocation10 + $0x1], 1 }
 0x9c6   :  { %5512 = vsyncpa [#allocation13], 1 }
 0x9c7   :  { %5513 = vsyncpa [#allocation16], 1 }
 0x9c8   :  { %5514 = vsyncpa [#allocation19], 1 }
 0x9c9   :  { %5515 = vsyncpa [#allocation22], 1 }
 0x9ca   :  { %5516 = vsyncpa [#allocation8], 1 }
 0x9cb   :  { %5518 = vsyncpa [#allocation8 + $0x1], 1 }
 0x9cc   :  { %5519 = vsyncpa [#allocation25], 1 }
 0x9cd   :  { %5521 = vsyncpa [#allocation25 + $0x1], 1 }
 0x9ce   :  { %5522 = vsyncmov [#allocation3] }
 0x9d1   :  { %s5523_s14 = vpop.sfrf %5522 }
 0x9d2   :  { %p6140_p0 = scmp.ne.s32.totalorder %s5523_s14, 0 }
 0x9d4   :  { %5527 = shalt.err (%p6140_p0)  }

</bundles_post_ra>
